<compile_context>
chip_gen: v7x
topology: tpu7x:2x2x1
jax: 0.10.0
libtpu: 0.0.40
codegen_flags: <defaults>
</compile_context>

<pallas_src>
import functools

import jax
import jax.numpy as jnp
import numpy as np
from jax.experimental import pallas as pl
from jax.experimental.pallas import tpu as pltpu

# ----------------------- configuration (mirrors NFFB.__init__) -----------------------
INPUT_DIMS = 2
OUT_DIMS = 3
FEAT_DIM = 2                    # encoding_config["feat_dim"]
BASE_RES = 64                   # encoding_config["base_resolution"]
PER_LEVEL_SCALE = 2             # encoding_config["per_level_scale"]
BASE_SIGMA = 5.0                # encoding_config["base_sigma"]
EXP_SIGMA = 2.0                 # encoding_config["exp_sigma"]
GRID_STD = 0.01                 # encoding_config["grid_embedding_std"]
DIMS = [64, 64, 64, 64]         # network_config["dims"]  (SIREN branch)
W0 = 100.0                      # network_config["w0"]
W1 = 100.0                      # network_config["w1"]
GRID_LEVELS = len(DIMS) - 2     # = 2
ENC_OUT_DIM = DIMS[-1]          # = 64   (FFB_encoder.out_dim, has_out=True)
BACKBONE_DIMS = [ENC_OUT_DIM, 64, 64, OUT_DIMS]

D = DIMS[0]                          # 64  hidden width
FF_HALF = DIMS[2] // 2               # 32  unique Fourier args per level
S1_ROWS = D + GRID_LEVELS * FF_HALF  # 128 stage-1 output channels
U_ROWS = 8                           # [cx, cy, g0a, g0b, g1a, g1b, 1, 0]
OUT_ROWS = 8                         # final projection rows (3 used, 5 zero pad)


# --------------------- cheap sine: polynomial coefficients (import-time) ---------------------
def _fit_sincos_coeffs():
    """L2-fit odd/even polynomials for sin(pi*u), cos(pi*u) on u in [-1, 1].

    Max abs error < ~1e-6 — far inside the 5e-3 output tolerance even after
    amplification through the downstream SIREN layers."""
    u = np.linspace(-1.0, 1.0, 8193, dtype=np.float64)
    sin_basis = np.stack([u ** k for k in (1, 3, 5, 7, 9, 11)], axis=1)
    cos_basis = np.stack([u ** k for k in (0, 2, 4, 6, 8, 10)], axis=1)
    sc = np.linalg.lstsq(sin_basis, np.sin(np.pi * u), rcond=None)[0]
    cc = np.linalg.lstsq(cos_basis, np.cos(np.pi * u), rcond=None)[0]
    return tuple(float(v) for v in sc), tuple(float(v) for v in cc)


_SIN_C, _COS_C = _fit_sincos_coeffs()


def _range_reduce(t):
    """t -> (u, u*u) with u = 2*(t - round(t)) in [-1, 1]; sin(2*pi*t) == sin(pi*u)."""
    r = t - jnp.floor(t + 0.5)
    u = r + r
    return u, u * u


def _sin_pi(u, u2):
    p = _SIN_C[5]
    for c in (_SIN_C[4], _SIN_C[3], _SIN_C[2], _SIN_C[1], _SIN_C[0]):
        p = p * u2 + c
    return p * u


def _cos_pi(u2):
    p = _COS_C[5]
    for c in (_COS_C[4], _COS_C[3], _COS_C[2], _COS_C[1], _COS_C[0]):
        p = p * u2 + c
    return p


def _fast_sin2pi(t):
    u, u2 = _range_reduce(t)
    return _sin_pi(u, u2)


# ----------------------------------- Pallas kernel -----------------------------------
def nffb_kernel(u_ref, wf_ref, ws_ref, wo_ref, b_ref, out_ref):
    f32 = jnp.float32
    u = u_ref[...]                                                 # [8, TN]

    # Stage 1 (fused): SIREN layer 0 + both per-level Fourier-feature transforms
    # as one K=8 matmul (the bias rides on the constant ones-row of u).  Output
    # rows: 0..63 SIREN args, 64..95 level-0 Fourier args, 96..127 level-1
    # Fourier args.  Everything was pre-scaled by 1/(2*pi) so sin(2*pi*t) is
    # the target; sin/cos of the Fourier args share one range reduction.
    f = jnp.dot(wf_ref[...], u, preferred_element_type=f32)       # [128, TN]
    uu, u2 = _range_reduce(f)
    s_all = _sin_pi(uu, u2)                                        # sin of all 128 args
    x0 = s_all[0:D, :]                                             # SIREN layer-0 output
    sf = s_all[D:S1_ROWS, :]                                       # sin(ff), both levels
    cf = _cos_pi(u2[D:S1_ROWS, :])                                 # cos(ff), shared reduce
    gf0 = jnp.concatenate([sf[0:FF_HALF, :], cf[0:FF_HALF, :]], axis=0)   # [64, TN]
    gf1 = jnp.concatenate([sf[FF_HALF:, :], cf[FF_HALF:, :]], axis=0)     # [64, TN]

    # SIREN hidden layers (W1 and 1/(2*pi) pre-folded) + grid-feature injection.
    x1 = _fast_sin2pi(jnp.dot(ws_ref[0:D, :], x0, preferred_element_type=f32)
                      + b_ref[0:D, :]) + gf0
    x2 = _fast_sin2pi(jnp.dot(ws_ref[D:2 * D, :], x1, preferred_element_type=f32)
                      + b_ref[D:2 * D, :]) + gf1

    # Per-level out-linears (+ 1/levels mean + biases) composed with backbone L0,
    # as two accumulating K=64 matmuls, then ReLU.
    h = jnp.maximum(
        jnp.dot(ws_ref[2 * D:3 * D, :], x1, preferred_element_type=f32)
        + jnp.dot(ws_ref[3 * D:4 * D, :], x2, preferred_element_type=f32)
        + b_ref[2 * D:3 * D, :], 0.0)
    # Backbone layer 1 + ReLU.
    h = jnp.maximum(
        jnp.dot(ws_ref[4 * D:5 * D, :], h, preferred_element_type=f32)
        + b_ref[3 * D:4 * D, :], 0.0)
    # Final projection (3 rows zero-padded to 8) + clamp.
    o = (jnp.dot(wo_ref[...], h, preferred_element_type=f32)
         + b_ref[4 * D:4 * D + OUT_ROWS, :])
    out_ref[...] = jnp.clip(o, -1.0, 1.0)


# --------------------------------- JAX glue / wrapper ---------------------------------
def make_grid_tables(key):
    """Dense multi-resolution feature grids (res^2 << 2^19 -> no hashing needed)."""
    tables = []
    ks = jax.random.split(key, GRID_LEVELS)
    for li in range(GRID_LEVELS):
        r = int(BASE_RES * (PER_LEVEL_SCALE ** li))
        tab = jax.random.normal(ks[li], (r + 1, r + 1, FEAT_DIM), jnp.float32) * GRID_STD
        tables.append(tab)
    return tables


def make_params(key):
    ks = iter(jax.random.split(key, 40))

    def uni(k, shape, bound):
        return jax.random.uniform(k, shape, jnp.float32, -bound, bound)

    p = {}
    # SIREN first layer (2 -> 64): U(-1/in, 1/in)
    p["s0w"] = uni(next(ks), (INPUT_DIMS, DIMS[0]), 1.0 / INPUT_DIMS)
    p["s0b"] = uni(next(ks), (1, DIMS[0]), 1.0 / np.sqrt(INPUT_DIMS))
    # SIREN hidden layers: U(-sqrt(6/in)/w1, +)
    for li in range(GRID_LEVELS):
        fan_in = DIMS[li]
        p[f"s{li + 1}w"] = uni(next(ks), (DIMS[li], DIMS[li + 1]),
                               np.sqrt(6.0 / fan_in) / W1)
        p[f"s{li + 1}b"] = uni(next(ks), (1, DIMS[li + 1]), 1.0 / np.sqrt(fan_in))
    # Gaussian Fourier feature matrices: N(0, sigma_l) * 2*pi, sigma_l = 5 * 2^l
    for li in range(GRID_LEVELS):
        sigma = BASE_SIGMA * (EXP_SIGMA ** li)
        p[f"bf{li}"] = (jax.random.normal(next(ks), (FEAT_DIM, DIMS[li + 2] // 2))
                        * sigma * 2.0 * np.pi).astype(jnp.float32)
    # per-level output linears: dims[l+2] -> dims[-1]
    for li in range(GRID_LEVELS):
        fan_in = DIMS[li + 2]
        p[f"ow{li}"] = uni(next(ks), (fan_in, ENC_OUT_DIM), 1.0 / np.sqrt(fan_in))
        p[f"ob{li}"] = uni(next(ks), (1, ENC_OUT_DIM), 1.0 / np.sqrt(fan_in))
    # backbone linears
    for li in range(len(BACKBONE_DIMS) - 1):
        fi, fo = BACKBONE_DIMS[li], BACKBONE_DIMS[li + 1]
        p[f"b{li}w"] = uni(next(ks), (fi, fo), 1.0 / np.sqrt(fi))
        p[f"b{li}b"] = uni(next(ks), (1, fo), 1.0 / np.sqrt(fi))
    return p


def grid_features(coords, tables):
    """Per-level bilinear grid interpolation (gather + blend), in XLA glue.

    Returns g [N, GRID_LEVELS*FEAT_DIM] — the pre-blended per-level features."""
    # TODO(synk): fusing this gather into the kernel (scalar-prefetch cell ids +
    #             DMA gather) is the next end-to-end lever; left in glue for now.
    u01 = jnp.clip(coords, 0.0, 1.0)
    feats = []
    for tab in tables:
        r = tab.shape[0] - 1
        u = u01 * r
        i0 = jnp.clip(jnp.floor(u).astype(jnp.int32), 0, r - 1)
        f = u - i0.astype(jnp.float32)
        x0i, y0i = i0[:, 0], i0[:, 1]
        fx, fy = f[:, 0:1], f[:, 1:2]
        c00 = tab[x0i, y0i]
        c10 = tab[x0i + 1, y0i]
        c01 = tab[x0i, y0i + 1]
        c11 = tab[x0i + 1, y0i + 1]
        g = ((1 - fx) * (1 - fy)) * c00 + (fx * (1 - fy)) * c10 \
            + ((1 - fx) * fy) * c01 + (fx * fy) * c11                    # [N, F]
        feats.append(g)
    return jnp.concatenate(feats, axis=-1)


def pack_params(p):
    """One-time constant folding into 4 transposed (channels-first) weight slabs."""
    hi = jax.lax.Precision.HIGHEST
    inv2pi = 1.0 / (2.0 * np.pi)

    # Stage-1 weight [128, 8]; cols 0..5 = [cx, cy, g0, g1], col 6 = ones (bias), 7 = pad.
    # sin(W0*((2c-1)@s0w + s0b)) = sin(2*pi*(c@((W0/pi)*s0w) + (W0/2pi)*(s0b - colsum(s0w)))).
    s0w_eff = (W0 / np.pi) * p["s0w"]                                        # [2, 64]
    s0b_eff = (W0 * inv2pi) * (p["s0b"] - jnp.sum(p["s0w"], axis=0, keepdims=True))
    wf = jnp.zeros((S1_ROWS, U_ROWS), jnp.float32)
    wf = wf.at[0:D, 0:INPUT_DIMS].set(s0w_eff.T)
    wf = wf.at[0:D, 6].set(s0b_eff[0])
    wf = wf.at[D:D + FF_HALF, 2:4].set((p["bf0"] * inv2pi).T)               # level-0 args
    wf = wf.at[D + FF_HALF:S1_ROWS, 4:6].set((p["bf1"] * inv2pi).T)         # level-1 args

    # SIREN hidden layers, W1 and 1/(2*pi) folded, transposed to [out, in].
    ws1 = ((W1 * inv2pi) * p["s1w"]).T
    ws2 = ((W1 * inv2pi) * p["s2w"]).T
    b1 = ((W1 * inv2pi) * p["s1b"]).T                                        # [64, 1]
    b2 = ((W1 * inv2pi) * p["s2b"]).T

    # Per-level out-linears (+ 1/levels mean + biases) fused with backbone L0.
    a0 = (jnp.dot(p["ow0"], p["b0w"], precision=hi) / GRID_LEVELS).T         # [64, 64]
    a1 = (jnp.dot(p["ow1"], p["b0w"], precision=hi) / GRID_LEVELS).T
    c0 = (jnp.dot(p["ob0"] + p["ob1"], p["b0w"], precision=hi) / GRID_LEVELS
          + p["b0b"]).T                                                      # [64, 1]
    bb1 = p["b1w"].T
    c1 = p["b1b"].T

    # Final projection, zero-padded 3 -> 8 output rows (lane-dense [8, N] store).
    wo = jnp.zeros((OUT_ROWS, D), jnp.float32).at[0:OUT_DIMS, :].set(p["b2w"].T)
    c2 = jnp.zeros((OUT_ROWS, 1), jnp.float32).at[0:OUT_DIMS, :].set(p["b2b"].T)

    w_stack = jnp.concatenate([ws1, ws2, a0, a1, bb1], axis=0)               # [320, 64]
    biases = jnp.concatenate([b1, b2, c0, c1, c2], axis=0)                   # [264, 1]
    return wf, w_stack, wo, biases


@functools.partial(jax.jit, static_argnames=("tile_n",))
def nffb_forward(coords, packed, tables, tile_n=1024):
    wf, w_stack, wo, biases = packed
    n = coords.shape[0]
    g = grid_features(coords, tables)                             # [N, 4] bilinear blend
    ones = jnp.ones((n, 1), jnp.float32)
    zeros = jnp.zeros((n, 1), jnp.float32)
    # Transposed channels-on-sublanes slab: rows [cx, cy, g0a, g0b, g1a, g1b, 1, 0].
    u = jnp.concatenate([coords.astype(jnp.float32), g, ones, zeros], axis=-1).T  # [8, N]
    n_pad = pl.cdiv(n, tile_n) * tile_n
    if n_pad != n:
        u = jnp.pad(u, ((0, 0), (0, n_pad - n)))

    def full_spec(a):
        return pl.BlockSpec(a.shape, lambda i: (0, 0))

    macs = n_pad * (S1_ROWS * U_ROWS + 5 * D * D + OUT_ROWS * D)
    cost = pl.CostEstimate(
        flops=int(2 * macs + 5000 * n_pad),          # matmuls + sin/cos polynomial work
        transcendentals=0,                            # custom polynomial sine; no EUP calls
        bytes_accessed=int(4 * (u.size + OUT_ROWS * n_pad + wf.size + w_stack.size
                                + wo.size + biases.size)))

    out_t = pl.pallas_call(
        nffb_kernel,
        out_shape=jax.ShapeDtypeStruct((OUT_ROWS, n_pad), jnp.float32),
        grid_spec=pltpu.PrefetchScalarGridSpec(
            num_scalar_prefetch=0,
            grid=(n_pad // tile_n,),
            in_specs=[pl.BlockSpec((U_ROWS, tile_n), lambda i: (0, i)),
                      full_spec(wf), full_spec(w_stack),
                      full_spec(wo), full_spec(biases)],
            out_specs=pl.BlockSpec((OUT_ROWS, tile_n), lambda i: (0, i)),
        ),
        compiler_params=pltpu.CompilerParams(dimension_semantics=("parallel",)),
        cost_estimate=cost,
    )(u, wf, w_stack, wo, biases)
    return {"model_in": coords, "model_out": out_t[:OUT_DIMS, :n].T}


# ------------------------------- pure-JAX reference -----------------------------------
def ref_forward(coords, p, tables):
    hi = jax.lax.Precision.HIGHEST
    g = grid_features(coords, tables)
    x_in = (coords - 0.5) * 2.0
    x = jnp.sin(W0 * (jnp.dot(x_in, p["s0w"], precision=hi) + p["s0b"]))
    acc = jnp.zeros((coords.shape[0], ENC_OUT_DIM), jnp.float32)
    for l in range(GRID_LEVELS):
        gl = g[:, l * FEAT_DIM:(l + 1) * FEAT_DIM]
        ff = jnp.dot(gl, p[f"bf{l}"], precision=hi)
        grid_feat = jnp.concatenate([jnp.sin(ff), jnp.cos(ff)], axis=-1)
        x = jnp.sin(W1 * (jnp.dot(x, p[f"s{l + 1}w"], precision=hi) + p[f"s{l + 1}b"]))
        x = x + grid_feat
        acc = acc + jnp.dot(x, p[f"ow{l}"], precision=hi) + p[f"ob{l}"]
    enc = acc / GRID_LEVELS
    h = jax.nn.relu(jnp.dot(enc, p["b0w"], precision=hi) + p["b0b"])
    h = jax.nn.relu(jnp.dot(h, p["b1w"], precision=hi) + p["b1b"])
    h = jnp.dot(h, p["b2w"], precision=hi) + p["b2b"]
    return jnp.clip(h, -1.0, 1.0)


# --------------------------------------- main ------------------------------------------
if __name__ == "__main__":
    key = jax.random.PRNGKey(0)
    kp, kt, kc = jax.random.split(key, 3)
    params = make_params(kp)
    tables = make_grid_tables(kt)
    packed = pack_params(params)       # one-time weight fold, outside the per-call path

    N = 4096                           # 8 grid steps at tile_n=512 (>= 4 per v7x TensorCore)
    coords = jax.random.uniform(kc, (N, INPUT_DIMS), jnp.float32)   # xy in [0, 1]

    result = nffb_forward(coords, packed, tables, tile_n=512)
    out = jax.block_until_ready(result["model_out"])

    ref = ref_forward(coords, params, tables)
    err = float(jnp.max(jnp.abs(out - ref)))
    assert out.shape == (N, OUT_DIMS), out.shape
    assert bool(jnp.all(jnp.isfinite(out)))
    assert err < 5e-3, f"max abs err vs reference: {err}"
    print("KERNEL_OK")
</pallas_src>

<mosaic_0001>
module attributes {stable_mosaic.version = 11 : i64} {
  func.func private @main(%arg0: i32) attributes {dimension_semantics = [#tpu.dimension_semantics<core_parallel>], iteration_bounds = array<i64: 2>, tpu.core_type = #tpu.core_type<sc_scalar_subcore>, window_params = []} {
    return
  }
}

module attributes {stable_mosaic.version = 11 : i64} {
  func.func private @main(%arg0: i32) attributes {dimension_semantics = [#tpu.dimension_semantics<core_parallel>], iteration_bounds = array<i64: 2>, tpu.core_type = #tpu.core_type<sc_scalar_subcore>, window_params = []} {
    return
  }
}

module attributes {stable_mosaic.version = 11 : i64} {
  func.func @nffb_kernel(%arg0: i32, %arg1: memref<8x512xf32, #tpu.memory_space<vmem>>, %arg2: memref<128x8xf32, #tpu.memory_space<vmem>>, %arg3: memref<320x64xf32, #tpu.memory_space<vmem>>, %arg4: memref<8x64xf32, #tpu.memory_space<vmem>>, %arg5: memref<264x1xf32, #tpu.memory_space<vmem>>, %arg6: memref<8x512xf32, #tpu.memory_space<vmem>>) attributes {dimension_semantics = [#tpu.dimension_semantics<parallel>], iteration_bounds = array<i64: 8>, scalar_prefetch = 0 : i64, scratch_operands = 0 : i64, tpu.core_type = #tpu.core_type<tc>, window_params = [{transform_indices = @transform_0, window_bounds = array<i64: 8, 512>}, {pipeline_mode = #tpu.pipeline_mode<synchronous>, transform_indices = @transform_1, window_bounds = array<i64: 128, 8>}, {pipeline_mode = #tpu.pipeline_mode<synchronous>, transform_indices = @transform_2, window_bounds = array<i64: 320, 64>}, {pipeline_mode = #tpu.pipeline_mode<synchronous>, transform_indices = @transform_3, window_bounds = array<i64: 8, 64>}, {pipeline_mode = #tpu.pipeline_mode<synchronous>, transform_indices = @transform_4, window_bounds = array<i64: 264, 1>}, {transform_indices = @transform_5, window_bounds = array<i64: 8, 512>}]} {
    %c0 = arith.constant 0 : index
    %c0_0 = arith.constant 0 : index
    %0 = vector.load %arg1[%c0, %c0_0] : memref<8x512xf32, #tpu.memory_space<vmem>>, vector<8x512xf32>
    %c0_1 = arith.constant 0 : index
    %c0_2 = arith.constant 0 : index
    %1 = vector.load %arg2[%c0_1, %c0_2] : memref<128x8xf32, #tpu.memory_space<vmem>>, vector<128x8xf32>
    %cst = arith.constant dense<0.000000e+00> : vector<128x512xf32>
    %2 = tpu.matmul %1, %0, %cst {dimension_numbers = #tpu.dot_dimension_numbers<[1], [0], [0], [1], [0, 0, 1, 1], [], []>} : vector<128x8xf32>, vector<8x512xf32>, vector<128x512xf32> -> vector<128x512xf32>
    %cst_3 = arith.constant 5.000000e-01 : f32
    %3 = vector.broadcast %cst_3 : f32 to vector<128x512xf32>
    %4 = arith.addf %2, %3 : vector<128x512xf32>
    %5 = math.floor %4 : vector<128x512xf32>
    %6 = arith.subf %2, %5 : vector<128x512xf32>
    %7 = arith.addf %6, %6 : vector<128x512xf32>
    %8 = arith.mulf %7, %7 : vector<128x512xf32>
    %cst_4 = arith.constant -0.00604097499 : f32
    %9 = vector.broadcast %cst_4 : f32 to vector<128x512xf32>
    %10 = arith.mulf %9, %8 : vector<128x512xf32>
    %cst_5 = arith.constant 0.0806046575 : f32
    %11 = vector.broadcast %cst_5 : f32 to vector<128x512xf32>
    %12 = arith.addf %10, %11 : vector<128x512xf32>
    %13 = arith.mulf %12, %8 : vector<128x512xf32>
    %cst_6 = arith.constant -0.598397315 : f32
    %14 = vector.broadcast %cst_6 : f32 to vector<128x512xf32>
    %15 = arith.addf %13, %14 : vector<128x512xf32>
    %16 = arith.mulf %15, %8 : vector<128x512xf32>
    %cst_7 = arith.constant 2.54992652 : f32
    %17 = vector.broadcast %cst_7 : f32 to vector<128x512xf32>
    %18 = arith.addf %16, %17 : vector<128x512xf32>
    %19 = arith.mulf %18, %8 : vector<128x512xf32>
    %cst_8 = arith.constant -5.16768503 : f32
    %20 = vector.broadcast %cst_8 : f32 to vector<128x512xf32>
    %21 = arith.addf %19, %20 : vector<128x512xf32>
    %22 = arith.mulf %21, %8 : vector<128x512xf32>
    %cst_9 = arith.constant 3.14159179 : f32
    %23 = vector.broadcast %cst_9 : f32 to vector<128x512xf32>
    %24 = arith.addf %22, %23 : vector<128x512xf32>
    %25 = arith.mulf %24, %7 : vector<128x512xf32>
    %26 = vector.extract_strided_slice %25 {offsets = [0, 0], sizes = [64, 512], strides = [1, 1]} : vector<128x512xf32> to vector<64x512xf32>
    %27 = vector.extract_strided_slice %25 {offsets = [64, 0], sizes = [64, 512], strides = [1, 1]} : vector<128x512xf32> to vector<64x512xf32>
    %28 = vector.extract_strided_slice %8 {offsets = [64, 0], sizes = [64, 512], strides = [1, 1]} : vector<128x512xf32> to vector<64x512xf32>
    %cst_10 = arith.constant -0.0207833089 : f32
    %29 = vector.broadcast %cst_10 : f32 to vector<64x512xf32>
    %30 = arith.mulf %29, %28 : vector<64x512xf32>
    %cst_11 = arith.constant 0.230125248 : f32
    %31 = vector.broadcast %cst_11 : f32 to vector<64x512xf32>
    %32 = arith.addf %30, %31 : vector<64x512xf32>
    %33 = arith.mulf %32, %28 : vector<64x512xf32>
    %cst_12 = arith.constant -1.33274817 : f32
    %34 = vector.broadcast %cst_12 : f32 to vector<64x512xf32>
    %35 = arith.addf %33, %34 : vector<64x512xf32>
    %36 = arith.mulf %35, %28 : vector<64x512xf32>
    %cst_13 = arith.constant 4.05816269 : f32
    %37 = vector.broadcast %cst_13 : f32 to vector<64x512xf32>
    %38 = arith.addf %36, %37 : vector<64x512xf32>
    %39 = arith.mulf %38, %28 : vector<64x512xf32>
    %cst_14 = arith.constant -4.93475866 : f32
    %40 = vector.broadcast %cst_14 : f32 to vector<64x512xf32>
    %41 = arith.addf %39, %40 : vector<64x512xf32>
    %42 = arith.mulf %41, %28 : vector<64x512xf32>
    %cst_15 = arith.constant 0.999999463 : f32
    %43 = vector.broadcast %cst_15 : f32 to vector<64x512xf32>
    %44 = arith.addf %42, %43 : vector<64x512xf32>
    %45 = vector.extract_strided_slice %27 {offsets = [0, 0], sizes = [32, 512], strides = [1, 1]} : vector<64x512xf32> to vector<32x512xf32>
    %46 = vector.extract_strided_slice %44 {offsets = [0, 0], sizes = [32, 512], strides = [1, 1]} : vector<64x512xf32> to vector<32x512xf32>
    %47 = tpu.concatenate %45, %46 in 0 : vector<32x512xf32>, vector<32x512xf32> -> vector<64x512xf32>
    %48 = vector.extract_strided_slice %27 {offsets = [32, 0], sizes = [32, 512], strides = [1, 1]} : vector<64x512xf32> to vector<32x512xf32>
    %49 = vector.extract_strided_slice %44 {offsets = [32, 0], sizes = [32, 512], strides = [1, 1]} : vector<64x512xf32> to vector<32x512xf32>
    %50 = tpu.concatenate %48, %49 in 0 : vector<32x512xf32>, vector<32x512xf32> -> vector<64x512xf32>
    %c0_16 = arith.constant 0 : index
    %c0_17 = arith.constant 0 : index
    %51 = vector.load %arg3[%c0_16, %c0_17] : memref<320x64xf32, #tpu.memory_space<vmem>>, vector<64x64xf32>
    %cst_18 = arith.constant dense<0.000000e+00> : vector<64x512xf32>
    %52 = tpu.matmul %51, %26, %cst_18 {dimension_numbers = #tpu.dot_dimension_numbers<[1], [0], [0], [1], [0, 0, 1, 1], [], []>} : vector<64x64xf32>, vector<64x512xf32>, vector<64x512xf32> -> vector<64x512xf32>
    %c0_19 = arith.constant 0 : index
    %c0_20 = arith.constant 0 : index
    %53 = vector.load %arg5[%c0_19, %c0_20] : memref<264x1xf32, #tpu.memory_space<vmem>>, vector<64x1xf32>
    %54 = vector.broadcast %53 : vector<64x1xf32> to vector<64x512xf32>
    %55 = arith.addf %52, %54 : vector<64x512xf32>
    %cst_21 = arith.constant 5.000000e-01 : f32
    %56 = vector.broadcast %cst_21 : f32 to vector<64x512xf32>
    %57 = arith.addf %55, %56 : vector<64x512xf32>
    %58 = math.floor %57 : vector<64x512xf32>
    %59 = arith.subf %55, %58 : vector<64x512xf32>
    %60 = arith.addf %59, %59 : vector<64x512xf32>
    %61 = arith.mulf %60, %60 : vector<64x512xf32>
    %cst_22 = arith.constant -0.00604097499 : f32
    %62 = vector.broadcast %cst_22 : f32 to vector<64x512xf32>
    %63 = arith.mulf %62, %61 : vector<64x512xf32>
    %cst_23 = arith.constant 0.0806046575 : f32
    %64 = vector.broadcast %cst_23 : f32 to vector<64x512xf32>
    %65 = arith.addf %63, %64 : vector<64x512xf32>
    %66 = arith.mulf %65, %61 : vector<64x512xf32>
    %cst_24 = arith.constant -0.598397315 : f32
    %67 = vector.broadcast %cst_24 : f32 to vector<64x512xf32>
    %68 = arith.addf %66, %67 : vector<64x512xf32>
    %69 = arith.mulf %68, %61 : vector<64x512xf32>
    %cst_25 = arith.constant 2.54992652 : f32
    %70 = vector.broadcast %cst_25 : f32 to vector<64x512xf32>
    %71 = arith.addf %69, %70 : vector<64x512xf32>
    %72 = arith.mulf %71, %61 : vector<64x512xf32>
    %cst_26 = arith.constant -5.16768503 : f32
    %73 = vector.broadcast %cst_26 : f32 to vector<64x512xf32>
    %74 = arith.addf %72, %73 : vector<64x512xf32>
    %75 = arith.mulf %74, %61 : vector<64x512xf32>
    %cst_27 = arith.constant 3.14159179 : f32
    %76 = vector.broadcast %cst_27 : f32 to vector<64x512xf32>
    %77 = arith.addf %75, %76 : vector<64x512xf32>
    %78 = arith.mulf %77, %60 : vector<64x512xf32>
    %79 = arith.addf %78, %47 : vector<64x512xf32>
    %c64 = arith.constant 64 : index
    %c0_28 = arith.constant 0 : index
    %80 = vector.load %arg3[%c64, %c0_28] : memref<320x64xf32, #tpu.memory_space<vmem>>, vector<64x64xf32>
    %cst_29 = arith.constant dense<0.000000e+00> : vector<64x512xf32>
    %81 = tpu.matmul %80, %79, %cst_29 {dimension_numbers = #tpu.dot_dimension_numbers<[1], [0], [0], [1], [0, 0, 1, 1], [], []>} : vector<64x64xf32>, vector<64x512xf32>, vector<64x512xf32> -> vector<64x512xf32>
    %c64_30 = arith.constant 64 : index
    %c0_31 = arith.constant 0 : index
    %82 = vector.load %arg5[%c64_30, %c0_31] : memref<264x1xf32, #tpu.memory_space<vmem>>, vector<64x1xf32>
    %83 = vector.broadcast %82 : vector<64x1xf32> to vector<64x512xf32>
    %84 = arith.addf %81, %83 : vector<64x512xf32>
    %cst_32 = arith.constant 5.000000e-01 : f32
    %85 = vector.broadcast %cst_32 : f32 to vector<64x512xf32>
    %86 = arith.addf %84, %85 : vector<64x512xf32>
    %87 = math.floor %86 : vector<64x512xf32>
    %88 = arith.subf %84, %87 : vector<64x512xf32>
    %89 = arith.addf %88, %88 : vector<64x512xf32>
    %90 = arith.mulf %89, %89 : vector<64x512xf32>
    %cst_33 = arith.constant -0.00604097499 : f32
    %91 = vector.broadcast %cst_33 : f32 to vector<64x512xf32>
    %92 = arith.mulf %91, %90 : vector<64x512xf32>
    %cst_34 = arith.constant 0.0806046575 : f32
    %93 = vector.broadcast %cst_34 : f32 to vector<64x512xf32>
    %94 = arith.addf %92, %93 : vector<64x512xf32>
    %95 = arith.mulf %94, %90 : vector<64x512xf32>
    %cst_35 = arith.constant -0.598397315 : f32
    %96 = vector.broadcast %cst_35 : f32 to vector<64x512xf32>
    %97 = arith.addf %95, %96 : vector<64x512xf32>
    %98 = arith.mulf %97, %90 : vector<64x512xf32>
    %cst_36 = arith.constant 2.54992652 : f32
    %99 = vector.broadcast %cst_36 : f32 to vector<64x512xf32>
    %100 = arith.addf %98, %99 : vector<64x512xf32>
    %101 = arith.mulf %100, %90 : vector<64x512xf32>
    %cst_37 = arith.constant -5.16768503 : f32
    %102 = vector.broadcast %cst_37 : f32 to vector<64x512xf32>
    %103 = arith.addf %101, %102 : vector<64x512xf32>
    %104 = arith.mulf %103, %90 : vector<64x512xf32>
    %cst_38 = arith.constant 3.14159179 : f32
    %105 = vector.broadcast %cst_38 : f32 to vector<64x512xf32>
    %106 = arith.addf %104, %105 : vector<64x512xf32>
    %107 = arith.mulf %106, %89 : vector<64x512xf32>
    %108 = arith.addf %107, %50 : vector<64x512xf32>
    %c128 = arith.constant 128 : index
    %c0_39 = arith.constant 0 : index
    %109 = vector.load %arg3[%c128, %c0_39] : memref<320x64xf32, #tpu.memory_space<vmem>>, vector<64x64xf32>
    %cst_40 = arith.constant dense<0.000000e+00> : vector<64x512xf32>
    %110 = tpu.matmul %109, %79, %cst_40 {dimension_numbers = #tpu.dot_dimension_numbers<[1], [0], [0], [1], [0, 0, 1, 1], [], []>} : vector<64x64xf32>, vector<64x512xf32>, vector<64x512xf32> -> vector<64x512xf32>
    %c192 = arith.constant 192 : index
    %c0_41 = arith.constant 0 : index
    %111 = vector.load %arg3[%c192, %c0_41] : memref<320x64xf32, #tpu.memory_space<vmem>>, vector<64x64xf32>
    %cst_42 = arith.constant dense<0.000000e+00> : vector<64x512xf32>
    %112 = tpu.matmul %111, %108, %cst_42 {dimension_numbers = #tpu.dot_dimension_numbers<[1], [0], [0], [1], [0, 0, 1, 1], [], []>} : vector<64x64xf32>, vector<64x512xf32>, vector<64x512xf32> -> vector<64x512xf32>
    %113 = arith.addf %110, %112 : vector<64x512xf32>
    %c128_43 = arith.constant 128 : index
    %c0_44 = arith.constant 0 : index
    %114 = vector.load %arg5[%c128_43, %c0_44] : memref<264x1xf32, #tpu.memory_space<vmem>>, vector<64x1xf32>
    %115 = vector.broadcast %114 : vector<64x1xf32> to vector<64x512xf32>
    %116 = arith.addf %113, %115 : vector<64x512xf32>
    %cst_45 = arith.constant 0.000000e+00 : f32
    %117 = vector.broadcast %cst_45 : f32 to vector<64x512xf32>
    %118 = arith.maximumf %116, %117 : vector<64x512xf32>
    %c256 = arith.constant 256 : index
    %c0_46 = arith.constant 0 : index
    %119 = vector.load %arg3[%c256, %c0_46] : memref<320x64xf32, #tpu.memory_space<vmem>>, vector<64x64xf32>
    %cst_47 = arith.constant dense<0.000000e+00> : vector<64x512xf32>
    %120 = tpu.matmul %119, %118, %cst_47 {dimension_numbers = #tpu.dot_dimension_numbers<[1], [0], [0], [1], [0, 0, 1, 1], [], []>} : vector<64x64xf32>, vector<64x512xf32>, vector<64x512xf32> -> vector<64x512xf32>
    %c192_48 = arith.constant 192 : index
    %c0_49 = arith.constant 0 : index
    %121 = vector.load %arg5[%c192_48, %c0_49] : memref<264x1xf32, #tpu.memory_space<vmem>>, vector<64x1xf32>
    %122 = vector.broadcast %121 : vector<64x1xf32> to vector<64x512xf32>
    %123 = arith.addf %120, %122 : vector<64x512xf32>
    %cst_50 = arith.constant 0.000000e+00 : f32
    %124 = vector.broadcast %cst_50 : f32 to vector<64x512xf32>
    %125 = arith.maximumf %123, %124 : vector<64x512xf32>
    %c0_51 = arith.constant 0 : index
    %c0_52 = arith.constant 0 : index
    %126 = vector.load %arg4[%c0_51, %c0_52] : memref<8x64xf32, #tpu.memory_space<vmem>>, vector<8x64xf32>
    %cst_53 = arith.constant dense<0.000000e+00> : vector<8x512xf32>
    %127 = tpu.matmul %126, %125, %cst_53 {dimension_numbers = #tpu.dot_dimension_numbers<[1], [0], [0], [1], [0, 0, 1, 1], [], []>} : vector<8x64xf32>, vector<64x512xf32>, vector<8x512xf32> -> vector<8x512xf32>
    %c256_54 = arith.constant 256 : index
    %c0_55 = arith.constant 0 : index
    %128 = vector.load %arg5[%c256_54, %c0_55] : memref<264x1xf32, #tpu.memory_space<vmem>>, vector<8x1xf32>
    %129 = vector.broadcast %128 : vector<8x1xf32> to vector<8x512xf32>
    %130 = arith.addf %127, %129 : vector<8x512xf32>
    %cst_56 = arith.constant -1.000000e+00 : f32
    %cst_57 = arith.constant 1.000000e+00 : f32
    %131 = vector.broadcast %cst_56 : f32 to vector<8x512xf32>
    %132 = arith.maximumf %131, %130 : vector<8x512xf32>
    %133 = vector.broadcast %cst_57 : f32 to vector<8x512xf32>
    %134 = arith.minimumf %133, %132 : vector<8x512xf32>
    %c0_58 = arith.constant 0 : index
    %c0_59 = arith.constant 0 : index
    %135 = vector.load %arg6[%c0_58, %c0_59] : memref<8x512xf32, #tpu.memory_space<vmem>>, vector<8x512xf32>
    tpu.vector_store %arg6[%c0_58, %c0_59], %134 {strides = array<i32>} : memref<8x512xf32, #tpu.memory_space<vmem>>, vector<8x512xf32>,
    return
  }
  func.func @transform_0(%arg0: i32) -> (i32, i32) {
    %c0_i32 = arith.constant 0 : i32
    %c0_i32_0 = arith.constant 0 : i32
    return %c0_i32, %arg0 : i32, i32
  }
  func.func @transform_1(%arg0: i32) -> (i32, i32) {
    %c0_i32 = arith.constant 0 : i32
    %c0_i32_0 = arith.constant 0 : i32
    %c0_i32_1 = arith.constant 0 : i32
    return %c0_i32, %c0_i32_0 : i32, i32
  }
  func.func @transform_2(%arg0: i32) -> (i32, i32) {
    %c0_i32 = arith.constant 0 : i32
    %c0_i32_0 = arith.constant 0 : i32
    %c0_i32_1 = arith.constant 0 : i32
    return %c0_i32, %c0_i32_0 : i32, i32
  }
  func.func @transform_3(%arg0: i32) -> (i32, i32) {
    %c0_i32 = arith.constant 0 : i32
    %c0_i32_0 = arith.constant 0 : i32
    %c0_i32_1 = arith.constant 0 : i32
    return %c0_i32, %c0_i32_0 : i32, i32
  }
  func.func @transform_4(%arg0: i32) -> (i32, i32) {
    %c0_i32 = arith.constant 0 : i32
    %c0_i32_0 = arith.constant 0 : i32
    %c0_i32_1 = arith.constant 0 : i32
    return %c0_i32, %c0_i32_0 : i32, i32
  }
  func.func @transform_5(%arg0: i32) -> (i32, i32) {
    %c0_i32 = arith.constant 0 : i32
    %c0_i32_0 = arith.constant 0 : i32
    return %c0_i32, %arg0 : i32, i32
  }
}

</mosaic_0001>

<bundles_post_ra>
// kernel: nffb_forward.1
= control target key start
LH: loop header
LB: loop body
LE: loop exit
PB: predicated region body
PF: predicated region fallthrough
CT: control target
= control target key end

     0   :  { %s5255_s18 = smov 0   ;;  %s8401_s0 = inlined_call_operand.vmem [shape: f32[8,4096], index: 0, kind: input, shape index: {}]   ;;  %s8402_s1 = inlined_call_operand.vmem [shape: f32[128,8], index: 1, kind: input, shape index: {}]   ;;  %s8403_s2 = inlined_call_operand.vmem [shape: f32[320,64], index: 2, kind: input, shape index: {}]   ;;  %s8404_s3 = inlined_call_operand.vmem [shape: f32[8,64], index: 3, kind: input, shape index: {}]   ;;  %s8405_s4 = inlined_call_operand.vmem [shape: f32[264,1], index: 4, kind: input, shape index: {}]   ;;  %s8406_s5 = inlined_call_operand.vmem [shape: f32[8,4096], index: 5, kind: output, shape index: {}]  }
   0x1 LB: > { %s4850_s19 = sadd.s32 4294967295, %s5221_s18   ;;  %p4854_p0 = scmp.ge.s32.totalorder %s5221_s18, 1  ;;  %s5221_s18 = sphi %s5255_s18, %s15_s18  }
   0x2   : > { %p188_p1 = scmp.lt.s32.totalorder %s5221_s18, 9 }
   0x4   : > { %p189_p2 = pnand %p4854_p0, %p188_p1 }
   0x6   : > { %192 = sbr.rel (%p189_p2) target bundleno = 1872 (0x750), region = 40 }
   0xd   : > { %s4855_s20 = sshll.u32 %s4850_s19, 2  ;;  %v8407_v0 = vmov 0.0   ;;  %v232_v1 = vld [vmem:[%s8402_s1] sm:$0xff]  ;;  %vm248_vm0 = vcmask 64512   ;;  %v233_v6 = vld [vmem:[%s8402_s1 + $0x8] sm:$0xff]  ;;  %v234_v7 = vld [vmem:[%s8402_s1 + $0x10] sm:$0xff] }
   0xe   : > { %p217_p3 = scmp.lt.s32.totalorder %s4855_s20, 31  ;;  %361 = vmatprep.mubr.f32.mxu0 %v8407_v0  ;;  %522 = vmatprep.mubr.f32.mxu1 %v8407_v0  ;;  %v235_v8 = vld [vmem:[%s8402_s1 + $0x18] sm:$0xff]  ;;  %v236_v9 = vld [vmem:[%s8402_s1 + $0x20] sm:$0xff]  ;;  %v237_v10 = vld [vmem:[%s8402_s1 + $0x28] sm:$0xff]  ;;  %vm2019_vm1 = vcmask 523264  }
   0xf   : > { %v238_v11 = vld [vmem:[%s8402_s1 + $0x30] sm:$0xff]  ;;  %v239_v12 = vld [vmem:[%s8402_s1 + $0x38] sm:$0xff]  ;;  %v240_v13 = vld [vmem:[%s8402_s1 + $0x40] sm:$0xff] }
  0x10   : > { %s8617_s20 = smov (!%p217_p3, %s4855_s20), 31  ;;  %v241_v14 = vld [vmem:[%s8402_s1 + $0x48] sm:$0xff]  ;;  %v242_v15 = vld [vmem:[%s8402_s1 + $0x50] sm:$0xff]  ;;  %v243_v16 = vld [vmem:[%s8402_s1 + $0x58] sm:$0xff] }
  0x11   : > { %s4856_s21 = sshll.u32 %s8617_s20, 3  ;;  %v244_v17 = vld [vmem:[%s8402_s1 + $0x60] sm:$0xff]  ;;  %v245_v18 = vld [vmem:[%s8402_s1 + $0x68] sm:$0xff]  ;;  %v246_v19 = vld [vmem:[%s8402_s1 + $0x70] sm:$0xff] }
  0x12   : > { %s220_s24 = scalar_lea.vmem %s8401_s0, %s4856_s21  ;;  %v247_v20 = vld [vmem:[%s8402_s1 + $0x78] sm:$0xff]  ;;  %s226_s6 = scalar_lea.vmem %s8406_s5, %s4856_s21 }
  0x13   : > { %v229_v2 = vld [vmem:[%s220_s24 + $0x8] sm:$0xff]  ;;  %v231_v3 = vld [vmem:[%s220_s24 + $0x18] sm:$0xff]  ;;  %v228_v4 = vld [vmem:[%s220_s24] sm:$0xff] }
  0x14   : > { %297 = vmatprep.subr.mxu0 %v229_v2  ;;  %458 = vmatprep.subr.mxu1 %v231_v3  ;;  %v230_v5 = vld [vmem:[%s220_s24 + $0x10] sm:$0xff] }
  0x15   : > { %298 = vmatpush1.msra.mxu0 %v228_v4  ;;  %459 = vmatpush1.msra.mxu1 %v230_v5 }
  0x16   : > { %4859 = vmatmul.mubr.msk.f32.vlgmr.msra.gmra.mrb[0].mxu0 %vm248_vm0, %v232_v1  ;;  %4875 = vmatmul.mubr.msk.f32.vlgmr.msra.gmra.mrb[0].mxu1 %vm248_vm0, %v232_v1 }
  0x17   : > { %367 = vmatprep.mubr.f32.mxu0 %v8407_v0  ;;  %528 = vmatprep.mubr.f32.mxu1 %v8407_v0 }
  0x1a   : > { %4860 = vmatmul.mubr.msk.f32.gmra.mrb[2].mxu0 %vm248_vm0, %v233_v6  ;;  %4876 = vmatmul.mubr.msk.f32.gmra.mrb[2].mxu1 %vm248_vm0, %v233_v6 }
  0x1b   : > { %373 = vmatprep.mubr.f32.mxu0 %v8407_v0  ;;  %534 = vmatprep.mubr.f32.mxu1 %v8407_v0 }
  0x1e   : > { %4861 = vmatmul.mubr.msk.f32.gmra.mrb[4].mxu0 %vm248_vm0, %v234_v7  ;;  %4877 = vmatmul.mubr.msk.f32.gmra.mrb[4].mxu1 %vm248_vm0, %v234_v7 }
  0x1f   : > { %379 = vmatprep.mubr.f32.mxu0 %v8407_v0  ;;  %540 = vmatprep.mubr.f32.mxu1 %v8407_v0 }
  0x22   : > { %4862 = vmatmul.mubr.msk.f32.gmra.mrb[6].mxu0 %vm248_vm0, %v235_v8  ;;  %4878 = vmatmul.mubr.msk.f32.gmra.mrb[6].mxu1 %vm248_vm0, %v235_v8 }
  0x23   : > { %385 = vmatprep.mubr.f32.mxu0 %v8407_v0  ;;  %546 = vmatprep.mubr.f32.mxu1 %v8407_v0 }
  0x26   : > { %4863 = vmatmul.mubr.msk.f32.gmra.mrb[8].mxu0 %vm248_vm0, %v236_v9  ;;  %4879 = vmatmul.mubr.msk.f32.gmra.mrb[8].mxu1 %vm248_vm0, %v236_v9 }
  0x27   : > { %391 = vmatprep.mubr.f32.mxu0 %v8407_v0  ;;  %552 = vmatprep.mubr.f32.mxu1 %v8407_v0 }
  0x2a   : > { %4864 = vmatmul.mubr.msk.f32.gmra.mrb[10].mxu0 %vm248_vm0, %v237_v10  ;;  %4880 = vmatmul.mubr.msk.f32.gmra.mrb[10].mxu1 %vm248_vm0, %v237_v10 }
  0x2b   : > { %397 = vmatprep.mubr.f32.mxu0 %v8407_v0  ;;  %558 = vmatprep.mubr.f32.mxu1 %v8407_v0 }
  0x2e   : > { %4865 = vmatmul.mubr.msk.f32.gmra.mrb[12].mxu0 %vm248_vm0, %v238_v11  ;;  %4881 = vmatmul.mubr.msk.f32.gmra.mrb[12].mxu1 %vm248_vm0, %v238_v11 }
  0x2f   : > { %403 = vmatprep.mubr.f32.mxu0 %v8407_v0  ;;  %564 = vmatprep.mubr.f32.mxu1 %v8407_v0 }
  0x32   : > { %4866 = vmatmul.mubr.msk.f32.gmra.mrb[14].mxu0 %vm248_vm0, %v239_v12  ;;  %4882 = vmatmul.mubr.msk.f32.gmra.mrb[14].mxu1 %vm248_vm0, %v239_v12 }
  0x33   : > { %409 = vmatprep.mubr.f32.mxu0 %v8407_v0  ;;  %570 = vmatprep.mubr.f32.mxu1 %v8407_v0 }
  0x36   : > { %4867 = vmatmul.mubr.msk.f32.gmra.mrb[16].mxu0 %vm248_vm0, %v240_v13  ;;  %4883 = vmatmul.mubr.msk.f32.gmra.mrb[16].mxu1 %vm248_vm0, %v240_v13 }
  0x37   : > { %415 = vmatprep.mubr.f32.mxu0 %v8407_v0  ;;  %576 = vmatprep.mubr.f32.mxu1 %v8407_v0 }
  0x3a   : > { %4868 = vmatmul.mubr.msk.f32.gmra.mrb[18].mxu0 %vm248_vm0, %v241_v14  ;;  %4884 = vmatmul.mubr.msk.f32.gmra.mrb[18].mxu1 %vm248_vm0, %v241_v14 }
  0x3b   : > { %421 = vmatprep.mubr.f32.mxu0 %v8407_v0  ;;  %582 = vmatprep.mubr.f32.mxu1 %v8407_v0 }
  0x3e   : > { %4869 = vmatmul.mubr.msk.f32.gmra.mrb[20].mxu0 %vm248_vm0, %v242_v15  ;;  %4885 = vmatmul.mubr.msk.f32.gmra.mrb[20].mxu1 %vm248_vm0, %v242_v15 }
  0x3f   : > { %427 = vmatprep.mubr.f32.mxu0 %v8407_v0  ;;  %588 = vmatprep.mubr.f32.mxu1 %v8407_v0 }
  0x42   : > { %4870 = vmatmul.mubr.msk.f32.gmra.mrb[22].mxu0 %vm248_vm0, %v243_v16  ;;  %4886 = vmatmul.mubr.msk.f32.gmra.mrb[22].mxu1 %vm248_vm0, %v243_v16 }
  0x43   : > { %433 = vmatprep.mubr.f32.mxu0 %v8407_v0  ;;  %594 = vmatprep.mubr.f32.mxu1 %v8407_v0 }
  0x46   : > { %4871 = vmatmul.mubr.msk.f32.gmra.mrb[24].mxu0 %vm248_vm0, %v244_v17  ;;  %4887 = vmatmul.mubr.msk.f32.gmra.mrb[24].mxu1 %vm248_vm0, %v244_v17 }
  0x47   : > { %439 = vmatprep.mubr.f32.mxu0 %v8407_v0  ;;  %600 = vmatprep.mubr.f32.mxu1 %v8407_v0 }
  0x4a   : > { %4872 = vmatmul.mubr.msk.f32.gmra.mrb[26].mxu0 %vm248_vm0, %v245_v18  ;;  %4888 = vmatmul.mubr.msk.f32.gmra.mrb[26].mxu1 %vm248_vm0, %v245_v18 }
  0x4b   : > { %445 = vmatprep.mubr.f32.mxu0 %v8407_v0  ;;  %606 = vmatprep.mubr.f32.mxu1 %v8407_v0 }
  0x4e   : > { %4873 = vmatmul.mubr.msk.f32.gmra.mrb[28].mxu0 %vm248_vm0, %v246_v19  ;;  %4889 = vmatmul.mubr.msk.f32.gmra.mrb[28].mxu1 %vm248_vm0, %v246_v19 }
  0x4f   : > { %451 = vmatprep.mubr.f32.mxu0 %v8407_v0  ;;  %612 = vmatprep.mubr.f32.mxu1 %v8407_v0 }
  0x52   : > { %4874 = vmatmul.mubr.msk.f32.gmra.mrb[30].mxu0 %vm248_vm0, %v247_v20  ;;  %4890 = vmatmul.mubr.msk.f32.gmra.mrb[30].mxu1 %vm248_vm0, %v247_v20 }
  0x53   : > { %2108 = vmatprep.mubr.f32.mxu0 %v8407_v0  ;;  %2221 = vmatprep.mubr.f32.mxu1 %v8407_v0 }
  0xe9   : > { %v363_v21 = vpop.f32.mrb[0].mxu0  ;;  %v524_v22 = vpop.f32.mrb[0].mxu1 }
  0xea   : > { %v619_v23 = vadd.f32 0.5, %v363_v21  ;;  %v621_v24 = vadd.f32 0.5, %v524_v22  ;;  %v365_v25 = vpop.f32.mrb[1].mxu0  ;;  %v526_v26 = vpop.f32.mrb[1].mxu1 }
  0xeb   : > { %v620_v27 = vadd.f32 0.5, %v365_v25  ;;  %v622_v28 = vadd.f32 0.5, %v526_v26 }
  0xec   : > { %v683_v29 = vfloor.f32 %v619_v23  ;;  %v685_v30 = vfloor.f32 %v621_v24 }
  0xed   : > { %v684_v31 = vfloor.f32 %v620_v27  ;;  %v686_v32 = vfloor.f32 %v622_v28  ;;  %v369_v33 = vpop.f32.mrb[2].mxu0  ;;  %v530_v34 = vpop.f32.mrb[2].mxu1 }
  0xee   : > { %v747_v35 = vsub.f32 %v363_v21, %v683_v29  ;;  %v749_v36 = vsub.f32 %v524_v22, %v685_v30  ;;  %v623_v37 = vadd.f32 0.5, %v369_v33  ;;  %v625_v38 = vadd.f32 0.5, %v530_v34  ;;  %v371_v39 = vpop.f32.mrb[3].mxu0  ;;  %v532_v40 = vpop.f32.mrb[3].mxu1 }
  0xef   : > { %v748_v41 = vsub.f32 %v365_v25, %v684_v31  ;;  %v750_v42 = vsub.f32 %v526_v26, %v686_v32  ;;  %v624_v43 = vadd.f32 0.5, %v371_v39  ;;  %v626_v44 = vadd.f32 0.5, %v532_v40 }
  0xf0   : > { %v5385_v45 = vadd.f32 %v747_v35, %v747_v35  ;;  %v5387_v46 = vadd.f32 %v749_v36, %v749_v36  ;;  %v687_v47 = vfloor.f32 %v623_v37  ;;  %v689_v48 = vfloor.f32 %v625_v38 }
  0xf1   : > { %v5389_v49 = vadd.f32 %v748_v41, %v748_v41  ;;  %v5391_v50 = vadd.f32 %v750_v42, %v750_v42  ;;  %v688_v51 = vfloor.f32 %v624_v43  ;;  %v690_v52 = vfloor.f32 %v626_v44  ;;  %v5393_v53 = vpop.f32.mrb[4].mxu0  ;;  %v5395_v54 = vpop.f32.mrb[4].mxu1 }
  0xf2   : > { %v5399_v55 = vmul.f32 %v5385_v45, %v5385_v45  ;;  %v5403_v56 = vmul.f32 %v5387_v46, %v5387_v46  ;;  %v751_v57 = vsub.f32 %v369_v33, %v687_v47  ;;  %v753_v58 = vsub.f32 %v530_v34, %v689_v48  ;;  %v5405_v59 = vpop.f32.mrb[5].mxu0  ;;  %v5407_v60 = vpop.f32.mrb[5].mxu1 }
  0xf3   : > { %v5411_v61 = vmul.f32 %v5389_v49, %v5389_v49  ;;  %v5415_v62 = vmul.f32 %v5391_v50, %v5391_v50  ;;  %v752_v63 = vsub.f32 %v371_v39, %v688_v51  ;;  %v754_v1 = vsub.f32 %v532_v40, %v690_v52 }
  0xf4   : > { %v939_v2 = vmul.f32 -0.006040975, %v5399_v55  ;;  %v941_v3 = vmul.f32 -0.006040975, %v5403_v56  ;;  %v5419_v4 = vadd.f32 %v751_v57, %v751_v57  ;;  %v5421_v5 = vadd.f32 %v753_v58, %v753_v58 }
  0xf5   : > { %v940_v6 = vmul.f32 -0.006040975, %v5411_v61  ;;  %v942_v7 = vmul.f32 -0.006040975, %v5415_v62  ;;  %v5425_v8 = vadd.f32 %v752_v63, %v752_v63  ;;  %v5427_v9 = vadd.f32 %v754_v1, %v754_v1  ;;  %v5429_v10 = vpop.f32.mrb[6].mxu0  ;;  %v5431_v11 = vpop.f32.mrb[6].mxu1 }
  0xf6   : > { %v1003_v12 = vadd.f32 0.08060466, %v939_v2  ;;  %v1005_v13 = vadd.f32 0.08060466, %v941_v3  ;;  %v5435_v14 = vmul.f32 %v5419_v4, %v5419_v4  ;;  %v5439_v15 = vmul.f32 %v5421_v5, %v5421_v5  ;;  %v5441_v16 = vpop.f32.mrb[7].mxu0  ;;  %v5443_v17 = vpop.f32.mrb[7].mxu1 }
  0xf7   : > { %v1004_v18 = vadd.f32 0.08060466, %v940_v6  ;;  %v1006_v19 = vadd.f32 0.08060466, %v942_v7  ;;  %v5447_v20 = vmul.f32 %v5425_v8, %v5425_v8  ;;  %v5451_v21 = vmul.f32 %v5427_v9, %v5427_v9 }
  0xf8   : > { %v1067_v22 = vmul.f32 %v1003_v12, %v5399_v55  ;;  %v1069_v23 = vmul.f32 %v1005_v13, %v5403_v56  ;;  %v943_v24 = vmul.f32 -0.006040975, %v5435_v14  ;;  %v945_v25 = vmul.f32 -0.006040975, %v5439_v15 }
  0xf9   : > { %v1068_v26 = vmul.f32 %v1004_v18, %v5411_v61  ;;  %v1070_v27 = vmul.f32 %v1006_v19, %v5415_v62  ;;  %v944_v28 = vmul.f32 -0.006040975, %v5447_v20  ;;  %v946_v29 = vmul.f32 -0.006040975, %v5451_v21  ;;  %v5461_v30 = vpop.f32.mrb[8].mxu0  ;;  %v5463_v31 = vpop.f32.mrb[8].mxu1 }
  0xfa   : > { %v1131_v32 = vadd.f32 -0.5983973, %v1067_v22  ;;  %v1133_v33 = vadd.f32 -0.5983973, %v1069_v23  ;;  %v1007_v34 = vadd.f32 0.08060466, %v943_v24 }
  0xfb   : > { %v1132_v35 = vadd.f32 -0.5983973, %v1068_v26  ;;  %v1134_v36 = vadd.f32 -0.5983973, %v1070_v27  ;;  %v1009_v37 = vadd.f32 0.08060466, %v945_v25 }
  0xfc   : > { %v1195_v38 = vmul.f32 %v1131_v32, %v5399_v55  ;;  %v1197_v39 = vmul.f32 %v1133_v33, %v5403_v56  ;;  %v1071_v40 = vmul.f32 %v1007_v34, %v5435_v14  ;;  %v1008_v41 = vadd.f32 0.08060466, %v944_v28  ;;  %v5468_v42 = vpop.f32.mrb[9].mxu0  ;;  %v5470_v43 = vpop.f32.mrb[9].mxu1 }
  0xfd   : > { %v1196_v44 = vmul.f32 %v1132_v35, %v5411_v61  ;;  %v1198_v47 = vmul.f32 %v1134_v36, %v5415_v62  ;;  %v1073_v48 = vmul.f32 %v1009_v37, %v5439_v15  ;;  %v1010_v51 = vadd.f32 0.08060466, %v946_v29  ;;  %v5475_v52 = vpop.f32.mrb[10].mxu0  ;;  %v5477_v57 = vpop.f32.mrb[10].mxu1 }
  0xfe   : > { %v1259_v58 = vadd.f32 2.5499265, %v1195_v38  ;;  %v1261_v63 = vadd.f32 2.5499265, %v1197_v39  ;;  %v1135_v1 = vadd.f32 -0.5983973, %v1071_v40  ;;  %v1072_v2 = vmul.f32 %v1008_v41, %v5447_v20 }
  0xff   : > { %v1260_v3 = vadd.f32 2.5499265, %v1196_v44  ;;  %v1262_v6 = vadd.f32 2.5499265, %v1198_v47  ;;  %v1137_v7 = vadd.f32 -0.5983973, %v1073_v48  ;;  %v1074_v12 = vmul.f32 %v1010_v51, %v5451_v21 }
 0x100   : > { %v1323_v13 = vmul.f32 %v1259_v58, %v5399_v55  ;;  %v1325_v18 = vmul.f32 %v1261_v63, %v5403_v56  ;;  %v1199_v19 = vmul.f32 %v1135_v1, %v5435_v14  ;;  %v1136_v22 = vadd.f32 -0.5983973, %v1072_v2  ;;  %v5484_v23 = vpop.f32.mrb[11].mxu0  ;;  %v5486_v24 = vpop.f32.mrb[11].mxu1 }
 0x101   : > { %v1324_v25 = vmul.f32 %v1260_v3, %v5411_v61  ;;  %v1326_v26 = vmul.f32 %v1262_v6, %v5415_v62  ;;  %v1201_v27 = vmul.f32 %v1137_v7, %v5439_v15  ;;  %v1138_v28 = vadd.f32 -0.5983973, %v1074_v12  ;;  %v5491_v29 = vpop.f32.mrb[12].mxu0  ;;  %v5493_v32 = vpop.f32.mrb[12].mxu1 }
 0x102   : > { %v1387_v33 = vadd.f32 -5.167685, %v1323_v13  ;;  %v1389_v34 = vadd.f32 -5.167685, %v1325_v18  ;;  %v1263_v35 = vadd.f32 2.5499265, %v1199_v19  ;;  %v1200_v36 = vmul.f32 %v1136_v22, %v5447_v20 }
 0x103   : > { %v1388_v37 = vadd.f32 -5.167685, %v1324_v25  ;;  %v1390_v38 = vadd.f32 -5.167685, %v1326_v26  ;;  %v1265_v39 = vadd.f32 2.5499265, %v1201_v27  ;;  %v1202_v40 = vmul.f32 %v1138_v28, %v5451_v21 }
 0x104   : > { %v1451_v41 = vmul.f32 %v1387_v33, %v5399_v55  ;;  %v1453_v44 = vmul.f32 %v1389_v34, %v5403_v56  ;;  %v1327_v47 = vmul.f32 %v1263_v35, %v5435_v14  ;;  %v1264_v48 = vadd.f32 2.5499265, %v1200_v36  ;;  %v5500_v51 = vpop.f32.mrb[13].mxu0  ;;  %v5502_v58 = vpop.f32.mrb[13].mxu1 }
 0x105   : > { %v1452_v63 = vmul.f32 %v1388_v37, %v5411_v61  ;;  %v1454_v1 = vmul.f32 %v1390_v38, %v5415_v62  ;;  %v1329_v2 = vmul.f32 %v1265_v39, %v5439_v15  ;;  %v1266_v3 = vadd.f32 2.5499265, %v1202_v40  ;;  %v5507_v6 = vpop.f32.mrb[14].mxu0  ;;  %v5509_v7 = vpop.f32.mrb[14].mxu1 }
 0x106   : > { %v1515_v55 = vadd.f32 3.1415918, %v1451_v41  ;;  %v1517_v56 = vadd.f32 3.1415918, %v1453_v44  ;;  %v1391_v12 = vadd.f32 -5.167685, %v1327_v47  ;;  %v1328_v13 = vmul.f32 %v1264_v48, %v5447_v20 }
 0x107   : > { %v1516_v18 = vadd.f32 3.1415918, %v1452_v63  ;;  %v1518_v19 = vadd.f32 3.1415918, %v1454_v1  ;;  %v1393_v22 = vadd.f32 -5.167685, %v1329_v2  ;;  %v1330_v25 = vmul.f32 %v1266_v3, %v5451_v21 }
 0x108   : > { %v5514_v61 = vmul.f32 %v1515_v55, %v5385_v45  ;;  %v5517_v62 = vmul.f32 %v1517_v56, %v5387_v46  ;;  %v1455_v26 = vmul.f32 %v1391_v12, %v5435_v14  ;;  %v1392_v27 = vadd.f32 -5.167685, %v1328_v13  ;;  %v5520_v28 = vpop.f32.mrb[15].mxu0  ;;  %v5522_v33 = vpop.f32.mrb[15].mxu1 }
 0x109   : > { %v5525_v34 = vmul.f32 %v1516_v18, %v5389_v49  ;;  %v5528_v35 = vmul.f32 %v1518_v19, %v5391_v50  ;;  %v1457_v36 = vmul.f32 %v1393_v22, %v5439_v15  ;;  %v1394_v45 = vadd.f32 -5.167685, %v1330_v25 }
 0x10a   : > { %v1519_v37 = vadd.f32 3.1415918, %v1455_v26  ;;  %v1456_v46 = vmul.f32 %v1392_v27, %v5447_v20  ;;  %v627_v38 = vadd.f32 0.5, %v5393_v53  ;;  %v629_v14 = vadd.f32 0.5, %v5395_v54 }
 0x10b   : > { %v1521_v39 = vadd.f32 3.1415918, %v1457_v36  ;;  %v1458_v40 = vmul.f32 %v1394_v45, %v5451_v21  ;;  %v628_v41 = vadd.f32 0.5, %v5405_v59  ;;  %v630_v49 = vadd.f32 0.5, %v5407_v60 }
 0x10c   : > { %v5538_v50 = vmul.f32 %v1519_v37, %v5419_v4  ;;  %v1520_v44 = vadd.f32 3.1415918, %v1456_v46  ;;  %v691_v15 = vfloor.f32 %v627_v38  ;;  %v693_v47 = vfloor.f32 %v629_v14 }
 0x10d   : > { %v5541_v48 = vmul.f32 %v1521_v39, %v5421_v5  ;;  %v1522_v20 = vadd.f32 3.1415918, %v1458_v40  ;;  %v692_v63 = vfloor.f32 %v628_v41  ;;  %v694_v1 = vfloor.f32 %v630_v49 }
 0x10e   : > { %v4981_v2 = vpack.c.bf16 %v5538_v50, %v5514_v61  ;;  %v1584_v21 = vmul.f32 %v1520_v44, %v5425_v8  ;;  %v755_v3 = vsub.f32 %v5393_v53, %v691_v15  ;;  %v757_v55 = vsub.f32 %v5395_v54, %v693_v47 }
 0x10f   : > { %v4997_v4 = vpack.c.bf16 %v5541_v48, %v5517_v62  ;;  %v1586_v56 = vmul.f32 %v1522_v20, %v5427_v9  ;;  %v756_v5 = vsub.f32 %v5405_v59, %v692_v63  ;;  %v758_v12 = vsub.f32 %v5407_v60, %v694_v1 }
 0x110   : > { %v5553_v13 = vadd.f32 %v755_v3, %v755_v3  ;;  %v5555_v18 = vadd.f32 %v757_v55, %v757_v55  ;;  %v631_v19 = vadd.f32 0.5, %v5429_v10  ;;  %v633_v8 = vadd.f32 0.5, %v5431_v11 }
 0x111   : > { %v5559_v53 = vadd.f32 %v756_v5, %v756_v5  ;;  %v5561_v54 = vadd.f32 %v758_v12, %v758_v12  ;;  %v632_v22 = vadd.f32 0.5, %v5441_v16  ;;  %v634_v9 = vadd.f32 0.5, %v5443_v17 }
 0x112   : > { %v5567_v59 = vmul.f32 %v5553_v13, %v5553_v13  ;;  %v5571_v60 = vmul.f32 %v5555_v18, %v5555_v18  ;;  %v695_v25 = vfloor.f32 %v631_v19  ;;  %v697_v26 = vfloor.f32 %v633_v8 }
 0x113   : > { %v5575_v27 = vmul.f32 %v5559_v53, %v5559_v53  ;;  %v5579_v36 = vmul.f32 %v5561_v54, %v5561_v54  ;;  %v696_v45 = vfloor.f32 %v632_v22  ;;  %v698_v37 = vfloor.f32 %v634_v9 }
 0x114   : > { %v947_v46 = vmul.f32 -0.006040975, %v5567_v59  ;;  %v949_v38 = vmul.f32 -0.006040975, %v5571_v60  ;;  %v759_v14 = vsub.f32 %v5429_v10, %v695_v25  ;;  %v761_v39 = vsub.f32 %v5431_v11, %v697_v26 }
 0x115   : > { %v948_v40 = vmul.f32 -0.006040975, %v5575_v27  ;;  %v950_v41 = vmul.f32 -0.006040975, %v5579_v36  ;;  %v760_v49 = vsub.f32 %v5441_v16, %v696_v45  ;;  %v762_v44 = vsub.f32 %v5443_v17, %v698_v37 }
 0x116   : > { %v1011_v15 = vadd.f32 0.08060466, %v947_v46  ;;  %v1013_v47 = vadd.f32 0.08060466, %v949_v38  ;;  %v5589_v20 = vadd.f32 %v759_v14, %v759_v14  ;;  %v5591_v63 = vadd.f32 %v761_v39, %v761_v39 }
 0x117   : > { %v1012_v1 = vadd.f32 0.08060466, %v948_v40  ;;  %v1014_v3 = vadd.f32 0.08060466, %v950_v41  ;;  %v5593_v55 = vadd.f32 %v760_v49, %v760_v49  ;;  %v5595_v10 = vadd.f32 %v762_v44, %v762_v44 }
 0x118   : > { %v1075_v11 = vmul.f32 %v1011_v15, %v5567_v59  ;;  %v1077_v5 = vmul.f32 %v1013_v47, %v5571_v60  ;;  %v5601_v16 = vmul.f32 %v5589_v20, %v5589_v20  ;;  %v5605_v17 = vmul.f32 %v5591_v63, %v5591_v63 }
 0x119   : > { %v1076_v12 = vmul.f32 %v1012_v1, %v5575_v27  ;;  %v1078_v19 = vmul.f32 %v1014_v3, %v5579_v36  ;;  %v5611_v8 = vmul.f32 %v5593_v55, %v5593_v55  ;;  %v5615_v22 = vmul.f32 %v5595_v10, %v5595_v10 }
 0x11a   : > { %v1139_v9 = vadd.f32 -0.5983973, %v1075_v11  ;;  %v1141_v25 = vadd.f32 -0.5983973, %v1077_v5  ;;  %v951_v26 = vmul.f32 -0.006040975, %v5601_v16  ;;  %v4979_v45 = vpack.c.bf16 %v1584_v21, %v5525_v34 }
 0x11b   : > { %v1140_v37 = vadd.f32 -0.5983973, %v1076_v12  ;;  %v1142_v46 = vadd.f32 -0.5983973, %v1078_v19  ;;  %v953_v38 = vmul.f32 -0.006040975, %v5605_v17  ;;  %v4995_v14 = vpack.c.bf16 %v1586_v56, %v5528_v35 }
 0x11c   : > { %v1203_v39 = vmul.f32 %v1139_v9, %v5567_v59  ;;  %v1205_v40 = vmul.f32 %v1141_v25, %v5571_v60  ;;  %v1015_v41 = vadd.f32 0.08060466, %v951_v26  ;;  %v952_v49 = vmul.f32 -0.006040975, %v5611_v8  ;;  %4980 = vmatprep.subr.bf16.mxu0 %v4979_v45 }
 0x11d   : > { %v1204_v44 = vmul.f32 %v1140_v37, %v5575_v27  ;;  %v1206_v15 = vmul.f32 %v1142_v46, %v5579_v36  ;;  %v1017_v47 = vadd.f32 0.08060466, %v953_v38  ;;  %v954_v34 = vmul.f32 -0.006040975, %v5615_v22  ;;  %4996 = vmatprep.subr.bf16.mxu1 %v4995_v14  ;;  %4982 = vmatpush1.bf16.msra.mxu0 %v4981_v2 }
 0x11e   : > { %v1267_v35 = vadd.f32 2.5499265, %v1203_v39  ;;  %v1269_v21 = vadd.f32 2.5499265, %v1205_v40  ;;  %v1079_v56 = vmul.f32 %v1015_v41, %v5601_v16  ;;  %v1016_v1 = vadd.f32 0.08060466, %v952_v49  ;;  %4998 = vmatpush1.bf16.msra.mxu1 %v4997_v4 }
 0x11f   : > { %v1268_v3 = vadd.f32 2.5499265, %v1204_v44  ;;  %v1270_v11 = vadd.f32 2.5499265, %v1206_v15  ;;  %v1081_v5 = vmul.f32 %v1017_v47, %v5605_v17  ;;  %v1018_v12 = vadd.f32 0.08060466, %v954_v34 }
 0x120   : > { %v1331_v19 = vmul.f32 %v1267_v35, %v5567_v59  ;;  %v1333_v9 = vmul.f32 %v1269_v21, %v5571_v60  ;;  %v1143_v61 = vadd.f32 -0.5983973, %v1079_v56  ;;  %v1080_v50 = vmul.f32 %v1016_v1, %v5611_v8 }
 0x121   : > { %v1332_v2 = vmul.f32 %v1268_v3, %v5575_v27  ;;  %v1334_v25 = vmul.f32 %v1270_v11, %v5579_v36  ;;  %v1145_v26 = vadd.f32 -0.5983973, %v1081_v5  ;;  %v1082_v62 = vmul.f32 %v1018_v12, %v5615_v22 }
 0x122   : > { %v1395_v48 = vadd.f32 -5.167685, %v1331_v19  ;;  %v1397_v4 = vadd.f32 -5.167685, %v1333_v9  ;;  %v1207_v45 = vmul.f32 %v1143_v61, %v5601_v16  ;;  %v1144_v37 = vadd.f32 -0.5983973, %v1080_v50 }
 0x123   : > { %v1396_v46 = vadd.f32 -5.167685, %v1332_v2  ;;  %v1398_v38 = vadd.f32 -5.167685, %v1334_v25  ;;  %v1209_v14 = vmul.f32 %v1145_v26, %v5605_v17  ;;  %v1146_v39 = vadd.f32 -0.5983973, %v1082_v62 }
 0x124   : > { %v1459_v40 = vmul.f32 %v1395_v48, %v5567_v59  ;;  %v1461_v41 = vmul.f32 %v1397_v4, %v5571_v60  ;;  %v1271_v49 = vadd.f32 2.5499265, %v1207_v45  ;;  %v1208_v44 = vmul.f32 %v1144_v37, %v5611_v8 }
 0x125   : > { %v1460_v15 = vmul.f32 %v1396_v46, %v5575_v27  ;;  %v1462_v47 = vmul.f32 %v1398_v38, %v5579_v36  ;;  %v1273_v34 = vadd.f32 2.5499265, %v1209_v14  ;;  %v1210_v35 = vmul.f32 %v1146_v39, %v5615_v22 }
 0x126   : > { %v1523_v21 = vadd.f32 3.1415918, %v1459_v40  ;;  %v1525_v56 = vadd.f32 3.1415918, %v1461_v41  ;;  %v1335_v1 = vmul.f32 %v1271_v49, %v5601_v16  ;;  %v1272_v3 = vadd.f32 2.5499265, %v1208_v44 }
 0x127   : > { %v1524_v11 = vadd.f32 3.1415918, %v1460_v15  ;;  %v1526_v5 = vadd.f32 3.1415918, %v1462_v47  ;;  %v1337_v59 = vmul.f32 %v1273_v34, %v5605_v17  ;;  %v1274_v60 = vadd.f32 2.5499265, %v1210_v35 }
 0x128   : > { %v5652_v12 = vmul.f32 %v1523_v21, %v5553_v13  ;;  %v5655_v27 = vmul.f32 %v1525_v56, %v5555_v18  ;;  %v1399_v36 = vadd.f32 -5.167685, %v1335_v1  ;;  %v1336_v19 = vmul.f32 %v1272_v3, %v5611_v8 }
 0x129   : > { %v5659_v9 = vmul.f32 %v1524_v11, %v5559_v53  ;;  %v5662_v61 = vmul.f32 %v1526_v5, %v5561_v54  ;;  %v1401_v50 = vadd.f32 -5.167685, %v1337_v59  ;;  %v1338_v2 = vmul.f32 %v1274_v60, %v5615_v22 }
 0x12a   : > { %v1463_v25 = vmul.f32 %v1399_v36, %v5601_v16  ;;  %v1400_v26 = vadd.f32 -5.167685, %v1336_v19  ;;  %v635_v13 = vadd.f32 0.5, %v5461_v30  ;;  %v637_v18 = vadd.f32 0.5, %v5463_v31 }
 0x12b   : > { %v1465_v62 = vmul.f32 %v1401_v50, %v5605_v17  ;;  %v1402_v48 = vadd.f32 -5.167685, %v1338_v2  ;;  %v636_v4 = vadd.f32 0.5, %v5468_v42  ;;  %v638_v53 = vadd.f32 0.5, %v5470_v43 }
 0x12c   : > { %v1527_v45 = vadd.f32 3.1415918, %v1463_v25  ;;  %v1464_v54 = vmul.f32 %v1400_v26, %v5611_v8  ;;  %v699_v37 = vfloor.f32 %v635_v13  ;;  %v701_v46 = vfloor.f32 %v637_v18 }
 0x12d   : > { %v1529_v38 = vadd.f32 3.1415918, %v1465_v62  ;;  %v1466_v16 = vmul.f32 %v1402_v48, %v5615_v22  ;;  %v700_v14 = vfloor.f32 %v636_v4  ;;  %v702_v39 = vfloor.f32 %v638_v53 }
 0x12e   : > { %v5674_v40 = vmul.f32 %v1527_v45, %v5589_v20  ;;  %v1528_v41 = vadd.f32 3.1415918, %v1464_v54  ;;  %v763_v17 = vsub.f32 %v5461_v30, %v699_v37  ;;  %v765_v49 = vsub.f32 %v5463_v31, %v701_v46 }
 0x12f   : > { %v5679_v44 = vmul.f32 %v1529_v38, %v5591_v63  ;;  %v1530_v15 = vadd.f32 3.1415918, %v1466_v16  ;;  %v764_v8 = vsub.f32 %v5468_v42, %v700_v14  ;;  %v766_v47 = vsub.f32 %v5470_v43, %v702_v39 }
 0x130   : > { %v4985_v22 = vpack.c.bf16 %v5674_v40, %v5652_v12  ;;  %v5686_v34 = vmul.f32 %v1528_v41, %v5593_v55  ;;  %v5688_v20 = vadd.f32 %v763_v17, %v763_v17  ;;  %v5690_v35 = vadd.f32 %v765_v49, %v765_v49 }
 0x131   : > { %v5001_v30 = vpack.c.bf16 %v5679_v44, %v5655_v27  ;;  %v5695_v31 = vmul.f32 %v1530_v15, %v5595_v10  ;;  %v5697_v63 = vadd.f32 %v764_v8, %v764_v8  ;;  %v5699_v42 = vadd.f32 %v766_v47, %v766_v47 }
 0x132   : > { %v5703_v43 = vmul.f32 %v5688_v20, %v5688_v20  ;;  %v5707_v55 = vmul.f32 %v5690_v35, %v5690_v35  ;;  %v639_v21 = vadd.f32 0.5, %v5475_v52  ;;  %v641_v56 = vadd.f32 0.5, %v5477_v57 }
 0x133   : > { %v5713_v10 = vmul.f32 %v5697_v63, %v5697_v63  ;;  %v5717_v1 = vmul.f32 %v5699_v42, %v5699_v42  ;;  %v640_v3 = vadd.f32 0.5, %v5484_v23  ;;  %v642_v11 = vadd.f32 0.5, %v5486_v24 }
 0x134   : > { %v955_v5 = vmul.f32 -0.006040975, %v5703_v43  ;;  %v957_v59 = vmul.f32 -0.006040975, %v5707_v55  ;;  %v703_v60 = vfloor.f32 %v639_v21  ;;  %v705_v36 = vfloor.f32 %v641_v56 }
 0x135   : > { %v956_v19 = vmul.f32 -0.006040975, %v5713_v10  ;;  %v958_v50 = vmul.f32 -0.006040975, %v5717_v1  ;;  %v704_v2 = vfloor.f32 %v640_v3  ;;  %v706_v25 = vfloor.f32 %v642_v11 }
 0x136   : > { %v1019_v26 = vadd.f32 0.08060466, %v955_v5  ;;  %v1021_v13 = vadd.f32 0.08060466, %v957_v59  ;;  %v767_v18 = vsub.f32 %v5475_v52, %v703_v60  ;;  %v769_v62 = vsub.f32 %v5477_v57, %v705_v36 }
 0x137   : > { %v1020_v48 = vadd.f32 0.08060466, %v956_v19  ;;  %v1022_v4 = vadd.f32 0.08060466, %v958_v50  ;;  %v768_v53 = vsub.f32 %v5484_v23, %v704_v2  ;;  %v770_v45 = vsub.f32 %v5486_v24, %v706_v25 }
 0x138   : > { %v1083_v54 = vmul.f32 %v1019_v26, %v5703_v43  ;;  %v1085_v37 = vmul.f32 %v1021_v13, %v5707_v55  ;;  %v5731_v46 = vadd.f32 %v767_v18, %v767_v18  ;;  %v5733_v38 = vadd.f32 %v769_v62, %v769_v62 }
 0x139   : > { %v1084_v16 = vmul.f32 %v1020_v48, %v5713_v10  ;;  %v1086_v52 = vmul.f32 %v1022_v4, %v5717_v1  ;;  %v5737_v14 = vadd.f32 %v768_v53, %v768_v53  ;;  %v5739_v57 = vadd.f32 %v770_v45, %v770_v45 }
 0x13a   : > { %v1147_v39 = vadd.f32 -0.5983973, %v1083_v54  ;;  %v1149_v23 = vadd.f32 -0.5983973, %v1085_v37  ;;  %v5743_v24 = vmul.f32 %v5731_v46, %v5731_v46  ;;  %v5747_v41 = vmul.f32 %v5733_v38, %v5733_v38 }
 0x13b   : > { %v1148_v17 = vadd.f32 -0.5983973, %v1084_v16  ;;  %v1150_v49 = vadd.f32 -0.5983973, %v1086_v52  ;;  %v5751_v15 = vmul.f32 %v5737_v14, %v5737_v14  ;;  %v5755_v8 = vmul.f32 %v5739_v57, %v5739_v57 }
 0x13c   : > { %v1211_v47 = vmul.f32 %v1147_v39, %v5703_v43  ;;  %v1213_v21 = vmul.f32 %v1149_v23, %v5707_v55  ;;  %v959_v56 = vmul.f32 -0.006040975, %v5743_v24  ;;  %v961_v3 = vmul.f32 -0.006040975, %v5747_v41 }
 0x13d   : > { %v1212_v11 = vmul.f32 %v1148_v17, %v5713_v10  ;;  %v1214_v5 = vmul.f32 %v1150_v49, %v5717_v1  ;;  %v960_v59 = vmul.f32 -0.006040975, %v5751_v15  ;;  %v962_v60 = vmul.f32 -0.006040975, %v5755_v8 }
 0x13e   : > { %v1275_v36 = vadd.f32 2.5499265, %v1211_v47  ;;  %v1277_v19 = vadd.f32 2.5499265, %v1213_v21  ;;  %v1023_v50 = vadd.f32 0.08060466, %v959_v56  ;;  %v4983_v2 = vpack.c.bf16 %v5686_v34, %v5659_v9 }
 0x13f   : > { %v1276_v25 = vadd.f32 2.5499265, %v1212_v11  ;;  %v1278_v26 = vadd.f32 2.5499265, %v1214_v5  ;;  %v1025_v13 = vadd.f32 0.08060466, %v961_v3  ;;  %v4999_v18 = vpack.c.bf16 %v5695_v31, %v5662_v61 }
 0x140   : > { %v1339_v62 = vmul.f32 %v1275_v36, %v5703_v43  ;;  %v1341_v48 = vmul.f32 %v1277_v19, %v5707_v55  ;;  %v1087_v4 = vmul.f32 %v1023_v50, %v5743_v24  ;;  %v1024_v53 = vadd.f32 0.08060466, %v960_v59  ;;  %4984 = vmatprep.subr.bf16.mxu0 %v4983_v2 }
 0x141   : > { %v1340_v45 = vmul.f32 %v1276_v25, %v5713_v10  ;;  %v1342_v54 = vmul.f32 %v1278_v26, %v5717_v1  ;;  %v1089_v9 = vmul.f32 %v1025_v13, %v5747_v41  ;;  %v1026_v34 = vadd.f32 0.08060466, %v962_v60  ;;  %5000 = vmatprep.subr.bf16.mxu1 %v4999_v18  ;;  %4986 = vmatpush1.bf16.msra.mxu0 %v4985_v22 }
 0x142   : > { %v1403_v61 = vadd.f32 -5.167685, %v1339_v62  ;;  %v1405_v31 = vadd.f32 -5.167685, %v1341_v48  ;;  %v1151_v37 = vadd.f32 -0.5983973, %v1087_v4  ;;  %v1088_v16 = vmul.f32 %v1024_v53, %v5751_v15  ;;  %5002 = vmatpush1.bf16.msra.mxu1 %v5001_v30 }
 0x143   : > { %v1404_v52 = vadd.f32 -5.167685, %v1340_v45  ;;  %v1406_v39 = vadd.f32 -5.167685, %v1342_v54  ;;  %v1153_v23 = vadd.f32 -0.5983973, %v1089_v9  ;;  %v1090_v17 = vmul.f32 %v1026_v34, %v5755_v8 }
 0x144   : > { %v1467_v49 = vmul.f32 %v1403_v61, %v5703_v43  ;;  %v1469_v47 = vmul.f32 %v1405_v31, %v5707_v55  ;;  %v1215_v12 = vmul.f32 %v1151_v37, %v5743_v24  ;;  %v1152_v40 = vadd.f32 -0.5983973, %v1088_v16 }
 0x145   : > { %v1468_v22 = vmul.f32 %v1404_v52, %v5713_v10  ;;  %v1470_v21 = vmul.f32 %v1406_v39, %v5717_v1  ;;  %v1217_v56 = vmul.f32 %v1153_v23, %v5747_v41  ;;  %v1154_v27 = vadd.f32 -0.5983973, %v1090_v17 }
 0x146   : > { %v1531_v44 = vadd.f32 3.1415918, %v1467_v49  ;;  %v1533_v30 = vadd.f32 3.1415918, %v1469_v47  ;;  %v1279_v3 = vadd.f32 2.5499265, %v1215_v12  ;;  %v1216_v11 = vmul.f32 %v1152_v40, %v5751_v15 }
 0x147   : > { %v1532_v5 = vadd.f32 3.1415918, %v1468_v22  ;;  %v1534_v59 = vadd.f32 3.1415918, %v1470_v21  ;;  %v1281_v43 = vadd.f32 2.5499265, %v1217_v56  ;;  %v1218_v55 = vmul.f32 %v1154_v27, %v5755_v8 }
 0x148   : > { %v5792_v60 = vmul.f32 %v1531_v44, %v5688_v20  ;;  %v5795_v10 = vmul.f32 %v1533_v30, %v5690_v35  ;;  %v1343_v1 = vmul.f32 %v1279_v3, %v5743_v24  ;;  %v1280_v36 = vadd.f32 2.5499265, %v1216_v11 }
 0x149   : > { %v5799_v19 = vmul.f32 %v1532_v5, %v5697_v63  ;;  %v5802_v50 = vmul.f32 %v1534_v59, %v5699_v42  ;;  %v1345_v2 = vmul.f32 %v1281_v43, %v5747_v41  ;;  %v1282_v25 = vadd.f32 2.5499265, %v1218_v55 }
 0x14a   : > { %v1407_v26 = vadd.f32 -5.167685, %v1343_v1  ;;  %v1344_v13 = vmul.f32 %v1280_v36, %v5751_v15  ;;  %v643_v20 = vadd.f32 0.5, %v5491_v29  ;;  %v645_v35 = vadd.f32 0.5, %v5493_v32 }
 0x14b   : > { %v1409_v18 = vadd.f32 -5.167685, %v1345_v2  ;;  %v1346_v62 = vmul.f32 %v1282_v25, %v5755_v8  ;;  %v644_v48 = vadd.f32 0.5, %v5500_v51  ;;  %v646_v63 = vadd.f32 0.5, %v5502_v58 }
 0x14c   : > { %v1471_v42 = vmul.f32 %v1407_v26, %v5743_v24  ;;  %v1408_v4 = vadd.f32 -5.167685, %v1344_v13  ;;  %v707_v53 = vfloor.f32 %v643_v20  ;;  %v709_v45 = vfloor.f32 %v645_v35 }
 0x14d   : > { %v1473_v54 = vmul.f32 %v1409_v18, %v5747_v41  ;;  %v1410_v9 = vadd.f32 -5.167685, %v1346_v62  ;;  %v708_v34 = vfloor.f32 %v644_v48  ;;  %v710_v61 = vfloor.f32 %v646_v63 }
 0x14e   : > { %v1535_v31 = vadd.f32 3.1415918, %v1471_v42  ;;  %v1472_v37 = vmul.f32 %v1408_v4, %v5751_v15  ;;  %v771_v16 = vsub.f32 %v5491_v29, %v707_v53  ;;  %v773_v52 = vsub.f32 %v5493_v32, %v709_v45 }
 0x14f   : > { %v1537_v39 = vadd.f32 3.1415918, %v1473_v54  ;;  %v1474_v23 = vmul.f32 %v1410_v9, %v5755_v8  ;;  %v772_v24 = vsub.f32 %v5500_v51, %v708_v34  ;;  %v774_v17 = vsub.f32 %v5502_v58, %v710_v61 }
 0x150   : > { %v5820_v49 = vmul.f32 %v1535_v31, %v5731_v46  ;;  %v1536_v41 = vadd.f32 3.1415918, %v1472_v37  ;;  %v5822_v47 = vadd.f32 %v771_v16, %v771_v16  ;;  %v5824_v12 = vadd.f32 %v773_v52, %v773_v52 }
 0x151   : > { %v5827_v15 = vmul.f32 %v1537_v39, %v5733_v38  ;;  %v1538_v29 = vadd.f32 3.1415918, %v1474_v23  ;;  %v5829_v32 = vadd.f32 %v772_v24, %v772_v24  ;;  %v5831_v40 = vadd.f32 %v774_v17, %v774_v17 }
 0x152   : > { %v4989_v51 = vpack.c.bf16 %v5820_v49, %v5792_v60  ;;  %v1600_v58 = vmul.f32 %v1536_v41, %v5737_v14  ;;  %v5838_v46 = vmul.f32 %v5822_v47, %v5822_v47  ;;  %v5842_v8 = vmul.f32 %v5824_v12, %v5824_v12 }
 0x153   : > { %v5005_v38 = vpack.c.bf16 %v5827_v15, %v5795_v10  ;;  %v1602_v22 = vmul.f32 %v1538_v29, %v5739_v57  ;;  %v5849_v21 = vmul.f32 %v5829_v32, %v5829_v32  ;;  %v5853_v14 = vmul.f32 %v5831_v40, %v5831_v40 }
 0x154   : > { %v963_v56 = vmul.f32 -0.006040975, %v5838_v46  ;;  %v965_v27 = vmul.f32 -0.006040975, %v5842_v8  ;;  %v647_v44 = vadd.f32 0.5, %v5507_v6  ;;  %v649_v30 = vadd.f32 0.5, %v5509_v7 }
 0x155   : > { %v964_v3 = vmul.f32 -0.006040975, %v5849_v21  ;;  %v966_v57 = vmul.f32 -0.006040975, %v5853_v14  ;;  %v648_v11 = vadd.f32 0.5, %v5520_v28  ;;  %v650_v5 = vadd.f32 0.5, %v5522_v33 }
 0x156   : > { %v1027_v59 = vadd.f32 0.08060466, %v963_v56  ;;  %v1029_v43 = vadd.f32 0.08060466, %v965_v27  ;;  %v711_v55 = vfloor.f32 %v647_v44  ;;  %v713_v60 = vfloor.f32 %v649_v30 }
 0x157   : > { %v1028_v10 = vadd.f32 0.08060466, %v964_v3  ;;  %v1030_v1 = vadd.f32 0.08060466, %v966_v57  ;;  %v712_v36 = vfloor.f32 %v648_v11  ;;  %v714_v2 = vfloor.f32 %v650_v5 }
 0x158   : > { %v1091_v25 = vmul.f32 %v1027_v59, %v5838_v46  ;;  %v1093_v26 = vmul.f32 %v1029_v43, %v5842_v8  ;;  %v775_v13 = vsub.f32 %v5507_v6, %v711_v55  ;;  %v777_v20 = vsub.f32 %v5509_v7, %v713_v60 }
 0x159   : > { %v1092_v35 = vmul.f32 %v1028_v10, %v5849_v21  ;;  %v1094_v18 = vmul.f32 %v1030_v1, %v5853_v14  ;;  %v776_v62 = vsub.f32 %v5520_v28, %v712_v36  ;;  %v778_v48 = vsub.f32 %v5522_v33, %v714_v2 }
 0x15a   : > { %v1155_v63 = vadd.f32 -0.5983973, %v1091_v25  ;;  %v1157_v42 = vadd.f32 -0.5983973, %v1093_v26  ;;  %v5871_v4 = vadd.f32 %v775_v13, %v775_v13  ;;  %v5873_v53 = vadd.f32 %v777_v20, %v777_v20 }
 0x15b   : > { %v1156_v45 = vadd.f32 -0.5983973, %v1092_v35  ;;  %v1158_v54 = vadd.f32 -0.5983973, %v1094_v18  ;;  %v5875_v9 = vadd.f32 %v776_v62, %v776_v62  ;;  %v5877_v6 = vadd.f32 %v778_v48, %v778_v48  ;;  %v1971_v18 = vld [vmem:[%s8405_s4] sm:$0xff]  ;;  %v1973_v62 = vld [vmem:[%s8405_s4 + $0x10] sm:$0xff] }
 0x15c   : > { %v1219_v7 = vmul.f32 %v1155_v63, %v5838_v46  ;;  %v1221_v34 = vmul.f32 %v1157_v42, %v5842_v8  ;;  %v5883_v28 = vmul.f32 %v5871_v4, %v5871_v4  ;;  %v5887_v33 = vmul.f32 %v5873_v53, %v5873_v53 }
 0x15d   : > { %v1220_v61 = vmul.f32 %v1156_v45, %v5849_v21  ;;  %v1222_v31 = vmul.f32 %v1158_v54, %v5853_v14  ;;  %v5893_v37 = vmul.f32 %v5875_v9, %v5875_v9  ;;  %v5897_v16 = vmul.f32 %v5877_v6, %v5877_v6 }
 0x15e   : > { %v1283_v52 = vadd.f32 2.5499265, %v1219_v7  ;;  %v967_v39 = vmul.f32 -0.006040975, %v5883_v28  ;;  %v4987_v23 = vpack.c.bf16 %v1600_v58, %v5799_v19  ;;  %v1285_v24 = vadd.f32 2.5499265, %v1221_v34 }
 0x15f   : > { %v969_v17 = vmul.f32 -0.006040975, %v5887_v33  ;;  %v5003_v49 = vpack.c.bf16 %v1602_v22, %v5802_v50  ;;  %v1284_v41 = vadd.f32 2.5499265, %v1220_v61  ;;  %v968_v29 = vmul.f32 -0.006040975, %v5893_v37 }
 0x160   : > { %v1031_v15 = vadd.f32 0.08060466, %v967_v39  ;;  %4988 = vmatprep.subr.bf16.mxu0 %v4987_v23  ;;  %v1286_v56 = vadd.f32 2.5499265, %v1222_v31  ;;  %v970_v44 = vmul.f32 -0.006040975, %v5897_v16  ;;  %v1347_v30 = vmul.f32 %v1283_v52, %v5838_v46 }
 0x161   : > { %v1033_v27 = vadd.f32 0.08060466, %v969_v17  ;;  %5004 = vmatprep.subr.bf16.mxu1 %v5003_v49  ;;  %4990 = vmatpush1.bf16.msra.mxu0 %v4989_v51  ;;  %v1032_v58 = vadd.f32 0.08060466, %v968_v29  ;;  %v1349_v3 = vmul.f32 %v1285_v24, %v5842_v8  ;;  %v1348_v57 = vmul.f32 %v1284_v41, %v5849_v21  ;;  %v1974_v24 = vld [vmem:[%s8405_s4 + $0x18] sm:$0xff] }
 0x162   : > { %v1095_v19 = vmul.f32 %v1031_v15, %v5883_v28  ;;  %5006 = vmatpush1.bf16.msra.mxu1 %v5005_v38  ;;  %v1034_v22 = vadd.f32 0.08060466, %v970_v44  ;;  %v1350_v59 = vmul.f32 %v1286_v56, %v5853_v14  ;;  %v1411_v55 = vadd.f32 -5.167685, %v1347_v30 }
 0x163   : > { %v1097_v50 = vmul.f32 %v1033_v27, %v5887_v33  ;;  %v1096_v5 = vmul.f32 %v1032_v58, %v5893_v37  ;;  %v1413_v38 = vadd.f32 -5.167685, %v1349_v3  ;;  %v1412_v2 = vadd.f32 -5.167685, %v1348_v57  ;;  %v1975_v58 = vld [vmem:[%s8405_s4 + $0x20] sm:$0xff] }
 0x164   : > { %v1159_v11 = vadd.f32 -0.5983973, %v1095_v19  ;;  %v1098_v51 = vmul.f32 %v1034_v22, %v5897_v16  ;;  %v1414_v13 = vadd.f32 -5.167685, %v1350_v59  ;;  %v1475_v48 = vmul.f32 %v1411_v55, %v5838_v46  ;;  %v2824_v55 = vld [vmem:[%s8405_s4 + $0x50] sm:$0xff] }
 0x165   : > { %v1161_v43 = vadd.f32 -0.5983973, %v1097_v50  ;;  %v1160_v10 = vadd.f32 -0.5983973, %v1096_v5  ;;  %v1477_v45 = vmul.f32 %v1413_v38, %v5842_v8  ;;  %v5224_v34 = vmov 0   ;;  %v1972_v8 = vld [vmem:[%s8405_s4 + $0x8] sm:$0xff] }
 0x166   : > { %v1223_v60 = vmul.f32 %v1159_v11, %v5883_v28  ;;  %v1162_v36 = vadd.f32 -0.5983973, %v1098_v51  ;;  %5213 = vset.pattern.permute.xlu0 %v5224_v34  ;;  %5214 = vset.pattern.permute.xlu1 %v5224_v34  ;;  %v1476_v61 = vmul.f32 %v1412_v2, %v5849_v21  ;;  %v1478_v46 = vmul.f32 %v1414_v13, %v5853_v14  ;;  %v2826_v38 = vld [vmem:[%s8405_s4 + $0x60] sm:$0xff]  ;;  %v2828_v2 = vld [vmem:[%s8405_s4 + $0x70] sm:$0xff]  ;;  %v6059_v34 = vpop.f32.mrb[16].mxu1 }
 0x167   : > { %v1225_v1 = vmul.f32 %v1161_v43, %v5887_v33  ;;  %v1224_v26 = vmul.f32 %v1160_v10, %v5893_v37  ;;  %1981 = vperm.xlu0 %5213, %v1971_v18   ;;  %1991 = vperm.xlu1 %5214, %v1973_v62   ;;  %v1539_v17 = vadd.f32 3.1415918, %v1475_v48  ;;  %v1541_v41 = vadd.f32 3.1415918, %v1477_v45  ;;  %v1965_v10 = vld [vmem:[%s8403_s2 + $0x10] sm:$0xff]  ;;  %v4180_v13 = vld [vmem:[%s8405_s4 + $0x80] sm:$0xff] }
 0x168   : > { %v1287_v25 = vadd.f32 2.5499265, %v1223_v60  ;;  %v1226_v35 = vmul.f32 %v1162_v36, %v5897_v16  ;;  %v1540_v14 = vadd.f32 3.1415918, %v1476_v61  ;;  %v1542_v44 = vadd.f32 3.1415918, %v1478_v46 }
 0x169   : > { %v1289_v20 = vadd.f32 2.5499265, %v1225_v1  ;;  %v1288_v42 = vadd.f32 2.5499265, %v1224_v26  ;;  %v2825_v60 = vld [vmem:[%s8405_s4 + $0x58] sm:$0xff]  ;;  %v2827_v1 = vld [vmem:[%s8405_s4 + $0x68] sm:$0xff] }
 0x16a   : > { %v1351_v63 = vmul.f32 %v1287_v25, %v5883_v28  ;;  %v1290_v7 = vadd.f32 2.5499265, %v1226_v35  ;;  %v1606_v59 = vmul.f32 %v1542_v44, %v5831_v40  ;;  %v1963_v40 = vld [vmem:[%s8403_s2] sm:$0xff]  ;;  %v1966_v36 = vld [vmem:[%s8403_s2 + $0x18] sm:$0xff]  ;;  %v1968_v35 = vld [vmem:[%s8403_s2 + $0x28] sm:$0xff] }
 0x16b   : > { %v1353_v54 = vmul.f32 %v1289_v20, %v5887_v33  ;;  %v1352_v52 = vmul.f32 %v1288_v42, %v5893_v37  ;;  %1986 = vperm.xlu0 %5213, %v1972_v8   ;;  %1996 = vperm.xlu1 %5214, %v1974_v24   ;;  %v2829_v25 = vld [vmem:[%s8405_s4 + $0x78] sm:$0xff]  ;;  %v1967_v26 = vld [vmem:[%s8403_s2 + $0x20] sm:$0xff]  ;;  %v4181_v20 = vld [vmem:[%s8405_s4 + $0x88] sm:$0xff] }
 0x16c   : > { %v1415_v31 = vadd.f32 -5.167685, %v1351_v63  ;;  %v1354_v23 = vmul.f32 %v1290_v7, %v5897_v16  ;;  %v4182_v18 = vld [vmem:[%s8405_s4 + $0x90] sm:$0xff]  ;;  %v4183_v62 = vld [vmem:[%s8405_s4 + $0x98] sm:$0xff]  ;;  %v4184_v63 = vld [vmem:[%s8405_s4 + $0xa0] sm:$0xff]  ;;  %v6057_v7 = vpop.f32.mrb[16].mxu0 }
 0x16d   : > { %v1417_v39 = vadd.f32 -5.167685, %v1353_v54  ;;  %v1416_v49 = vadd.f32 -5.167685, %v1352_v52  ;;  %v1969_v48 = vld [vmem:[%s8403_s2 + $0x30] sm:$0xff]  ;;  %v4185_v42 = vld [vmem:[%s8405_s4 + $0xa8] sm:$0xff] }
 0x16e   : > { %v1479_v21 = vmul.f32 %v1415_v31, %v5883_v28  ;;  %v1418_v29 = vadd.f32 -5.167685, %v1354_v23  ;;  %v1976_v28 = vld [vmem:[%s8405_s4 + $0x28] sm:$0xff]  ;;  %v1970_v45 = vld [vmem:[%s8403_s2 + $0x38] sm:$0xff]  ;;  %v4186_v54 = vld [vmem:[%s8405_s4 + $0xb0] sm:$0xff]  ;;  %v6062_v61 = vpop.f32.mrb[17].mxu0 }
 0x16f   : > { %v1481_v15 = vmul.f32 %v1417_v39, %v5887_v33  ;;  %v1480_v27 = vmul.f32 %v1416_v49, %v5893_v37  ;;  %v1603_v33 = vmul.f32 %v1539_v17, %v5822_v47  ;;  %v1605_v37 = vmul.f32 %v1541_v41, %v5824_v12  ;;  %2001 = vperm.xlu0 %5213, %v1975_v58   ;;  %v6064_v31 = vpop.f32.mrb[17].mxu1  ;;  %v4187_v52 = vld [vmem:[%s8405_s4 + $0xb8] sm:$0xff]  ;;  %v4300_v46 = vld [vmem:[%s8405_s4 + $0xc0] sm:$0xff]  ;;  %v6074_v39 = vpop.f32.mrb[18].mxu0  ;;  %v4301_v17 = vld [vmem:[%s8405_s4 + $0xc8] sm:$0xff] }
 0x170   : > { %v1543_v56 = vadd.f32 3.1415918, %v1479_v21  ;;  %v1482_v19 = vmul.f32 %v1418_v29, %v5897_v16  ;;  %v1604_v16 = vmul.f32 %v1540_v14, %v5829_v32  ;;  %2006 = vperm.xlu1 %5214, %v1976_v28   ;;  %v1978_v32 = vld [vmem:[%s8405_s4 + $0x38] sm:$0xff]  ;;  %v6076_v23 = vpop.f32.mrb[18].mxu1  ;;  %v6079_v8 = vpop.f32.mrb[19].mxu0  ;;  %v4302_v21 = vld [vmem:[%s8405_s4 + $0xd0] sm:$0xff] }
 0x171   : > { %v1545_v30 = vadd.f32 3.1415918, %v1481_v15  ;;  %v1544_v50 = vadd.f32 3.1415918, %v1480_v27  ;;  %v6081_v24 = vpop.f32.mrb[19].mxu1  ;;  %v6090_v49 = vpop.f32.mrb[20].mxu0 }
 0x172   : > { %v1607_v3 = vmul.f32 %v1543_v56, %v5871_v4  ;;  %v1546_v57 = vadd.f32 3.1415918, %v1482_v19  ;;  %v1977_v4 = vld [vmem:[%s8405_s4 + $0x30] sm:$0xff]  ;;  %v6092_v41 = vpop.f32.mrb[20].mxu1  ;;  %v6094_v15 = vpop.f32.mrb[21].mxu0  ;;  %v4303_v14 = vld [vmem:[%s8405_s4 + $0xd8] sm:$0xff] }
 0x173   : > { %v1609_v22 = vmul.f32 %v1545_v30, %v5873_v53  ;;  %v1608_v5 = vmul.f32 %v1544_v50, %v5875_v9  ;;  %2011 = vperm.xlu0 %5213, %v1977_v4   ;;  %v2822_v53 = vld [vmem:[%s8405_s4 + $0x40] sm:$0xff]  ;;  %v2823_v9 = vld [vmem:[%s8405_s4 + $0x48] sm:$0xff]  ;;  %v6096_v29 = vpop.f32.mrb[21].mxu1  ;;  %v6104_v27 = vpop.f32.mrb[22].mxu0  ;;  %v4306_v28 = vld [vmem:[%s8405_s4 + $0xf0] sm:$0xff] }
 0x174   : > { %v4993_v11 = vpack.c.bf16 %v1607_v3, %v1603_v33  ;;  %v1610_v47 = vmul.f32 %v1546_v57, %v5877_v6  ;;  %2016 = vperm.xlu1 %5214, %v1978_v32   ;;  %v1964_v6 = vld [vmem:[%s8403_s2 + $0x8] sm:$0xff]  ;;  %v4304_v56 = vld [vmem:[%s8405_s4 + $0xe0] sm:$0xff]  ;;  %v6106_v44 = vpop.f32.mrb[22].mxu1  ;;  %v6108_v30 = vpop.f32.mrb[23].mxu0  ;;  %v4307_v50 = vld [vmem:[%s8405_s4 + $0xf8] sm:$0xff] }
 0x175   : > { %v5009_v43 = vpack.c.bf16 %v1609_v22, %v1605_v37  ;;  %v4991_v12 = vpack.c.bf16 %v1608_v5, %v1604_v16  ;;  %v6110_v19 = vpop.f32.mrb[23].mxu1  ;;  %v4305_v58 = vld [vmem:[%s8405_s4 + $0xe8] sm:$0xff]  ;;  %v6118_v33 = vpop.f32.mrb[24].mxu0  ;;  %v4631_v57 = vld [vmem:[%s8405_s4 + $0x100] sm:$0xff] }
 0x176   : > { %v5007_v51 = vpack.c.bf16 %v1610_v47, %v1606_v59  ;;  %8442 = vst [vmem:[#allocation2_spill] sm:$0xff] %v6118_v33  ;;  %v6120_v3 = vpop.f32.mrb[24].mxu1  ;;  %v6125_v37 = vpop.f32.mrb[25].mxu0 }
 0x177   : > { %4992 = vmatprep.subr.bf16.mxu0 %v4991_v12  ;;  %2832 = vperm.xlu0 %5213, %v2822_v53   ;;  %8443 = vst [vmem:[#allocation3_spill] sm:$0xff] %v6120_v3  ;;  %8444 = vst [vmem:[#allocation4_spill] sm:$0xff] %v6125_v37  ;;  %v6127_v22 = vpop.f32.mrb[25].mxu1  ;;  %v6132_v16 = vpop.f32.mrb[26].mxu0 }
 0x178   : > { %5008 = vmatprep.subr.bf16.mxu1 %v5007_v51  ;;  %4994 = vmatpush1.bf16.msra.mxu0 %v4993_v11  ;;  %8445 = vst [vmem:[#allocation5_spill] sm:$0xff] %v6127_v22  ;;  %8446 = vst [vmem:[#allocation6_spill] sm:$0xff] %v6132_v16  ;;  %v6134_v11 = vpop.f32.mrb[26].mxu1  ;;  %v6136_v5 = vpop.f32.mrb[27].mxu0 }
 0x179   : > { %5010 = vmatpush1.bf16.msra.mxu1 %v5009_v43  ;;  %2837 = vperm.xlu1 %5214, %v2823_v9   ;;  %8447 = vst [vmem:[#allocation7_spill] sm:$0xff] %v6134_v11  ;;  %8448 = vst [vmem:[#allocation8_spill] sm:$0xff] %v6136_v5  ;;  %v6138_v59 = vpop.f32.mrb[27].mxu1  ;;  %v6140_v43 = vpop.f32.mrb[28].mxu0  ;;  %v651_v9 = vadd.f32 0.5, %v6057_v7 }
 0x17a   : > { %8449 = vst [vmem:[#allocation9_spill] sm:$0xff] %v6138_v59  ;;  %8450 = vst [vmem:[#allocation10_spill] sm:$0xff] %v6140_v43  ;;  %v6142_v47 = vpop.f32.mrb[28].mxu1  ;;  %v6144_v4 = vpop.f32.mrb[29].mxu0 }
 0x17b   : > { %4891 = vmatmul.mubr.msk.f32.vlgmr.msra.gmra.mrb[32].mxu0 %vm2019_vm1, %v1963_v40  ;;  %2842 = vperm.xlu0 %5213, %v2824_v55   ;;  %8451 = vst [vmem:[#allocation11_spill] sm:$0xff] %v6142_v47  ;;  %8452 = vst [vmem:[#allocation12_spill] sm:$0xff] %v6144_v4  ;;  %v6146_v12 = vpop.f32.mrb[29].mxu1  ;;  %v6148_v51 = vpop.f32.mrb[30].mxu0  ;;  %v652_v55 = vadd.f32 0.5, %v6062_v61 }
 0x17c   : > { %4899 = vmatmul.mubr.msk.f32.vlgmr.msra.gmra.mrb[32].mxu1 %vm2019_vm1, %v1963_v40  ;;  %2114 = vmatprep.mubr.f32.mxu0 %v8407_v0  ;;  %8453 = vst [vmem:[#allocation13_spill] sm:$0xff] %v6146_v12  ;;  %8454 = vst [vmem:[#allocation14_spill] sm:$0xff] %v6148_v51  ;;  %v6150_v32 = vpop.f32.mrb[30].mxu1  ;;  %v6152_v40 = vpop.f32.mrb[31].mxu0 }
 0x17d   : > { %2227 = vmatprep.mubr.f32.mxu1 %v8407_v0  ;;  %2847 = vperm.xlu1 %5214, %v2825_v60   ;;  %8455 = vst [vmem:[#allocation15_spill] sm:$0xff] %v6150_v32  ;;  %8456 = vst [vmem:[#allocation16_spill] sm:$0xff] %v6152_v40  ;;  %v6154_v53 = vpop.f32.mrb[31].mxu1  ;;  %v654_v60 = vadd.f32 0.5, %v6064_v31 }
 0x17e   : > { %8457 = vst [vmem:[#allocation17_spill] sm:$0xff] %v6154_v53 }
 0x17f   : > { %4892 = vmatmul.mubr.msk.f32.gmra.mrb[34].mxu0 %vm2019_vm1, %v1964_v6  ;;  %2852 = vperm.xlu0 %5213, %v2826_v38  }
 0x180   : > { %4900 = vmatmul.mubr.msk.f32.gmra.mrb[34].mxu1 %vm2019_vm1, %v1964_v6  ;;  %2120 = vmatprep.mubr.f32.mxu0 %v8407_v0  ;;  %v653_v6 = vadd.f32 0.5, %v6059_v34 }
 0x181   : > { %2233 = vmatprep.mubr.f32.mxu1 %v8407_v0  ;;  %2857 = vperm.xlu1 %5214, %v2827_v1   ;;  %v716_v1 = vfloor.f32 %v652_v55 }
 0x182   : > { %v717_v38 = vfloor.f32 %v653_v6 }
 0x183   : > { %4893 = vmatmul.mubr.msk.f32.gmra.mrb[36].mxu0 %vm2019_vm1, %v1965_v10  ;;  %2862 = vperm.xlu0 %5213, %v2828_v2   ;;  %v655_v2 = vadd.f32 0.5, %v6074_v39 }
 0x184   : > { %4901 = vmatmul.mubr.msk.f32.gmra.mrb[36].mxu1 %vm2019_vm1, %v1965_v10  ;;  %2126 = vmatprep.mubr.f32.mxu0 %v8407_v0  ;;  %v715_v10 = vfloor.f32 %v651_v9  ;;  %v665_v9 = vadd.f32 0.5, %v6106_v44 }
 0x185   : > { %2239 = vmatprep.mubr.f32.mxu1 %v8407_v0  ;;  %2867 = vperm.xlu1 %5214, %v2829_v25   ;;  %v657_v25 = vadd.f32 0.5, %v6076_v23 }
 0x187   : > { %4894 = vmatmul.mubr.msk.f32.gmra.mrb[38].mxu0 %vm2019_vm1, %v1966_v36  ;;  %4190 = vperm.xlu0 %5213, %v4180_v13   ;;  %v656_v13 = vadd.f32 0.5, %v6079_v8 }
 0x188   : > { %4902 = vmatmul.mubr.msk.f32.gmra.mrb[38].mxu1 %vm2019_vm1, %v1966_v36  ;;  %2132 = vmatprep.mubr.f32.mxu0 %v8407_v0  ;;  %v718_v36 = vfloor.f32 %v654_v60 }
 0x189   : > { %2245 = vmatprep.mubr.f32.mxu1 %v8407_v0  ;;  %4195 = vperm.xlu1 %5214, %v4181_v20   ;;  %v781_v20 = vsub.f32 %v6059_v34, %v717_v38 }
 0x18b   : > { %4895 = vmatmul.mubr.msk.f32.gmra.mrb[40].mxu0 %vm2019_vm1, %v1967_v26  ;;  %4200 = vperm.xlu0 %5213, %v4182_v18   ;;  %v782_v18 = vsub.f32 %v6064_v31, %v718_v36 }
 0x18c   : > { %4903 = vmatmul.mubr.msk.f32.gmra.mrb[40].mxu1 %vm2019_vm1, %v1967_v26  ;;  %2138 = vmatprep.mubr.f32.mxu0 %v8407_v0  ;;  %v779_v26 = vsub.f32 %v6057_v7, %v715_v10  ;;  %v6172_v7 = vadd.f32 %v781_v20, %v781_v20 }
 0x18d   : > { %2251 = vmatprep.mubr.f32.mxu1 %v8407_v0  ;;  %4205 = vperm.xlu1 %5214, %v4183_v62   ;;  %v719_v62 = vfloor.f32 %v655_v2  ;;  %v6176_v34 = vadd.f32 %v782_v18, %v782_v18 }
 0x18f   : > { %4896 = vmatmul.mubr.msk.f32.gmra.mrb[42].mxu0 %vm2019_vm1, %v1968_v35  ;;  %4210 = vperm.xlu0 %5213, %v4184_v63   ;;  %v6167_v63 = vadd.f32 %v779_v26, %v779_v26  ;;  %v6199_v6 = vmul.f32 %v6176_v34, %v6176_v34 }
 0x190   : > { %4904 = vmatmul.mubr.msk.f32.gmra.mrb[42].mxu1 %vm2019_vm1, %v1968_v35  ;;  %2144 = vmatprep.mubr.f32.mxu0 %v8407_v0  ;;  %v780_v35 = vsub.f32 %v6062_v61, %v716_v1  ;;  %v783_v61 = vsub.f32 %v6074_v39, %v719_v62  ;;  %v6190_v39 = vmul.f32 %v6172_v7, %v6172_v7 }
 0x191   : > { %2257 = vmatprep.mubr.f32.mxu1 %v8407_v0  ;;  %4215 = vperm.xlu1 %5214, %v4185_v42   ;;  %v658_v42 = vadd.f32 0.5, %v6081_v24  ;;  %v974_v18 = vmul.f32 -0.006040975, %v6199_v6 }
 0x192   : > { %v6201_v55 = vadd.f32 %v783_v61, %v783_v61 }
 0x193   : > { %4897 = vmatmul.mubr.msk.f32.gmra.mrb[44].mxu0 %vm2019_vm1, %v1969_v48  ;;  %4220 = vperm.xlu0 %5213, %v4186_v54   ;;  %v659_v54 = vadd.f32 0.5, %v6090_v49 }
 0x194   : > { %4905 = vmatmul.mubr.msk.f32.gmra.mrb[44].mxu1 %vm2019_vm1, %v1969_v48  ;;  %2150 = vmatprep.mubr.f32.mxu0 %v8407_v0  ;;  %v721_v48 = vfloor.f32 %v657_v25  ;;  %v6216_v62 = vmul.f32 %v6201_v55, %v6201_v55 }
 0x195   : > { %2263 = vmatprep.mubr.f32.mxu1 %v8407_v0  ;;  %4225 = vperm.xlu1 %5214, %v4187_v52   ;;  %v661_v52 = vadd.f32 0.5, %v6092_v41 }
 0x196   : > { %v785_v31 = vsub.f32 %v6076_v23, %v721_v48 }
 0x197   : > { %4898 = vmatmul.mubr.msk.f32.gmra.mrb[46].mxu0 %vm2019_vm1, %v1970_v45  ;;  %4310 = vperm.xlu0 %5213, %v4300_v46   ;;  %v6174_v46 = vadd.f32 %v780_v35, %v780_v35  ;;  %v729_v35 = vfloor.f32 %v665_v9 }
 0x198   : > { %4906 = vmatmul.mubr.msk.f32.gmra.mrb[46].mxu1 %vm2019_vm1, %v1970_v45  ;;  %2958 = vmatprep.mubr.f32.mxu0 %v8407_v0  ;;  %v720_v45 = vfloor.f32 %v656_v13  ;;  %v973_v13 = vmul.f32 -0.006040975, %v6190_v39 }
 0x199   : > { %3071 = vmatprep.mubr.f32.mxu1 %v8407_v0  ;;  %4315 = vperm.xlu1 %5214, %v4301_v17   ;;  %v6182_v17 = vmul.f32 %v6167_v63, %v6167_v63  ;;  %v6194_v23 = vmul.f32 %v6174_v46, %v6174_v46 }
 0x19b   : > { %4320 = vperm.xlu0 %5213, %v4302_v21   ;;  %v722_v21 = vfloor.f32 %v658_v42  ;;  %v971_v60 = vmul.f32 -0.006040975, %v6182_v17  ;;  %v972_v20 = vmul.f32 -0.006040975, %v6194_v23 }
 0x19d   : > { %4325 = vperm.xlu1 %5214, %v4303_v14   ;;  %v660_v14 = vadd.f32 0.5, %v6094_v15  ;;  %v786_v10 = vsub.f32 %v6081_v24, %v722_v21  ;;  %v1035_v48 = vadd.f32 0.08060466, %v971_v60  ;;  %v1036_v21 = vadd.f32 0.08060466, %v972_v20 }
 0x19f   : > { %4330 = vperm.xlu0 %5213, %v4304_v56   ;;  %v662_v56 = vadd.f32 0.5, %v6096_v29  ;;  %v724_v38 = vfloor.f32 %v660_v14  ;;  %v793_v14 = vsub.f32 %v6106_v44, %v729_v35 }
 0x1a1   : > { %4335 = vperm.xlu1 %5214, %v4305_v58   ;;  %v784_v58 = vsub.f32 %v6079_v8, %v720_v45  ;;  %v6203_v8 = vadd.f32 %v785_v31, %v785_v31  ;;  %v726_v1 = vfloor.f32 %v662_v56  ;;  %v1037_v31 = vadd.f32 0.08060466, %v973_v13 }
 0x1a2   : > { %v664_v56 = vadd.f32 0.5, %v6108_v30 }
 0x1a3   : > { %4340 = vperm.xlu0 %5213, %v4306_v28   ;;  %v723_v28 = vfloor.f32 %v659_v54  ;;  %v6207_v36 = vadd.f32 %v784_v58, %v784_v58  ;;  %v6220_v24 = vmul.f32 %v6203_v8, %v6203_v8  ;;  %v790_v42 = vsub.f32 %v6096_v29, %v726_v1 }
 0x1a4   : > { %v666_v58 = vadd.f32 0.5, %v6110_v19  ;;  %v1101_v1 = vmul.f32 %v1037_v31, %v6190_v39 }
 0x1a5   : > { %4345 = vperm.xlu1 %5214, %v4307_v50   ;;  %v725_v50 = vfloor.f32 %v661_v52  ;;  %v787_v2 = vsub.f32 %v6090_v49, %v723_v28  ;;  %v6222_v49 = vadd.f32 %v786_v10, %v786_v10  ;;  %v6228_v45 = vmul.f32 %v6207_v36, %v6207_v36 }
 0x1a6   : > { %v977_v29 = vmul.f32 -0.006040975, %v6220_v24  ;;  %v1038_v28 = vadd.f32 0.08060466, %v974_v18  ;;  %v730_v35 = vfloor.f32 %v666_v58 }
 0x1a7   : > { %4634 = vperm.xlu0 %5213, %v4631_v57   ;;  %v663_v57 = vadd.f32 0.5, %v6104_v27  ;;  %v789_v25 = vsub.f32 %v6092_v41, %v725_v50  ;;  %v788_v41 = vsub.f32 %v6094_v15, %v724_v38  ;;  %v6230_v54 = vadd.f32 %v787_v2, %v787_v2 }
 0x1a8   : > { %v975_v15 = vmul.f32 -0.006040975, %v6216_v62  ;;  %v6242_v50 = vmul.f32 %v6222_v49, %v6222_v49  ;;  %v976_v9 = vmul.f32 -0.006040975, %v6228_v45  ;;  %v1099_v38 = vmul.f32 %v1035_v48, %v6182_v17 }
 0x1a9   : > { %v727_v26 = vfloor.f32 %v663_v57  ;;  %v6232_v52 = vadd.f32 %v789_v25, %v789_v25  ;;  %v6244_v57 = vadd.f32 %v788_v41, %v788_v41  ;;  %v6251_v44 = vmul.f32 %v6230_v54, %v6230_v54 }
 0x1aa   : > { %v6261_v2 = vadd.f32 %v793_v14, %v793_v14  ;;  %v728_v25 = vfloor.f32 %v664_v56  ;;  %v1039_v13 = vadd.f32 0.08060466, %v975_v15  ;;  %v1041_v20 = vadd.f32 0.08060466, %v977_v29 }
 0x1ab   : > { %v791_v61 = vsub.f32 %v6104_v27, %v727_v26  ;;  %v6246_v27 = vadd.f32 %v790_v42, %v790_v42  ;;  %v6255_v60 = vmul.f32 %v6232_v52, %v6232_v52  ;;  %v1100_v26 = vmul.f32 %v1036_v21, %v6194_v23 }
 0x1ac   : > { %v1102_v18 = vmul.f32 %v1038_v28, %v6199_v6  ;;  %v978_v41 = vmul.f32 -0.006040975, %v6242_v50  ;;  %v6268_v42 = vmul.f32 %v6244_v57, %v6244_v57  ;;  %v979_v31 = vmul.f32 -0.006040975, %v6251_v44 }
 0x1ad   : > { %v6257_v10 = vadd.f32 %v791_v61, %v791_v61  ;;  %v6272_v48 = vmul.f32 %v6246_v27, %v6246_v27  ;;  %v1040_v61 = vadd.f32 0.08060466, %v976_v9  ;;  %v981_v21 = vmul.f32 -0.006040975, %v6255_v60 }
 0x1ae   : > { %v1163_v56 = vadd.f32 -0.5983973, %v1099_v38  ;;  %v1165_v15 = vadd.f32 -0.5983973, %v1101_v1  ;;  %v6282_v29 = vmul.f32 %v6261_v2, %v6261_v2  ;;  %v792_v58 = vsub.f32 %v6108_v30, %v728_v25 }
 0x1af   : > { %v6278_v14 = vmul.f32 %v6257_v10, %v6257_v10  ;;  %v1164_v28 = vadd.f32 -0.5983973, %v1100_v26  ;;  %v1103_v0 = vmul.f32 %v1039_v13, %v6216_v62  ;;  %v1105_v9 = vmul.f32 %v1041_v20, %v6220_v24 }
 0x1b0   : > { %v794_v53 = vsub.f32 %v6110_v19, %v730_v35  ;;  %v1042_v40 = vadd.f32 0.08060466, %v978_v41  ;;  %v980_v32 = vmul.f32 -0.006040975, %v6268_v42  ;;  %v982_v51 = vmul.f32 -0.006040975, %v6272_v48 }
 0x1b1   : > { %v1104_v38 = vmul.f32 %v1040_v61, %v6228_v45  ;;  %v1043_v1 = vadd.f32 0.08060466, %v979_v31  ;;  %v1045_v12 = vadd.f32 0.08060466, %v981_v21  ;;  %v983_v4 = vmul.f32 -0.006040975, %v6278_v14 }
 0x1b2   : > { %v1227_v30 = vmul.f32 %v1163_v56, %v6182_v17  ;;  %v1166_v25 = vadd.f32 -0.5983973, %v1102_v18  ;;  %v985_v26 = vmul.f32 -0.006040975, %v6282_v29  ;;  %v6294_v13 = vadd.f32 %v792_v58, %v792_v58 }
 0x1b3   : > { %v1229_v19 = vmul.f32 %v1165_v15, %v6190_v39  ;;  %v1167_v20 = vadd.f32 -0.5983973, %v1103_v0  ;;  %v1169_v35 = vadd.f32 -0.5983973, %v1105_v9  ;;  %v6297_v41 = vadd.f32 %v794_v53, %v794_v53 }
 0x1b4   : > { %v1228_v47 = vmul.f32 %v1164_v28, %v6194_v23  ;;  %v1106_v61 = vmul.f32 %v1042_v40, %v6242_v50  ;;  %v1044_v31 = vadd.f32 0.08060466, %v980_v32  ;;  %v1046_v21 = vadd.f32 0.08060466, %v982_v51 }
 0x1b5   : > { %v1168_v43 = vadd.f32 -0.5983973, %v1104_v38  ;;  %v1107_v56 = vmul.f32 %v1043_v1, %v6251_v44  ;;  %v1109_v18 = vmul.f32 %v1045_v12, %v6255_v60  ;;  %v1047_v59 = vadd.f32 0.08060466, %v983_v4 }
 0x1b6   : > { %v1291_v58 = vadd.f32 2.5499265, %v1227_v30  ;;  %v1230_v5 = vmul.f32 %v1166_v25, %v6199_v6  ;;  %v1049_v15 = vadd.f32 0.08060466, %v985_v26  ;;  %v6306_v0 = vmul.f32 %v6294_v13, %v6294_v13 }
 0x1b7   : > { %v1293_v53 = vadd.f32 2.5499265, %v1229_v19  ;;  %v1231_v28 = vmul.f32 %v1167_v20, %v6216_v62  ;;  %v1233_v32 = vmul.f32 %v1169_v35, %v6220_v24  ;;  %v6312_v51 = vmul.f32 %v6297_v41, %v6297_v41 }
 0x1b8   : > { %v1292_v40 = vadd.f32 2.5499265, %v1228_v47  ;;  %v1170_v12 = vadd.f32 -0.5983973, %v1106_v61  ;;  %v1108_v4 = vmul.f32 %v1044_v31, %v6268_v42  ;;  %v1110_v9 = vmul.f32 %v1046_v21, %v6272_v48 }
 0x1b9   : > { %v1232_v38 = vmul.f32 %v1168_v43, %v6228_v45  ;;  %v1171_v1 = vadd.f32 -0.5983973, %v1107_v56  ;;  %v1173_v30 = vadd.f32 -0.5983973, %v1109_v18  ;;  %v1111_v25 = vmul.f32 %v1047_v59, %v6278_v14 }
 0x1ba   : > { %v1355_v26 = vmul.f32 %v1291_v58, %v6182_v17  ;;  %v1294_v19 = vadd.f32 2.5499265, %v1230_v5  ;;  %v1113_v20 = vmul.f32 %v1049_v15, %v6282_v29  ;;  %v984_v35 = vmul.f32 -0.006040975, %v6306_v0 }
 0x1bb   : > { %v1357_v47 = vmul.f32 %v1293_v53, %v6190_v39  ;;  %v1295_v61 = vadd.f32 2.5499265, %v1231_v28  ;;  %v1297_v11 = vadd.f32 2.5499265, %v1233_v32  ;;  %v986_v31 = vmul.f32 -0.006040975, %v6312_v51 }
 0x1bc   : > { %v1356_v21 = vmul.f32 %v1292_v40, %v6194_v23  ;;  %v1234_v43 = vmul.f32 %v1170_v12, %v6242_v50  ;;  %v1172_v56 = vadd.f32 -0.5983973, %v1108_v4  ;;  %v1174_v18 = vadd.f32 -0.5983973, %v1110_v9 }
 0x1bd   : > { %v1296_v59 = vadd.f32 2.5499265, %v1232_v38  ;;  %v1235_v58 = vmul.f32 %v1171_v1, %v6251_v44  ;;  %v1237_v5 = vmul.f32 %v1173_v30, %v6255_v60  ;;  %v1175_v15 = vadd.f32 -0.5983973, %v1111_v25 }
 0x1be   : > { %v1419_v16 = vadd.f32 -5.167685, %v1355_v26  ;;  %v1358_v22 = vmul.f32 %v1294_v19, %v6199_v6  ;;  %v1177_v53 = vadd.f32 -0.5983973, %v1113_v20  ;;  %v1048_v28 = vadd.f32 0.08060466, %v984_v35 }
 0x1bf   : > { %v1421_v32 = vadd.f32 -5.167685, %v1357_v47  ;;  %v1359_v37 = vmul.f32 %v1295_v61, %v6216_v62  ;;  %v1361_v40 = vmul.f32 %v1297_v11, %v6220_v24  ;;  %v1050_v3 = vadd.f32 0.08060466, %v986_v31 }
 0x1c0   : > { %v1420_v12 = vadd.f32 -5.167685, %v1356_v21  ;;  %v1298_v4 = vadd.f32 2.5499265, %v1234_v43  ;;  %v1236_v9 = vmul.f32 %v1172_v56, %v6268_v42  ;;  %v1238_v38 = vmul.f32 %v1174_v18, %v6272_v48 }
 0x1c1   : > { %v1360_v1 = vmul.f32 %v1296_v59, %v6228_v45  ;;  %v1299_v30 = vadd.f32 2.5499265, %v1235_v58  ;;  %v1301_v25 = vadd.f32 2.5499265, %v1237_v5  ;;  %v1239_v26 = vmul.f32 %v1175_v15, %v6278_v14 }
 0x1c2   : > { %v1483_v19 = vmul.f32 %v1419_v16, %v6182_v17  ;;  %v1422_v20 = vadd.f32 -5.167685, %v1358_v22  ;;  %v1241_v35 = vmul.f32 %v1177_v53, %v6282_v29  ;;  %v1112_v11 = vmul.f32 %v1048_v28, %v6306_v0 }
 0x1c3   : > { %v1485_v47 = vmul.f32 %v1421_v32, %v6190_v39  ;;  %v1423_v61 = vadd.f32 -5.167685, %v1359_v37  ;;  %v1425_v31 = vadd.f32 -5.167685, %v1361_v40  ;;  %v1114_v21 = vmul.f32 %v1050_v3, %v6312_v51 }
 0x1c4   : > { %v1484_v43 = vmul.f32 %v1420_v12, %v6194_v23  ;;  %v1362_v56 = vmul.f32 %v1298_v4, %v6242_v50  ;;  %v1300_v18 = vadd.f32 2.5499265, %v1236_v9  ;;  %v1302_v59 = vadd.f32 2.5499265, %v1238_v38 }
 0x1c5   : > { %v1424_v58 = vadd.f32 -5.167685, %v1360_v1  ;;  %v1363_v16 = vmul.f32 %v1299_v30, %v6251_v44  ;;  %v1365_v22 = vmul.f32 %v1301_v25, %v6255_v60  ;;  %v1303_v5 = vadd.f32 2.5499265, %v1239_v26 }
 0x1c6   : > { %v1547_v15 = vadd.f32 3.1415918, %v1483_v19  ;;  %v1486_v53 = vmul.f32 %v1422_v20, %v6199_v6  ;;  %v1305_v28 = vadd.f32 2.5499265, %v1241_v35  ;;  %v1176_v37 = vadd.f32 -0.5983973, %v1112_v11 }
 0x1c7   : > { %v1549_v32 = vadd.f32 3.1415918, %v1485_v47  ;;  %v1487_v3 = vmul.f32 %v1423_v61, %v6216_v62  ;;  %v1489_v40 = vmul.f32 %v1425_v31, %v6220_v24  ;;  %v1178_v12 = vadd.f32 -0.5983973, %v1114_v21 }
 0x1c8   : > { %v1548_v4 = vadd.f32 3.1415918, %v1484_v43  ;;  %v1426_v9 = vadd.f32 -5.167685, %v1362_v56  ;;  %v1364_v38 = vmul.f32 %v1300_v18, %v6268_v42  ;;  %v1366_v1 = vmul.f32 %v1302_v59, %v6272_v48 }
 0x1c9   : > { %v1488_v30 = vmul.f32 %v1424_v58, %v6228_v45  ;;  %v1427_v25 = vadd.f32 -5.167685, %v1363_v16  ;;  %v1429_v26 = vadd.f32 -5.167685, %v1365_v22  ;;  %v1367_v19 = vmul.f32 %v1303_v5, %v6278_v14 }
 0x1ca   : > { %v6351_v20 = vmul.f32 %v1547_v15, %v6167_v63  ;;  %v1550_v35 = vadd.f32 3.1415918, %v1486_v53  ;;  %v1369_v11 = vmul.f32 %v1305_v28, %v6282_v29  ;;  %v1240_v47 = vmul.f32 %v1176_v37, %v6306_v0 }
 0x1cb   : > { %v6356_v61 = vmul.f32 %v1549_v32, %v6172_v7  ;;  %v1551_v31 = vadd.f32 3.1415918, %v1487_v3  ;;  %v1553_v21 = vadd.f32 3.1415918, %v1489_v40  ;;  %v1242_v43 = vmul.f32 %v1178_v12, %v6312_v51 }
 0x1cc   : > { %v1490_v56 = vmul.f32 %v1426_v9, %v6242_v50  ;;  %v1428_v18 = vadd.f32 -5.167685, %v1364_v38  ;;  %v1430_v59 = vadd.f32 -5.167685, %v1366_v1  ;;  %v1643_v58 = vmul.f32 -0.020783309, %v6182_v17 }
 0x1cd   : > { %v1552_v63 = vadd.f32 3.1415918, %v1488_v30  ;;  %v1491_v16 = vmul.f32 %v1427_v25, %v6251_v44  ;;  %v1493_v22 = vmul.f32 %v1429_v26, %v6255_v60  ;;  %v1431_v5 = vadd.f32 -5.167685, %v1367_v19 }
 0x1ce   : > { %v6364_v15 = vmul.f32 %v1548_v4, %v6174_v46  ;;  %v1433_v7 = vadd.f32 -5.167685, %v1369_v11  ;;  %v1304_v53 = vadd.f32 2.5499265, %v1240_v47  ;;  %v1645_v28 = vmul.f32 -0.020783309, %v6190_v39 }
 0x1cf   : > { %v6368_v37 = vmul.f32 %v1550_v35, %v6176_v34  ;;  %v1306_v32 = vadd.f32 2.5499265, %v1242_v43  ;;  %v1647_v3 = vmul.f32 -0.020783309, %v6216_v62  ;;  %v1649_v40 = vmul.f32 -0.020783309, %v6220_v24 }
 0x1d0   : > { %8458 = vst [vmem:[#allocation18_spill] sm:$0xff] %v6364_v15  ;;  %v1554_v12 = vadd.f32 3.1415918, %v1490_v56  ;;  %v1492_v9 = vmul.f32 %v1428_v18, %v6268_v42  ;;  %v1494_v38 = vmul.f32 %v1430_v59, %v6272_v48  ;;  %v1675_v1 = vadd.f32 0.23012525, %v1643_v58 }
 0x1d1   : > { %8459 = vst [vmem:[#allocation19_spill] sm:$0xff] %v6368_v37  ;;  %v6375_v46 = vmul.f32 %v1551_v31, %v6201_v55  ;;  %v1555_v4 = vadd.f32 3.1415918, %v1491_v16  ;;  %v1557_v30 = vadd.f32 3.1415918, %v1493_v22  ;;  %v1495_v25 = vmul.f32 %v1431_v5, %v6278_v14 }
 0x1d2   : > { %v6379_v34 = vmul.f32 %v1553_v21, %v6203_v8  ;;  %v1497_v26 = vmul.f32 %v1433_v7, %v6282_v29  ;;  %v1368_v19 = vmul.f32 %v1304_v53, %v6306_v0  ;;  %v1677_v35 = vadd.f32 0.23012525, %v1645_v28 }
 0x1d3   : > { %v6384_v11 = vmul.f32 %v1552_v63, %v6207_v36  ;;  %v1370_v47 = vmul.f32 %v1306_v32, %v6312_v51  ;;  %v1679_v43 = vadd.f32 0.23012525, %v1647_v3  ;;  %v1681_v55 = vadd.f32 0.23012525, %v1649_v40 }
 0x1d4   : > { %v6388_v31 = vmul.f32 %v1554_v12, %v6222_v49  ;;  %v1556_v56 = vadd.f32 3.1415918, %v1492_v9  ;;  %v1558_v18 = vadd.f32 3.1415918, %v1494_v38  ;;  %v1707_v8 = vmul.f32 %v1675_v1, %v6182_v17 }
 0x1d5   : > { %8460 = vst [vmem:[#allocation20_spill] sm:$0xff] %v6384_v11  ;;  %v6392_v21 = vmul.f32 %v1555_v4, %v6230_v54  ;;  %v6395_v59 = vmul.f32 %v1557_v30, %v6232_v52  ;;  %v1559_v58 = vadd.f32 3.1415918, %v1495_v25  ;;  %v1651_v36 = vmul.f32 -0.020783309, %v6251_v44 }
 0x1d6   : > { %8461 = vst [vmem:[#allocation21_spill] sm:$0xff] %v6388_v31  ;;  %v1561_v63 = vadd.f32 3.1415918, %v1497_v26  ;;  %v1432_v16 = vadd.f32 -5.167685, %v1368_v19  ;;  %v1709_v22 = vmul.f32 %v1677_v35, %v6190_v39  ;;  %v1711_v7 = vmul.f32 %v1679_v43, %v6216_v62 }
 0x1d7   : > { %v1653_v49 = vmul.f32 -0.020783309, %v6255_v60  ;;  %v1434_v5 = vadd.f32 -5.167685, %v1370_v47  ;;  %v1713_v53 = vmul.f32 %v1681_v55, %v6220_v24  ;;  %v1655_v54 = vmul.f32 -0.020783309, %v6278_v14 }
 0x1d8   : > { %v6404_v28 = vmul.f32 %v1556_v56, %v6244_v57  ;;  %v1739_v52 = vadd.f32 -1.3327482, %v1707_v8  ;;  %v1657_v32 = vmul.f32 -0.020783309, %v6282_v29  ;;  %v1644_v3 = vmul.f32 -0.020783309, %v6194_v23 }
 0x1d9   : > { %v6409_v40 = vmul.f32 %v1558_v18, %v6246_v27  ;;  %v1683_v12 = vadd.f32 0.23012525, %v1651_v36  ;;  %v1648_v9 = vmul.f32 -0.020783309, %v6228_v45  ;;  %v1646_v38 = vmul.f32 -0.020783309, %v6199_v6 }
 0x1da   : > { %8462 = vst [vmem:[#allocation22_spill] sm:$0xff] %v6404_v28  ;;  %v6414_v1 = vmul.f32 %v1559_v58, %v6257_v10  ;;  %v1741_v4 = vadd.f32 -1.3327482, %v1709_v22  ;;  %v1685_v30 = vadd.f32 0.23012525, %v1653_v49  ;;  %v1496_v25 = vmul.f32 %v1432_v16, %v6306_v0 }
 0x1db   : > { %8463 = vst [vmem:[#allocation23_spill] sm:$0xff] %v6409_v40  ;;  %v1650_v57 = vmul.f32 -0.020783309, %v6242_v50  ;;  %v1743_v26 = vadd.f32 -1.3327482, %v1711_v7  ;;  %v1498_v27 = vmul.f32 %v1434_v5, %v6312_v51  ;;  %v1715_v56 = vmul.f32 %v1683_v12, %v6251_v44 }
 0x1dc   : > { %v1745_v19 = vadd.f32 -1.3327482, %v1713_v53  ;;  %v1687_v35 = vadd.f32 0.23012525, %v1655_v54  ;;  %v1689_v47 = vadd.f32 0.23012525, %v1657_v32  ;;  %v1771_v58 = vmul.f32 %v1739_v52, %v6182_v17 }
 0x1dd   : > { %v1676_v43 = vadd.f32 0.23012525, %v1644_v3  ;;  %v1652_v55 = vmul.f32 -0.020783309, %v6268_v42  ;;  %v1680_v18 = vadd.f32 0.23012525, %v1648_v9  ;;  %v1717_v36 = vmul.f32 %v1685_v30, %v6255_v60 }
 0x1de   : > { %v1678_v10 = vadd.f32 0.23012525, %v1646_v38  ;;  %v1656_v8 = vmul.f32 -0.020783309, %v6306_v0  ;;  %v1682_v16 = vadd.f32 0.23012525, %v1650_v57  ;;  %v1773_v49 = vmul.f32 %v1741_v4, %v6190_v39 }
 0x1df   : > { %v1684_v22 = vadd.f32 0.23012525, %v1652_v55  ;;  %v1775_v5 = vmul.f32 %v1743_v26, %v6216_v62  ;;  %v1719_v7 = vmul.f32 %v1687_v35, %v6278_v14  ;;  %v1560_v54 = vadd.f32 3.1415918, %v1496_v25 }
 0x1e0   : > { %v1688_v53 = vadd.f32 0.23012525, %v1656_v8  ;;  %v1777_v32 = vmul.f32 %v1745_v19, %v6220_v24  ;;  %v1721_v3 = vmul.f32 %v1689_v47, %v6282_v29  ;;  %v1708_v12 = vmul.f32 %v1676_v43, %v6194_v23 }
 0x1e1   : > { %v6430_v9 = vadd.f32 3.1415918, %v1498_v27  ;;  %v1747_v52 = vadd.f32 -1.3327482, %v1715_v56  ;;  %v1712_v38 = vmul.f32 %v1680_v18, %v6228_v45  ;;  %v1710_v30 = vmul.f32 %v1678_v10, %v6199_v6 }
 0x1e2   : > { %v1803_v4 = vadd.f32 4.0581627, %v1771_v58  ;;  %v1749_v57 = vadd.f32 -1.3327482, %v1717_v36  ;;  %v1714_v26 = vmul.f32 %v1682_v16, %v6242_v50  ;;  %v1716_v35 = vmul.f32 %v1684_v22, %v6268_v42 }
 0x1e3   : > { %v1805_v25 = vadd.f32 4.0581627, %v1773_v49  ;;  %v1807_v55 = vadd.f32 4.0581627, %v1775_v5  ;;  %v1751_v19 = vadd.f32 -1.3327482, %v1719_v7  ;;  %v1720_v47 = vmul.f32 %v1688_v53, %v6306_v0 }
 0x1e4   : > { %v6438_v43 = vmul.f32 %v1561_v63, %v6261_v2  ;;  %v1809_v27 = vadd.f32 4.0581627, %v1777_v32  ;;  %v1753_v56 = vadd.f32 -1.3327482, %v1721_v3  ;;  %v1740_v8 = vadd.f32 -1.3327482, %v1708_v12 }
 0x1e5   : > { %v6441_v18 = vmul.f32 %v1560_v54, %v6294_v13  ;;  %v1779_v10 = vmul.f32 %v1747_v52, %v6251_v44  ;;  %v1744_v58 = vadd.f32 -1.3327482, %v1712_v38  ;;  %v1742_v36 = vadd.f32 -1.3327482, %v1710_v30 }
 0x1e6   : > { %v1835_v16 = vmul.f32 %v1803_v4, %v6182_v17  ;;  %v1781_v22 = vmul.f32 %v1749_v57, %v6255_v60  ;;  %v1746_v49 = vadd.f32 -1.3327482, %v1714_v26  ;;  %v1748_v5 = vadd.f32 -1.3327482, %v1716_v35 }
 0x1e7   : > { %8464 = vst [vmem:[#allocation24_spill] sm:$0xff] %v6441_v18  ;;  %v1837_v7 = vmul.f32 %v1805_v25, %v6190_v39  ;;  %v1839_v2 = vmul.f32 %v1807_v55, %v6216_v62  ;;  %v1783_v63 = vmul.f32 %v1751_v19, %v6278_v14  ;;  %v1752_v53 = vadd.f32 -1.3327482, %v1720_v47 }
 0x1e8   : > { %v1841_v13 = vmul.f32 %v1809_v27, %v6220_v24  ;;  %v1785_v54 = vmul.f32 %v1753_v56, %v6282_v29  ;;  %v1772_v32 = vmul.f32 %v1740_v8, %v6194_v23  ;;  %v1654_v3 = vmul.f32 -0.020783309, %v6272_v48 }
 0x1e9   : > { %v1811_v12 = vadd.f32 4.0581627, %v1779_v10  ;;  %v1776_v52 = vmul.f32 %v1744_v58, %v6228_v45  ;;  %v1774_v38 = vmul.f32 %v1742_v36, %v6199_v6  ;;  %v1658_v30 = vmul.f32 -0.020783309, %v6312_v51 }
 0x1ea   : > { %v1813_v4 = vadd.f32 4.0581627, %v1781_v22  ;;  %v1778_v57 = vmul.f32 %v1746_v49, %v6242_v50  ;;  %v1780_v26 = vmul.f32 %v1748_v5, %v6268_v42  ;;  %v1686_v35 = vadd.f32 0.23012525, %v1654_v3 }
 0x1eb   : > { %v1867_v25 = vadd.f32 -4.9347587, %v1835_v16  ;;  %v1815_v55 = vadd.f32 4.0581627, %v1783_v63  ;;  %v1784_v19 = vmul.f32 %v1752_v53, %v6306_v0  ;;  %v1690_v47 = vadd.f32 0.23012525, %v1658_v30 }
 0x1ec   : > { %v1869_v27 = vadd.f32 -4.9347587, %v1837_v7  ;;  %v1817_v56 = vadd.f32 4.0581627, %v1785_v54  ;;  %v1804_v8 = vadd.f32 4.0581627, %v1772_v32  ;;  %v1718_v10 = vmul.f32 %v1686_v35, %v6272_v48 }
 0x1ed   : > { %v1843_v58 = vmul.f32 %v1811_v12, %v6251_v44  ;;  %v1808_v36 = vadd.f32 4.0581627, %v1776_v52  ;;  %v1806_v33 = vadd.f32 4.0581627, %v1774_v38  ;;  %v1722_v22 = vmul.f32 %v1690_v47, %v6312_v51 }
 0x1ee   : > { %v1845_v49 = vmul.f32 %v1813_v4, %v6255_v60  ;;  %v1810_v5 = vadd.f32 4.0581627, %v1778_v57  ;;  %v1812_v3 = vadd.f32 4.0581627, %v1780_v26  ;;  %v1750_v16 = vadd.f32 -1.3327482, %v1718_v10 }
 0x1ef   : > { %v1871_v63 = vadd.f32 -4.9347587, %v1839_v2  ;;  %v1847_v53 = vmul.f32 %v1815_v55, %v6278_v14  ;;  %v1816_v30 = vadd.f32 4.0581627, %v1784_v19  ;;  %v1754_v7 = vadd.f32 -1.3327482, %v1722_v22 }
 0x1f0   : > { %v1873_v54 = vadd.f32 -4.9347587, %v1841_v13  ;;  %v1849_v32 = vmul.f32 %v1817_v56, %v6282_v29  ;;  %v1836_v35 = vmul.f32 %v1804_v8, %v6194_v23  ;;  %v1782_v12 = vmul.f32 %v1750_v16, %v6272_v48 }
 0x1f1   : > { %v1875_v52 = vadd.f32 -4.9347587, %v1843_v58  ;;  %v1840_v38 = vmul.f32 %v1808_v36, %v6228_v45  ;;  %v1838_v4 = vmul.f32 %v1806_v33, %v6199_v6  ;;  %v1786_v57 = vmul.f32 %v1754_v7, %v6312_v51 }
 0x1f2   : > { %v1877_v26 = vadd.f32 -4.9347587, %v1845_v49  ;;  %v1842_v2 = vmul.f32 %v1810_v5, %v6242_v50  ;;  %v1844_v55 = vmul.f32 %v1812_v3, %v6268_v42  ;;  %v1814_v19 = vadd.f32 4.0581627, %v1782_v12 }
 0x1f3   : > { %v1899_v13 = vmul.f32 %v1867_v25, %v6182_v17  ;;  %v1879_v47 = vadd.f32 -4.9347587, %v1847_v53  ;;  %v1848_v56 = vmul.f32 %v1816_v30, %v6306_v0  ;;  %v1818_v8 = vadd.f32 4.0581627, %v1786_v57 }
 0x1f4   : > { %v1901_v10 = vmul.f32 %v1869_v27, %v6190_v39  ;;  %v1881_v58 = vadd.f32 -4.9347587, %v1849_v32  ;;  %v1868_v36 = vadd.f32 -4.9347587, %v1836_v35  ;;  %v1846_v33 = vmul.f32 %v1814_v19, %v6272_v48 }
 0x1f5   : > { %v1903_v22 = vmul.f32 %v1871_v63, %v6216_v62  ;;  %v1905_v49 = vmul.f32 %v1873_v54, %v6220_v24  ;;  %v1872_v5 = vadd.f32 -4.9347587, %v1840_v38  ;;  %v1870_v16 = vadd.f32 -4.9347587, %v1838_v4  ;;  %v1982_v54 = vpop.permute.xlu0 %1981 }
 0x1f6   : > { %v1907_v3 = vmul.f32 %v1875_v52, %v6251_v44  ;;  %v1909_v17 = vmul.f32 %v1877_v26, %v6255_v60  ;;  %v1874_v25 = vadd.f32 -4.9347587, %v1842_v2  ;;  %v1876_v53 = vadd.f32 -4.9347587, %v1844_v55 }
 0x1f7   : > { %v6480_v30 = vadd.f32 0.99999946, %v1899_v13  ;;  %v1911_v39 = vmul.f32 %v1879_v47, %v6278_v14  ;;  %v1880_v27 = vadd.f32 -4.9347587, %v1848_v56  ;;  %v1850_v7 = vmul.f32 %v1818_v8, %v6312_v51 }
 0x1f8   : > { %v6484_v32 = vadd.f32 0.99999946, %v1901_v10  ;;  %v1913_v62 = vmul.f32 %v1881_v58, %v6282_v29  ;;  %v1900_v24 = vmul.f32 %v1868_v36, %v6194_v23  ;;  %v1878_v63 = vadd.f32 -4.9347587, %v1846_v33 }
 0x1f9   : > { %8465 = vst [vmem:[#allocation25_spill] sm:$0xff] %v6480_v30  ;;  %v6488_v44 = vadd.f32 0.99999946, %v1903_v22  ;;  %v6490_v60 = vadd.f32 0.99999946, %v1905_v49  ;;  %v1904_v35 = vmul.f32 %v1872_v5, %v6228_v45  ;;  %v1902_v12 = vmul.f32 %v1870_v16, %v6199_v6  ;;  %v1987_v36 = vpop.permute.xlu0 %1986 }
 0x1fa   : > { %8466 = vst [vmem:[#allocation26_spill] sm:$0xff] %v6484_v32  ;;  %v6494_v14 = vadd.f32 0.99999946, %v1907_v3  ;;  %v6496_v52 = vadd.f32 0.99999946, %v1909_v17  ;;  %v1906_v38 = vmul.f32 %v1874_v25, %v6242_v50  ;;  %v1908_v29 = vmul.f32 %v1876_v53, %v6268_v42 }
 0x1fb   : > { %8467 = vst [vmem:[#allocation27_spill] sm:$0xff] %v6488_v44  ;;  %8468 = vst [vmem:[#allocation28_spill] sm:$0xff] %v6490_v60  ;;  %v6502_v23 = vmul.f32 %v6430_v9, %v6297_v41  ;;  %v6504_v57 = vadd.f32 0.99999946, %v1911_v39  ;;  %v1912_v26 = vmul.f32 %v1880_v27, %v6306_v0  ;;  %v1882_v45 = vadd.f32 -4.9347587, %v1850_v7 }
 0x1fc   : > { %8469 = vst [vmem:[#allocation29_spill] sm:$0xff] %v6494_v14  ;;  %8470 = vst [vmem:[#allocation30_spill] sm:$0xff] %v6496_v52  ;;  %v6507_v19 = vadd.f32 0.99999946, %v1913_v62  ;;  %v6509_v13 = vadd.f32 0.99999946, %v1900_v24  ;;  %v1910_v50 = vmul.f32 %v1878_v63, %v6272_v48 }
 0x1fd   : > { %8471 = vst [vmem:[#allocation31_spill] sm:$0xff] %v6502_v23  ;;  %8472 = vst [vmem:[#allocation32_spill] sm:$0xff] %v6504_v57  ;;  %v6512_v41 = vadd.f32 0.99999946, %v1904_v35  ;;  %v6514_v9 = vadd.f32 0.99999946, %v1902_v12  ;;  %v6523_v48 = vmul.f32 %v1882_v45, %v6312_v51 }
 0x1fe   : > { %8473 = vst [vmem:[#allocation33_spill] sm:$0xff] %v6507_v19  ;;  %8474 = vst [vmem:[#allocation34_spill] sm:$0xff] %v6509_v13  ;;  %v6516_v0 = vadd.f32 0.99999946, %v1906_v38  ;;  %v6518_v58 = vadd.f32 0.99999946, %v1908_v29 }
 0x1ff   : > { %8475 = vst [vmem:[#allocation35_spill] sm:$0xff] %v6512_v41  ;;  %8476 = vst [vmem:[#allocation36_spill] sm:$0xff] %v6514_v9  ;;  %v6520_v5 = vadd.f32 0.99999946, %v1912_v26  ;;  %v6525_v39 = vadd.f32 0.99999946, %v1910_v50 }
 0x200   : > { %8477 = vst [vmem:[#allocation37_spill] sm:$0xff] %v6516_v0  ;;  %8478 = vst [vmem:[#allocation38_spill] sm:$0xff] %v6518_v58 }
 0x201   : > { %8479 = vst [vmem:[#allocation39_spill] sm:$0xff] %v6520_v5  ;;  %8480 = vst [vmem:[#allocation40_spill] sm:$0xff] %v6523_v48 }
 0x202   : > { %8481 = vst [vmem:[#allocation41_spill] sm:$0xff] %v6525_v39 }
 0x24e   : > { %v2110_v4 = vpop.f32.mrb[32].mxu0 }
 0x24f   : > { %v2111_v2 = vadd.f32 %v2110_v4, %v1982_v54  ;;  %v2223_v6 = vpop.f32.mrb[32].mxu1  ;;  %v2112_v55 = vpop.f32.mrb[33].mxu0 }
 0x250   : > { %v2224_v42 = vadd.f32 %v2223_v6, %v1982_v54  ;;  %v2113_v47 = vadd.f32 %v2112_v55, %v1982_v54  ;;  %v2225_v56 = vpop.f32.mrb[33].mxu1 }
 0x251   : > { %v2270_v8 = vadd.f32 0.5, %v2111_v2  ;;  %v2226_v10 = vadd.f32 %v2225_v56, %v1982_v54 }
 0x252   : > { %v2272_v33 = vadd.f32 0.5, %v2224_v42  ;;  %v2271_v22 = vadd.f32 0.5, %v2113_v47  ;;  %v2116_v49 = vpop.f32.mrb[34].mxu0 }
 0x253   : > { %v2302_v16 = vfloor.f32 %v2270_v8  ;;  %v2273_v3 = vadd.f32 0.5, %v2226_v10  ;;  %v2117_v17 = vadd.f32 %v2116_v49, %v1987_v36  ;;  %v2229_v25 = vpop.f32.mrb[34].mxu1  ;;  %v2118_v53 = vpop.f32.mrb[35].mxu0 }
 0x254   : > { %v2304_v27 = vfloor.f32 %v2272_v33  ;;  %v2303_v7 = vfloor.f32 %v2271_v22  ;;  %v2230_v62 = vadd.f32 %v2229_v25, %v1987_v36  ;;  %v2119_v24 = vadd.f32 %v2118_v53, %v1987_v36  ;;  %v2231_v63 = vpop.f32.mrb[35].mxu1 }
 0x255   : > { %v2334_v54 = vsub.f32 %v2111_v2, %v2302_v16  ;;  %v2305_v35 = vfloor.f32 %v2273_v3  ;;  %v2274_v12 = vadd.f32 0.5, %v2117_v17  ;;  %v2232_v38 = vadd.f32 %v2231_v63, %v1987_v36 }
 0x256   : > { %v2336_v29 = vsub.f32 %v2224_v42, %v2304_v27  ;;  %v2335_v4 = vsub.f32 %v2113_v47, %v2303_v7  ;;  %v2276_v51 = vadd.f32 0.5, %v2230_v62  ;;  %v2275_v26 = vadd.f32 0.5, %v2119_v24  ;;  %v2122_v45 = vpop.f32.mrb[36].mxu0 }
 0x257   : > { %v6527_v6 = vadd.f32 %v2334_v54, %v2334_v54  ;;  %v2337_v55 = vsub.f32 %v2226_v10, %v2305_v35  ;;  %v2306_v56 = vfloor.f32 %v2274_v12  ;;  %v2277_v50 = vadd.f32 0.5, %v2232_v38  ;;  %v6529_v8 = vpop.f32.mrb[36].mxu1  ;;  %v6531_v33 = vpop.f32.mrb[37].mxu0 }
 0x258   : > { %v6533_v22 = vadd.f32 %v2336_v29, %v2336_v29  ;;  %v6535_v2 = vadd.f32 %v2335_v4, %v2335_v4  ;;  %v2308_v49 = vfloor.f32 %v2276_v51  ;;  %v2307_v36 = vfloor.f32 %v2275_v26  ;;  %v6537_v42 = vpop.f32.mrb[37].mxu1 }
 0x259   : > { %v6541_v47 = vmul.f32 %v6527_v6, %v6527_v6  ;;  %v6543_v16 = vadd.f32 %v2337_v55, %v2337_v55  ;;  %v2338_v10 = vsub.f32 %v2117_v17, %v2306_v56  ;;  %v2309_v3 = vfloor.f32 %v2277_v50 }
 0x25a   : > { %v6547_v25 = vmul.f32 %v6533_v22, %v6533_v22  ;;  %v6551_v53 = vmul.f32 %v6535_v2, %v6535_v2  ;;  %v2340_v27 = vsub.f32 %v2230_v62, %v2308_v49  ;;  %v2339_v7 = vsub.f32 %v2119_v24, %v2307_v36  ;;  %v6553_v63 = vpop.f32.mrb[38].mxu0 }
 0x25b   : > { %v2430_v54 = vmul.f32 -0.006040975, %v6541_v47  ;;  %v6558_v35 = vmul.f32 %v6543_v16, %v6543_v16  ;;  %v6560_v17 = vadd.f32 %v2338_v10, %v2338_v10  ;;  %v2341_v12 = vsub.f32 %v2232_v38, %v2309_v3  ;;  %v6562_v29 = vpop.f32.mrb[38].mxu1  ;;  %v6564_v4 = vpop.f32.mrb[39].mxu0 }
 0x25c   : > { %v2432_v51 = vmul.f32 -0.006040975, %v6547_v25  ;;  %v2431_v62 = vmul.f32 -0.006040975, %v6551_v53  ;;  %v6568_v24 = vadd.f32 %v2340_v27, %v2340_v27  ;;  %v6570_v26 = vadd.f32 %v2339_v7, %v2339_v7  ;;  %v6572_v55 = vpop.f32.mrb[39].mxu1 }
 0x25d   : > { %v2462_v56 = vadd.f32 0.08060466, %v2430_v54  ;;  %v2433_v50 = vmul.f32 -0.006040975, %v6558_v35  ;;  %v6577_v38 = vmul.f32 %v6560_v17, %v6560_v17  ;;  %v6579_v49 = vadd.f32 %v2341_v12, %v2341_v12 }
 0x25e   : > { %v2464_v36 = vadd.f32 0.08060466, %v2432_v51  ;;  %v2463_v10 = vadd.f32 0.08060466, %v2431_v62  ;;  %v6583_v3 = vmul.f32 %v6568_v24, %v6568_v24  ;;  %v6587_v27 = vmul.f32 %v6570_v26, %v6570_v26  ;;  %v6589_v7 = vpop.f32.mrb[40].mxu0 }
 0x25f   : > { %v2494_v54 = vmul.f32 %v2462_v56, %v6541_v47  ;;  %v2465_v39 = vadd.f32 0.08060466, %v2433_v50  ;;  %v2434_v5 = vmul.f32 -0.006040975, %v6577_v38  ;;  %v6595_v12 = vmul.f32 %v6579_v49, %v6579_v49  ;;  %v6597_v51 = vpop.f32.mrb[40].mxu1  ;;  %v6599_v62 = vpop.f32.mrb[41].mxu0 }
 0x260   : > { %v2496_v58 = vmul.f32 %v2464_v36, %v6547_v25  ;;  %v2495_v48 = vmul.f32 %v2463_v10, %v6551_v53  ;;  %v2436_v0 = vmul.f32 -0.006040975, %v6583_v3  ;;  %v2435_v9 = vmul.f32 -0.006040975, %v6587_v27  ;;  %v6605_v56 = vpop.f32.mrb[41].mxu1  ;;  %v6607_v50 = vpop.permute.xlu1 %1991 }
 0x261   : > { %v2526_v41 = vadd.f32 -0.5983973, %v2494_v54  ;;  %v2497_v19 = vmul.f32 %v2465_v39, %v6558_v35  ;;  %v2466_v13 = vadd.f32 0.08060466, %v2434_v5  ;;  %v2437_v57 = vmul.f32 -0.006040975, %v6595_v12 }
 0x262   : > { %v2528_v23 = vadd.f32 -0.5983973, %v2496_v58  ;;  %v2527_v40 = vadd.f32 -0.5983973, %v2495_v48  ;;  %v2468_v18 = vadd.f32 0.08060466, %v2436_v0  ;;  %v6612_v36 = vadd.f32 %v2122_v45, %v6607_v50 }
 0x263   : > { %v2558_v10 = vmul.f32 %v2526_v41, %v6541_v47  ;;  %v2529_v28 = vadd.f32 -0.5983973, %v2497_v19  ;;  %v2498_v31 = vmul.f32 %v2466_v13, %v6577_v38  ;;  %v2467_v37 = vadd.f32 0.08060466, %v2435_v9  ;;  %v6616_v11 = vpop.f32.mrb[42].mxu0  ;;  %v6618_v54 = vpop.f32.mrb[42].mxu1 }
 0x264   : > { %v2560_v5 = vmul.f32 %v2528_v23, %v6547_v25  ;;  %v2559_v39 = vmul.f32 %v2527_v40, %v6551_v53  ;;  %v2500_v58 = vmul.f32 %v2468_v18, %v6583_v3  ;;  %v2469_v0 = vadd.f32 0.08060466, %v2437_v57  ;;  %v6623_v48 = vpop.f32.mrb[43].mxu0  ;;  %v6625_v45 = vpop.f32.mrb[43].mxu1 }
 0x265   : > { %v2590_v41 = vadd.f32 2.5499265, %v2558_v10  ;;  %v2561_v19 = vmul.f32 %v2529_v28, %v6558_v35  ;;  %v2530_v13 = vadd.f32 -0.5983973, %v2498_v31  ;;  %v2499_v9 = vmul.f32 %v2467_v37, %v6587_v27 }
 0x266   : > { %v2592_v15 = vadd.f32 2.5499265, %v2560_v5  ;;  %v2591_v52 = vadd.f32 2.5499265, %v2559_v39  ;;  %v2532_v14 = vadd.f32 -0.5983973, %v2500_v58  ;;  %v2501_v23 = vmul.f32 %v2469_v0, %v6595_v12 }
 0x267   : > { %v2622_v40 = vmul.f32 %v2590_v41, %v6541_v47  ;;  %v2593_v60 = vadd.f32 2.5499265, %v2561_v19  ;;  %v2562_v18 = vmul.f32 %v2530_v13, %v6577_v38  ;;  %v2531_v57 = vadd.f32 -0.5983973, %v2499_v9  ;;  %v6632_v44 = vpop.f32.mrb[44].mxu0  ;;  %v6634_v32 = vpop.f32.mrb[44].mxu1 }
 0x268   : > { %8482 = vst [vmem:[#allocation42_spill] sm:$0xff] %v6634_v32  ;;  %v2624_v28 = vmul.f32 %v2592_v15, %v6547_v25  ;;  %v2623_v31 = vmul.f32 %v2591_v52, %v6551_v53  ;;  %v2564_v37 = vmul.f32 %v2532_v14, %v6583_v3  ;;  %v2533_v10 = vadd.f32 -0.5983973, %v2501_v23  ;;  %v6639_v5 = vpop.f32.mrb[45].mxu0  ;;  %v6641_v39 = vpop.f32.mrb[45].mxu1 }
 0x269   : > { %8483 = vst [vmem:[#allocation43_spill] sm:$0xff] %v6639_v5  ;;  %8484 = vst [vmem:[#allocation44_spill] sm:$0xff] %v6641_v39  ;;  %v2654_v58 = vadd.f32 -5.167685, %v2622_v40  ;;  %v2625_v0 = vmul.f32 %v2593_v60, %v6558_v35  ;;  %v2594_v41 = vadd.f32 2.5499265, %v2562_v18  ;;  %v2563_v19 = vmul.f32 %v2531_v57, %v6587_v27 }
 0x26a   : > { %v2656_v13 = vadd.f32 -5.167685, %v2624_v28  ;;  %v2655_v9 = vadd.f32 -5.167685, %v2623_v31  ;;  %v2596_v30 = vadd.f32 2.5499265, %v2564_v37  ;;  %v2565_v15 = vmul.f32 %v2533_v10, %v6595_v12 }
 0x26b   : > { %v2686_v52 = vmul.f32 %v2654_v58, %v6541_v47  ;;  %v2657_v32 = vadd.f32 -5.167685, %v2625_v0  ;;  %v2626_v14 = vmul.f32 %v2594_v41, %v6577_v38  ;;  %v2595_v23 = vadd.f32 2.5499265, %v2563_v19  ;;  %v6648_v5 = vpop.f32.mrb[46].mxu0  ;;  %v6650_v39 = vpop.f32.mrb[46].mxu1 }
 0x26c   : > { %v2688_v60 = vmul.f32 %v2656_v13, %v6547_v25  ;;  %v2687_v40 = vmul.f32 %v2655_v9, %v6551_v53  ;;  %v2628_v18 = vmul.f32 %v2596_v30, %v6583_v3  ;;  %v2597_v57 = vadd.f32 2.5499265, %v2565_v15  ;;  %v6655_v28 = vpop.f32.mrb[47].mxu0  ;;  %v6657_v31 = vpop.f32.mrb[47].mxu1 }
 0x26d   : > { %v2718_v47 = vadd.f32 3.1415918, %v2686_v52  ;;  %v2689_v37 = vmul.f32 %v2657_v32, %v6558_v35  ;;  %v2658_v10 = vadd.f32 -5.167685, %v2626_v14  ;;  %v2627_v58 = vmul.f32 %v2595_v23, %v6587_v27 }
 0x26e   : > { %v2720_v0 = vadd.f32 3.1415918, %v2688_v60  ;;  %v2719_v41 = vadd.f32 3.1415918, %v2687_v40  ;;  %v2660_v19 = vadd.f32 -5.167685, %v2628_v18  ;;  %v2629_v25 = vmul.f32 %v2597_v57, %v6595_v12 }
 0x26f   : > { %v2750_v53 = vmul.f32 %v2718_v47, %v6527_v6  ;;  %v2721_v13 = vadd.f32 3.1415918, %v2689_v37  ;;  %v2690_v30 = vmul.f32 %v2658_v10, %v6577_v38  ;;  %v2659_v9 = vadd.f32 -5.167685, %v2627_v58  ;;  %v1997_v58 = vpop.permute.xlu1 %1996 }
 0x270   : > { %v2752_v15 = vmul.f32 %v2720_v0, %v6533_v22  ;;  %v6666_v52 = vmul.f32 %v2719_v41, %v6535_v2  ;;  %v2692_v32 = vmul.f32 %v2660_v19, %v6583_v3  ;;  %v2661_v35 = vadd.f32 -5.167685, %v2629_v25 }
 0x271   : > { %v6670_v14 = vadd.f32 %v2750_v53, %v6351_v20  ;;  %v6673_v23 = vmul.f32 %v2721_v13, %v6543_v16  ;;  %v2722_v60 = vadd.f32 3.1415918, %v2690_v30  ;;  %v2691_v6 = vmul.f32 %v2659_v9, %v6587_v27 }
 0x272   : > { %v6677_v38 = vadd.f32 %v2752_v15, %v6356_v61  ;;  %v2724_v40 = vadd.f32 3.1415918, %v2692_v32  ;;  %v2693_v22 = vmul.f32 %v2661_v35, %v6595_v12  ;;  %v2278_v2 = vadd.f32 0.5, %v6612_v36 }
 0x273   : > { %v2754_v3 = vmul.f32 %v2722_v60, %v6560_v17  ;;  %v2723_v18 = vadd.f32 3.1415918, %v2691_v6  ;;  %v2236_v20 = vadd.f32 %v6529_v8, %v6607_v50  ;;  %v2125_v16 = vadd.f32 %v6531_v33, %v6607_v50 }
 0x274   : > { %v2756_v57 = vmul.f32 %v2724_v40, %v6568_v24  ;;  %v2725_v27 = vadd.f32 3.1415918, %v2693_v22  ;;  %v2310_v47 = vfloor.f32 %v2278_v2  ;;  %v2238_v61 = vadd.f32 %v6537_v42, %v6607_v50 }
 0x275   : > { %v6690_v12 = vadd.f32 %v2754_v3, %v6375_v46  ;;  %v6693_v37 = vmul.f32 %v2723_v18, %v6570_v26  ;;  %v2280_v17 = vadd.f32 0.5, %v2236_v20  ;;  %v2279_v10 = vadd.f32 0.5, %v2125_v16 }
 0x276   : > { %v6696_v8 = vadd.f32 %v2756_v57, %v6379_v34  ;;  %v6699_v33 = vmul.f32 %v2725_v27, %v6579_v49  ;;  %v2342_v24 = vsub.f32 %v6612_v36, %v2310_v47  ;;  %v2281_v0 = vadd.f32 0.5, %v2238_v61 }
 0x277   : > { %v2312_v41 = vfloor.f32 %v2280_v17  ;;  %v2311_v42 = vfloor.f32 %v2279_v10  ;;  %v2129_v46 = vadd.f32 %v6553_v63, %v1997_v58  ;;  %v2242_v50 = vadd.f32 %v6562_v29, %v1997_v58 }
 0x278   : > { %v6704_v26 = vadd.f32 %v2342_v24, %v2342_v24  ;;  %v2313_v19 = vfloor.f32 %v2281_v0  ;;  %v2131_v25 = vadd.f32 %v6564_v4, %v1997_v58  ;;  %v2244_v34 = vadd.f32 %v6572_v55, %v1997_v58 }
 0x279   : > { %v2344_v53 = vsub.f32 %v2236_v20, %v2312_v41  ;;  %v2343_v13 = vsub.f32 %v2125_v16, %v2311_v42  ;;  %v2282_v49 = vadd.f32 0.5, %v2129_v46  ;;  %v2284_v30 = vadd.f32 0.5, %v2242_v50 }
 0x27a   : > { %v6710_v36 = vmul.f32 %v6704_v26, %v6704_v26  ;;  %v2345_v9 = vsub.f32 %v2238_v61, %v2313_v19  ;;  %v2283_v15 = vadd.f32 0.5, %v2131_v25  ;;  %v2285_v63 = vadd.f32 0.5, %v2244_v34 }
 0x27b   : > { %v6712_v32 = vadd.f32 %v2344_v53, %v2344_v53  ;;  %v6714_v29 = vadd.f32 %v2343_v13, %v2343_v13  ;;  %v2314_v35 = vfloor.f32 %v2282_v49  ;;  %v2316_v60 = vfloor.f32 %v2284_v30 }
 0x27c   : > { %v2438_v4 = vmul.f32 -0.006040975, %v6710_v36  ;;  %v6717_v55 = vadd.f32 %v2345_v9, %v2345_v9  ;;  %v2315_v6 = vfloor.f32 %v2283_v15  ;;  %v2317_v40 = vfloor.f32 %v2285_v63  ;;  %v6763_v63 = vpop.permute.xlu0 %2001 }
 0x27d   : > { %v6721_v22 = vmul.f32 %v6712_v32, %v6712_v32  ;;  %v6725_v2 = vmul.f32 %v6714_v29, %v6714_v29  ;;  %v2346_v3 = vsub.f32 %v2129_v46, %v2314_v35  ;;  %v2348_v18 = vsub.f32 %v2242_v50, %v2316_v60 }
 0x27e   : > { %v2470_v20 = vadd.f32 0.08060466, %v2438_v4  ;;  %v6729_v16 = vmul.f32 %v6717_v55, %v6717_v55  ;;  %v2347_v57 = vsub.f32 %v2131_v25, %v2315_v6  ;;  %v2349_v27 = vsub.f32 %v2244_v34, %v2317_v40 }
 0x27f   : > { %v2440_v47 = vmul.f32 -0.006040975, %v6721_v22  ;;  %v2439_v61 = vmul.f32 -0.006040975, %v6725_v2  ;;  %v6733_v17 = vadd.f32 %v2346_v3, %v2346_v3  ;;  %v6735_v10 = vadd.f32 %v2348_v18, %v2348_v18 }
 0x280   : > { %v2502_v58 = vmul.f32 %v2470_v20, %v6710_v36  ;;  %v2441_v24 = vmul.f32 -0.006040975, %v6729_v16  ;;  %v6739_v0 = vadd.f32 %v2347_v57, %v2347_v57  ;;  %v6741_v41 = vadd.f32 %v2349_v27, %v2349_v27 }
 0x281   : > { %v2472_v42 = vadd.f32 0.08060466, %v2440_v47  ;;  %v2471_v46 = vadd.f32 0.08060466, %v2439_v61  ;;  %v6745_v50 = vmul.f32 %v6733_v17, %v6733_v17  ;;  %v6749_v19 = vmul.f32 %v6735_v10, %v6735_v10 }
 0x282   : > { %v2534_v25 = vadd.f32 -0.5983973, %v2502_v58  ;;  %v2473_v34 = vadd.f32 0.08060466, %v2441_v24  ;;  %v6753_v53 = vmul.f32 %v6739_v0, %v6739_v0  ;;  %v6757_v13 = vmul.f32 %v6741_v41, %v6741_v41 }
 0x283   : > { %v2504_v49 = vmul.f32 %v2472_v42, %v6721_v22  ;;  %v2503_v30 = vmul.f32 %v2471_v46, %v6725_v2  ;;  %v2442_v9 = vmul.f32 -0.006040975, %v6745_v50  ;;  %v2444_v15 = vmul.f32 -0.006040975, %v6749_v19 }
 0x284   : > { %v2566_v35 = vmul.f32 %v2534_v25, %v6710_v36  ;;  %v2505_v60 = vmul.f32 %v2473_v34, %v6729_v16  ;;  %v2443_v4 = vmul.f32 -0.006040975, %v6753_v53  ;;  %v2445_v6 = vmul.f32 -0.006040975, %v6757_v13 }
 0x285   : > { %v2536_v40 = vadd.f32 -0.5983973, %v2504_v49  ;;  %v2535_v3 = vadd.f32 -0.5983973, %v2503_v30  ;;  %v2474_v18 = vadd.f32 0.08060466, %v2442_v9  ;;  %v6771_v20 = vadd.f32 %v6589_v7, %v6763_v63 }
 0x286   : > { %v2598_v57 = vadd.f32 2.5499265, %v2566_v35  ;;  %v2537_v27 = vadd.f32 -0.5983973, %v2505_v60  ;;  %v2476_v47 = vadd.f32 0.08060466, %v2444_v15  ;;  %v6775_v61 = vadd.f32 %v6597_v51, %v6763_v63 }
 0x287   : > { %v2568_v58 = vmul.f32 %v2536_v40, %v6721_v22  ;;  %v2567_v24 = vmul.f32 %v2535_v3, %v6725_v2  ;;  %v2506_v42 = vmul.f32 %v2474_v18, %v6745_v50  ;;  %v2475_v46 = vadd.f32 0.08060466, %v2443_v4 }
 0x288   : > { %v2630_v25 = vmul.f32 %v2598_v57, %v6710_v36  ;;  %v2569_v34 = vmul.f32 %v2537_v27, %v6729_v16  ;;  %v2508_v7 = vmul.f32 %v2476_v47, %v6749_v19  ;;  %v2477_v49 = vadd.f32 0.08060466, %v2445_v6 }
 0x289   : > { %v2600_v30 = vadd.f32 2.5499265, %v2568_v58  ;;  %v2599_v9 = vadd.f32 2.5499265, %v2567_v24  ;;  %v2538_v15 = vadd.f32 -0.5983973, %v2506_v42  ;;  %v2507_v51 = vmul.f32 %v2475_v46, %v6753_v53 }
 0x28a   : > { %v2662_v35 = vadd.f32 -5.167685, %v2630_v25  ;;  %v2601_v60 = vadd.f32 2.5499265, %v2569_v34  ;;  %v2540_v40 = vadd.f32 -0.5983973, %v2508_v7  ;;  %v2509_v3 = vmul.f32 %v2477_v49, %v6757_v13 }
 0x28b   : > { %v2632_v18 = vmul.f32 %v2600_v30, %v6721_v22  ;;  %v2631_v4 = vmul.f32 %v2599_v9, %v6725_v2  ;;  %v2570_v57 = vmul.f32 %v2538_v15, %v6745_v50  ;;  %v2539_v27 = vadd.f32 -0.5983973, %v2507_v51 }
 0x28c   : > { %v2694_v47 = vmul.f32 %v2662_v35, %v6710_v36  ;;  %v2633_v6 = vmul.f32 %v2601_v60, %v6729_v16  ;;  %v2572_v58 = vmul.f32 %v2540_v40, %v6749_v19  ;;  %v2541_v24 = vadd.f32 -0.5983973, %v2509_v3 }
 0x28d   : > { %v2664_v42 = vadd.f32 -5.167685, %v2632_v18  ;;  %v2663_v46 = vadd.f32 -5.167685, %v2631_v4  ;;  %v2602_v25 = vadd.f32 2.5499265, %v2570_v57  ;;  %v2571_v34 = vmul.f32 %v2539_v27, %v6753_v53 }
 0x28e   : > { %v2726_v7 = vadd.f32 3.1415918, %v2694_v47  ;;  %v2665_v49 = vadd.f32 -5.167685, %v2633_v6  ;;  %v2604_v30 = vadd.f32 2.5499265, %v2572_v58  ;;  %v2573_v9 = vmul.f32 %v2541_v24, %v6757_v13 }
 0x28f   : > { %v2696_v15 = vmul.f32 %v2664_v42, %v6721_v22  ;;  %v2695_v51 = vmul.f32 %v2663_v46, %v6725_v2  ;;  %v2634_v36 = vmul.f32 %v2602_v25, %v6745_v50  ;;  %v2603_v35 = vadd.f32 2.5499265, %v2571_v34 }
 0x290   : > { %v2758_v60 = vmul.f32 %v2726_v7, %v6704_v26  ;;  %v2697_v40 = vmul.f32 %v2665_v49, %v6729_v16  ;;  %v2636_v3 = vmul.f32 %v2604_v30, %v6749_v19  ;;  %v2605_v18 = vadd.f32 2.5499265, %v2573_v9 }
 0x291   : > { %v2728_v4 = vadd.f32 3.1415918, %v2696_v15  ;;  %v2727_v57 = vadd.f32 3.1415918, %v2695_v51  ;;  %v2666_v27 = vadd.f32 -5.167685, %v2634_v36  ;;  %v2635_v47 = vmul.f32 %v2603_v35, %v6753_v53 }
 0x292   : > { %v6801_v6 = vadd.f32 %v2758_v60, %v6392_v21  ;;  %v2729_v22 = vadd.f32 3.1415918, %v2697_v40  ;;  %v2668_v2 = vadd.f32 -5.167685, %v2636_v3  ;;  %v2637_v58 = vmul.f32 %v2605_v18, %v6757_v13  ;;  %v2007_v3 = vpop.permute.xlu1 %2006 }
 0x293   : > { %v2760_v24 = vmul.f32 %v2728_v4, %v6712_v32  ;;  %v6806_v26 = vmul.f32 %v2727_v57, %v6714_v29  ;;  %v2698_v16 = vmul.f32 %v2666_v27, %v6745_v50  ;;  %v2667_v42 = vadd.f32 -5.167685, %v2635_v47 }
 0x294   : > { %v6810_v46 = vmul.f32 %v2729_v22, %v6717_v55  ;;  %v2700_v25 = vmul.f32 %v2668_v2, %v6749_v19  ;;  %v2669_v34 = vadd.f32 -5.167685, %v2637_v58  ;;  %v2286_v21 = vadd.f32 0.5, %v6771_v20 }
 0x295   : > { %v6815_v7 = vadd.f32 %v2760_v24, %v6395_v59  ;;  %v2730_v49 = vadd.f32 3.1415918, %v2698_v16  ;;  %v2699_v32 = vmul.f32 %v2667_v42, %v6753_v53  ;;  %v2288_v29 = vadd.f32 0.5, %v6775_v61 }
 0x296   : > { %v2732_v30 = vadd.f32 3.1415918, %v2700_v25  ;;  %v2701_v50 = vmul.f32 %v2669_v34, %v6757_v13  ;;  %v2318_v9 = vfloor.f32 %v2286_v21  ;;  %v2137_v55 = vadd.f32 %v6599_v62, %v6763_v63 }
 0x297   : > { %v2762_v19 = vmul.f32 %v2730_v49, %v6733_v17  ;;  %v2731_v15 = vadd.f32 3.1415918, %v2699_v32  ;;  %v2320_v51 = vfloor.f32 %v2288_v29  ;;  %v2250_v59 = vadd.f32 %v6605_v56, %v6763_v63 }
 0x298   : > { %v2764_v36 = vmul.f32 %v2732_v30, %v6735_v10  ;;  %v2733_v35 = vadd.f32 3.1415918, %v2701_v50  ;;  %v2350_v53 = vsub.f32 %v6771_v20, %v2318_v9  ;;  %v2287_v60 = vadd.f32 0.5, %v2137_v55 }
 0x299   : > { %v6828_v40 = vadd.f32 %v2762_v19, %v6414_v1  ;;  %v6831_v13 = vmul.f32 %v2731_v15, %v6739_v0  ;;  %v2352_v62 = vsub.f32 %v6775_v61, %v2320_v51  ;;  %v2289_v17 = vadd.f32 0.5, %v2250_v59 }
 0x29a   : > { %v6835_v18 = vadd.f32 %v2764_v36, %v6438_v43  ;;  %v6838_v56 = vmul.f32 %v2733_v35, %v6741_v41  ;;  %v6840_v10 = vadd.f32 %v2350_v53, %v2350_v53  ;;  %v2319_v63 = vfloor.f32 %v2287_v60 }
 0x29b   : > { %v6842_v20 = vadd.f32 %v2352_v62, %v2352_v62  ;;  %v2321_v1 = vfloor.f32 %v2289_v17  ;;  %v2141_v4 = vadd.f32 %v6616_v11, %v2007_v3  ;;  %v2254_v0 = vadd.f32 %v6618_v54, %v2007_v3 }
 0x29c   : > { %v6848_v61 = vmul.f32 %v6840_v10, %v6840_v10  ;;  %v2351_v57 = vsub.f32 %v2137_v55, %v2319_v63  ;;  %v2143_v43 = vadd.f32 %v6623_v48, %v2007_v3  ;;  %v2256_v41 = vadd.f32 %v6625_v45, %v2007_v3 }
 0x29d   : > { %v6854_v27 = vmul.f32 %v6842_v20, %v6842_v20  ;;  %v2353_v47 = vsub.f32 %v2250_v59, %v2321_v1  ;;  %v2290_v22 = vadd.f32 0.5, %v2141_v4  ;;  %v2292_v2 = vadd.f32 0.5, %v2254_v0 }
 0x29e   : > { %v2446_v11 = vmul.f32 -0.006040975, %v6848_v61  ;;  %v6857_v58 = vadd.f32 %v2351_v57, %v2351_v57  ;;  %v2291_v54 = vadd.f32 0.5, %v2143_v43  ;;  %v2293_v24 = vadd.f32 0.5, %v2256_v41 }
 0x29f   : > { %v2448_v16 = vmul.f32 -0.006040975, %v6854_v27  ;;  %v6860_v42 = vadd.f32 %v2353_v47, %v2353_v47  ;;  %v2322_v48 = vfloor.f32 %v2290_v22  ;;  %v2324_v25 = vfloor.f32 %v2292_v2  ;;  %v6900_v47 = vpop.permute.xlu0 %2011 }
 0x2a0   : > { %v2478_v45 = vadd.f32 0.08060466, %v2446_v11  ;;  %v6864_v34 = vmul.f32 %v6857_v58, %v6857_v58  ;;  %v2323_v21 = vfloor.f32 %v2291_v54  ;;  %v2325_v49 = vfloor.f32 %v2293_v24 }
 0x2a1   : > { %v2480_v32 = vadd.f32 0.08060466, %v2448_v16  ;;  %v6868_v29 = vmul.f32 %v6860_v42, %v6860_v42  ;;  %v2354_v30 = vsub.f32 %v2141_v4, %v2322_v48  ;;  %v2356_v50 = vsub.f32 %v2254_v0, %v2324_v25 }
 0x2a2   : > { %v2510_v9 = vmul.f32 %v2478_v45, %v6848_v61  ;;  %v2447_v55 = vmul.f32 -0.006040975, %v6864_v34  ;;  %v2355_v19 = vsub.f32 %v2143_v43, %v2323_v21  ;;  %v2357_v15 = vsub.f32 %v2256_v41, %v2325_v49 }
 0x2a3   : > { %v2512_v51 = vmul.f32 %v2480_v32, %v6854_v27  ;;  %v2449_v59 = vmul.f32 -0.006040975, %v6868_v29  ;;  %v6874_v36 = vadd.f32 %v2354_v30, %v2354_v30  ;;  %v6876_v35 = vadd.f32 %v2356_v50, %v2356_v50  ;;  %v8485_v32 = vld [vmem:[#allocation42_spill] sm:$0xff] }
 0x2a4   : > { %v2542_v53 = vadd.f32 -0.5983973, %v2510_v9  ;;  %v2479_v60 = vadd.f32 0.08060466, %v2447_v55  ;;  %v6878_v62 = vadd.f32 %v2355_v19, %v2355_v19  ;;  %v6880_v17 = vadd.f32 %v2357_v15, %v2357_v15 }
 0x2a5   : > { %v2544_v3 = vadd.f32 -0.5983973, %v2512_v51  ;;  %v2481_v63 = vadd.f32 0.08060466, %v2449_v59  ;;  %v6884_v1 = vmul.f32 %v6874_v36, %v6874_v36  ;;  %v6888_v4 = vmul.f32 %v6876_v35, %v6876_v35 }
 0x2a6   : > { %v2574_v0 = vmul.f32 %v2542_v53, %v6848_v61  ;;  %v2511_v57 = vmul.f32 %v2479_v60, %v6864_v34  ;;  %v6894_v43 = vmul.f32 %v6878_v62, %v6878_v62  ;;  %v6898_v41 = vmul.f32 %v6880_v17, %v6880_v17 }
 0x2a7   : > { %v2576_v22 = vmul.f32 %v2544_v3, %v6854_v27  ;;  %v2513_v2 = vmul.f32 %v2481_v63, %v6868_v29  ;;  %v2450_v11 = vmul.f32 -0.006040975, %v6884_v1  ;;  %v2452_v54 = vmul.f32 -0.006040975, %v6888_v4 }
 0x2a8   : > { %v2606_v24 = vadd.f32 2.5499265, %v2574_v0  ;;  %v2543_v16 = vadd.f32 -0.5983973, %v2511_v57  ;;  %v2451_v48 = vmul.f32 -0.006040975, %v6894_v43  ;;  %v6909_v25 = vadd.f32 %v6632_v44, %v6900_v47 }
 0x2a9   : > { %v2608_v45 = vadd.f32 2.5499265, %v2576_v22  ;;  %v2545_v21 = vadd.f32 -0.5983973, %v2513_v2  ;;  %v2482_v49 = vadd.f32 0.08060466, %v2450_v11  ;;  %v6913_v30 = vadd.f32 %v8485_v32, %v6900_v47 }
 0x2aa   : > { %v2638_v50 = vmul.f32 %v2606_v24, %v6848_v61  ;;  %v2575_v9 = vmul.f32 %v2543_v16, %v6864_v34  ;;  %v2484_v55 = vadd.f32 0.08060466, %v2452_v54  ;;  %v2483_v19 = vadd.f32 0.08060466, %v2451_v48  ;;  %v8486_v2 = vld [vmem:[#allocation43_spill] sm:$0xff] }
 0x2ab   : > { %v2640_v15 = vmul.f32 %v2608_v45, %v6854_v27  ;;  %v2577_v51 = vmul.f32 %v2545_v21, %v6868_v29  ;;  %v2514_v44 = vmul.f32 %v2482_v49, %v6884_v1  ;;  %v2453_v59 = vmul.f32 -0.006040975, %v6898_v41 }
 0x2ac   : > { %v2670_v53 = vadd.f32 -5.167685, %v2638_v50  ;;  %v2607_v60 = vadd.f32 2.5499265, %v2575_v9  ;;  %v2516_v3 = vmul.f32 %v2484_v55, %v6888_v4  ;;  %v2515_v63 = vmul.f32 %v2483_v19, %v6894_v43 }
 0x2ad   : > { %v2672_v0 = vadd.f32 -5.167685, %v2640_v15  ;;  %v2609_v57 = vadd.f32 2.5499265, %v2577_v51  ;;  %v2546_v22 = vadd.f32 -0.5983973, %v2514_v44  ;;  %v2149_v11 = vadd.f32 %v8486_v2, %v6900_v47 }
 0x2ae   : > { %v2702_v54 = vmul.f32 %v2670_v53, %v6848_v61  ;;  %v2639_v24 = vmul.f32 %v2607_v60, %v6864_v34  ;;  %v2548_v16 = vadd.f32 -0.5983973, %v2516_v3  ;;  %v2547_v48 = vadd.f32 -0.5983973, %v2515_v63 }
 0x2af   : > { %v2704_v45 = vmul.f32 %v2672_v0, %v6854_v27  ;;  %v2641_v21 = vmul.f32 %v2609_v57, %v6868_v29  ;;  %v2578_v49 = vmul.f32 %v2546_v22, %v6884_v1  ;;  %v2485_v32 = vadd.f32 0.08060466, %v2453_v59  ;;  %v8487_v22 = vld [vmem:[#allocation25_spill] sm:$0xff] }
 0x2b0   : > { %v2734_v50 = vadd.f32 3.1415918, %v2702_v54  ;;  %v2671_v9 = vadd.f32 -5.167685, %v2639_v24  ;;  %v2580_v55 = vmul.f32 %v2548_v16, %v6888_v4  ;;  %v2579_v19 = vmul.f32 %v2547_v48, %v6894_v43 }
 0x2b1   : > { %v2736_v15 = vadd.f32 3.1415918, %v2704_v45  ;;  %v2673_v51 = vadd.f32 -5.167685, %v2641_v21  ;;  %v2610_v61 = vadd.f32 2.5499265, %v2578_v49  ;;  %v2517_v44 = vmul.f32 %v2485_v32, %v6898_v41 }
 0x2b2   : > { %v2766_v53 = vmul.f32 %v2734_v50, %v6840_v10  ;;  %v2703_v27 = vmul.f32 %v2671_v9, %v6864_v34  ;;  %v2612_v60 = vadd.f32 2.5499265, %v2580_v55  ;;  %v2611_v3 = vadd.f32 2.5499265, %v2579_v19  ;;  %v8488_v10 = vld [vmem:[#allocation26_spill] sm:$0xff] }
 0x2b3   : > { %v2768_v63 = vmul.f32 %v2736_v15, %v6842_v20  ;;  %v2705_v59 = vmul.f32 %v2673_v51, %v6868_v29  ;;  %v2642_v0 = vmul.f32 %v2610_v61, %v6884_v1  ;;  %v2549_v57 = vadd.f32 -0.5983973, %v2517_v44 }
 0x2b4   : > { %v6939_v2 = vadd.f32 %v2766_v53, %v8487_v22  ;;  %v2735_v54 = vadd.f32 3.1415918, %v2703_v27  ;;  %v2644_v24 = vmul.f32 %v2612_v60, %v6888_v4  ;;  %v2643_v16 = vmul.f32 %v2611_v3, %v6894_v43  ;;  %v8489_v60 = vld [vmem:[#allocation44_spill] sm:$0xff] }
 0x2b5   : > { %v6944_v48 = vadd.f32 %v2768_v63, %v8488_v10  ;;  %v2737_v34 = vadd.f32 3.1415918, %v2705_v59  ;;  %v2674_v45 = vadd.f32 -5.167685, %v2642_v0  ;;  %v2581_v20 = vmul.f32 %v2549_v57, %v6898_v41  ;;  %v8490_v10 = vld [vmem:[#allocation27_spill] sm:$0xff] }
 0x2b6   : > { %v6948_v29 = vmul.f32 %v2735_v54, %v6857_v58  ;;  %v2676_v21 = vadd.f32 -5.167685, %v2644_v24  ;;  %v2675_v49 = vadd.f32 -5.167685, %v2643_v16  ;;  %v2294_v32 = vadd.f32 0.5, %v6909_v25 }
 0x2b7   : > { %v6952_v50 = vmul.f32 %v2737_v34, %v6860_v42  ;;  %v2706_v9 = vmul.f32 %v2674_v45, %v6884_v1  ;;  %v2613_v55 = vadd.f32 2.5499265, %v2581_v20  ;;  %v2296_v19 = vadd.f32 0.5, %v6913_v30  ;;  %v8491_v20 = vld [vmem:[#allocation28_spill] sm:$0xff] }
 0x2b8   : > { %v2708_v15 = vmul.f32 %v2676_v21, %v6888_v4  ;;  %v2707_v51 = vmul.f32 %v2675_v49, %v6894_v43  ;;  %v2326_v61 = vfloor.f32 %v2294_v32  ;;  %v2295_v44 = vadd.f32 0.5, %v2149_v11 }
 0x2b9   : > { %v2738_v58 = vadd.f32 3.1415918, %v2706_v9  ;;  %v2645_v53 = vmul.f32 %v2613_v55, %v6898_v41  ;;  %v2328_v27 = vfloor.f32 %v2296_v19  ;;  %v2262_v3 = vadd.f32 %v8489_v60, %v6900_v47  ;;  %v2017_v47 = vpop.permute.xlu1 %2016 }
 0x2ba   : > { %v2740_v42 = vadd.f32 3.1415918, %v2708_v15  ;;  %v2739_v63 = vadd.f32 3.1415918, %v2707_v51  ;;  %v2358_v1 = vsub.f32 %v6909_v25, %v2326_v61  ;;  %v2327_v59 = vfloor.f32 %v2295_v44 }
 0x2bb   : > { %v2770_v0 = vmul.f32 %v2738_v58, %v6874_v36  ;;  %v2677_v57 = vadd.f32 -5.167685, %v2645_v53  ;;  %v2360_v4 = vsub.f32 %v6913_v30, %v2328_v27  ;;  %v2297_v43 = vadd.f32 0.5, %v2262_v3 }
 0x2bc   : > { %v2772_v22 = vmul.f32 %v2740_v42, %v6876_v35  ;;  %v6966_v54 = vmul.f32 %v2739_v63, %v6878_v62  ;;  %v6968_v24 = vadd.f32 %v2358_v1, %v2358_v1  ;;  %v2359_v16 = vsub.f32 %v2149_v11, %v2327_v59 }
 0x2bd   : > { %v6971_v34 = vadd.f32 %v2770_v0, %v8490_v10  ;;  %v2709_v25 = vmul.f32 %v2677_v57, %v6898_v41  ;;  %v6974_v45 = vadd.f32 %v2360_v4, %v2360_v4  ;;  %v2329_v36 = vfloor.f32 %v2297_v43 }
 0x2be   : > { %v6977_v30 = vadd.f32 %v2772_v22, %v8491_v20  ;;  %v6981_v35 = vmul.f32 %v6968_v24, %v6968_v24  ;;  %v6983_v62 = vadd.f32 %v2359_v16, %v2359_v16  ;;  %v2153_v11 = vadd.f32 %v6648_v5, %v2017_v47 }
 0x2bf   : > { %v2741_v21 = vadd.f32 3.1415918, %v2709_v25  ;;  %v6988_v49 = vmul.f32 %v6974_v45, %v6974_v45  ;;  %v2361_v41 = vsub.f32 %v2262_v3, %v2329_v36  ;;  %v2266_v32 = vadd.f32 %v6650_v39, %v2017_v47 }
 0x2c0   : > { %v2454_v9 = vmul.f32 -0.006040975, %v6981_v35  ;;  %v6994_v55 = vmul.f32 %v6983_v62, %v6983_v62  ;;  %v2298_v19 = vadd.f32 0.5, %v2153_v11  ;;  %v2155_v15 = vadd.f32 %v6655_v28, %v2017_v47 }
 0x2c1   : > { %v6998_v51 = vmul.f32 %v2741_v21, %v6880_v17  ;;  %v2456_v5 = vmul.f32 -0.006040975, %v6988_v49  ;;  %v7001_v61 = vadd.f32 %v2361_v41, %v2361_v41  ;;  %v2300_v44 = vadd.f32 0.5, %v2266_v32 }
 0x2c2   : > { %v2486_v58 = vadd.f32 0.08060466, %v2454_v9  ;;  %v2455_v39 = vmul.f32 -0.006040975, %v6994_v55  ;;  %v2330_v53 = vfloor.f32 %v2298_v19  ;;  %v2299_v27 = vadd.f32 0.5, %v2155_v15 }
 0x2c3   : > { %v2488_v60 = vadd.f32 0.08060466, %v2456_v5  ;;  %v7006_v3 = vmul.f32 %v7001_v61, %v7001_v61  ;;  %v2332_v42 = vfloor.f32 %v2300_v44  ;;  %v2268_v28 = vadd.f32 %v6657_v31, %v2017_v47 }
 0x2c4   : > { %v2518_v17 = vmul.f32 %v2486_v58, %v6981_v35  ;;  %v2487_v63 = vadd.f32 0.08060466, %v2455_v39  ;;  %v2362_v1 = vsub.f32 %v2153_v11, %v2330_v53  ;;  %v2331_v59 = vfloor.f32 %v2299_v27 }
 0x2c5   : > { %v2520_v0 = vmul.f32 %v2488_v60, %v6988_v49  ;;  %v2457_v57 = vmul.f32 -0.006040975, %v7006_v3  ;;  %v2364_v4 = vsub.f32 %v2266_v32, %v2332_v42  ;;  %v2301_v43 = vadd.f32 0.5, %v2268_v28 }
 0x2c6   : > { %v2550_v22 = vadd.f32 -0.5983973, %v2518_v17  ;;  %v2519_v16 = vmul.f32 %v2487_v63, %v6994_v55  ;;  %v7013_v10 = vadd.f32 %v2362_v1, %v2362_v1  ;;  %v2363_v25 = vsub.f32 %v2155_v15, %v2331_v59 }
 0x2c7   : > { %v2552_v36 = vadd.f32 -0.5983973, %v2520_v0  ;;  %v2489_v20 = vadd.f32 0.08060466, %v2457_v57  ;;  %v7015_v31 = vadd.f32 %v2364_v4, %v2364_v4  ;;  %v2333_v47 = vfloor.f32 %v2301_v43 }
 0x2c8   : > { %v2582_v11 = vmul.f32 %v2550_v22, %v6981_v35  ;;  %v2551_v21 = vadd.f32 -0.5983973, %v2519_v16  ;;  %v7020_v41 = vmul.f32 %v7013_v10, %v7013_v10  ;;  %v7022_v32 = vadd.f32 %v2363_v25, %v2363_v25 }
 0x2c9   : > { %v2584_v9 = vmul.f32 %v2552_v36, %v6988_v49  ;;  %v2521_v19 = vmul.f32 %v2489_v20, %v7006_v3  ;;  %v7028_v15 = vmul.f32 %v7015_v31, %v7015_v31  ;;  %v2365_v5 = vsub.f32 %v2268_v28, %v2333_v47 }
 0x2ca   : > { %v2614_v44 = vadd.f32 2.5499265, %v2582_v11  ;;  %v2583_v58 = vmul.f32 %v2551_v21, %v6994_v55  ;;  %v2458_v39 = vmul.f32 -0.006040975, %v7020_v41  ;;  %v7034_v53 = vmul.f32 %v7022_v32, %v7022_v32 }
 0x2cb   : > { %v2616_v27 = vadd.f32 2.5499265, %v2584_v9  ;;  %v2553_v60 = vadd.f32 -0.5983973, %v2521_v19  ;;  %v2460_v42 = vmul.f32 -0.006040975, %v7028_v15  ;;  %v7037_v17 = vadd.f32 %v2365_v5, %v2365_v5 }
 0x2cc   : > { %v2646_v63 = vmul.f32 %v2614_v44, %v6981_v35  ;;  %v2615_v1 = vadd.f32 2.5499265, %v2583_v58  ;;  %v2490_v59 = vadd.f32 0.08060466, %v2458_v39  ;;  %v2459_v28 = vmul.f32 -0.006040975, %v7034_v53 }
 0x2cd   : > { %v2648_v0 = vmul.f32 %v2616_v27, %v6988_v49  ;;  %v2585_v57 = vmul.f32 %v2553_v60, %v7006_v3  ;;  %v2492_v4 = vadd.f32 0.08060466, %v2460_v42  ;;  %v7045_v43 = vmul.f32 %v7037_v17, %v7037_v17 }
 0x2ce   : > { %v2678_v22 = vadd.f32 -5.167685, %v2646_v63  ;;  %v2647_v16 = vmul.f32 %v2615_v1, %v6994_v55  ;;  %v2522_v25 = vmul.f32 %v2490_v59, %v7020_v41  ;;  %v2491_v36 = vadd.f32 0.08060466, %v2459_v28 }
 0x2cf   : > { %v2680_v20 = vadd.f32 -5.167685, %v2648_v0  ;;  %v2617_v47 = vadd.f32 2.5499265, %v2585_v57  ;;  %v2524_v11 = vmul.f32 %v2492_v4, %v7028_v15  ;;  %v2461_v21 = vmul.f32 -0.006040975, %v7045_v43 }
 0x2d0   : > { %v2710_v9 = vmul.f32 %v2678_v22, %v6981_v35  ;;  %v2679_v19 = vadd.f32 -5.167685, %v2647_v16  ;;  %v2554_v5 = vadd.f32 -0.5983973, %v2522_v25  ;;  %v2523_v44 = vmul.f32 %v2491_v36, %v7034_v53 }
 0x2d1   : > { %v2712_v58 = vmul.f32 %v2680_v20, %v6988_v49  ;;  %v2649_v39 = vmul.f32 %v2617_v47, %v7006_v3  ;;  %v2556_v27 = vadd.f32 -0.5983973, %v2524_v11  ;;  %v2493_v60 = vadd.f32 0.08060466, %v2461_v21  ;;  %v8492_v47 = vld [vmem:[#allocation29_spill] sm:$0xff] }
 0x2d2   : > { %v2742_v42 = vadd.f32 3.1415918, %v2710_v9  ;;  %v2711_v63 = vmul.f32 %v2679_v19, %v6994_v55  ;;  %v2586_v1 = vmul.f32 %v2554_v5, %v7020_v41  ;;  %v2555_v59 = vadd.f32 -0.5983973, %v2523_v44  ;;  %v8493_v5 = vld [vmem:[#allocation30_spill] sm:$0xff] }
 0x2d3   : > { %v2744_v28 = vadd.f32 3.1415918, %v2712_v58  ;;  %v2681_v0 = vadd.f32 -5.167685, %v2649_v39  ;;  %v2588_v35 = vmul.f32 %v2556_v27, %v7028_v15  ;;  %v2525_v57 = vmul.f32 %v2493_v60, %v7045_v43  ;;  %v8494_v27 = vld [vmem:[#allocation18_spill] sm:$0xff] }
 0x2d4   : > { %v2774_v4 = vmul.f32 %v2742_v42, %v6968_v24  ;;  %v2743_v22 = vadd.f32 3.1415918, %v2711_v63  ;;  %v2618_v49 = vadd.f32 2.5499265, %v2586_v1  ;;  %v2587_v16 = vmul.f32 %v2555_v59, %v7034_v53  ;;  %v8495_v42 = vld [vmem:[#allocation20_spill] sm:$0xff] }
 0x2d5   : > { %v2776_v25 = vmul.f32 %v2744_v28, %v6974_v45  ;;  %v2713_v36 = vmul.f32 %v2681_v0, %v7006_v3  ;;  %v2620_v55 = vadd.f32 2.5499265, %v2588_v35  ;;  %v2557_v20 = vadd.f32 -0.5983973, %v2525_v57  ;;  %v8496_v28 = vld [vmem:[#allocation19_spill] sm:$0xff] }
 0x2d6   : > { %v7064_v11 = vadd.f32 %v2774_v4, %v8492_v47  ;;  %v2775_v21 = vmul.f32 %v2743_v22, %v6983_v62  ;;  %v2650_v9 = vmul.f32 %v2618_v49, %v7020_v41  ;;  %v2619_v19 = vadd.f32 2.5499265, %v2587_v16  ;;  %v8498_v22 = vld [vmem:[#allocation21_spill] sm:$0xff]  ;;  %v8505_v47 = vld [vmem:[#allocation31_spill] sm:$0xff] }
 0x2d7   : > { %v7069_v24 = vadd.f32 %v2776_v25, %v8493_v5  ;;  %v2745_v44 = vadd.f32 3.1415918, %v2713_v36  ;;  %v2652_v58 = vmul.f32 %v2620_v55, %v7028_v15  ;;  %v2589_v45 = vmul.f32 %v2557_v20, %v7045_v43  ;;  %v8504_v20 = vld [vmem:[#allocation23_spill] sm:$0xff] }
 0x2d8   : > { %v2682_v39 = vadd.f32 -5.167685, %v2650_v9  ;;  %v2651_v3 = vmul.f32 %v2619_v19, %v7034_v53  ;;  %v2783_v60 = vadd.f32 %v6666_v52, %v8494_v27  ;;  %v2787_v62 = vadd.f32 %v6693_v37, %v8495_v42  ;;  %v8514_v27 = vld [vmem:[#allocation36_spill] sm:$0xff] }
 0x2d9   : > { %v2777_v63 = vmul.f32 %v2745_v44, %v7001_v61  ;;  %v2684_v1 = vadd.f32 -5.167685, %v2652_v58  ;;  %v2621_v59 = vadd.f32 2.5499265, %v2589_v45  ;;  %v2785_v0 = vadd.f32 %v6673_v23, %v8496_v28  ;;  %v8518_v42 = vld [vmem:[#allocation40_spill] sm:$0xff]  ;;  %v8521_v28 = vld [vmem:[#allocation39_spill] sm:$0xff] }
 0x2da   : > { %v2714_v35 = vmul.f32 %v2682_v39, %v7020_v41  ;;  %v2683_v57 = vadd.f32 -5.167685, %v2651_v3  ;;  %v7082_v4 = vpack.c.bf16 %v2787_v62, %v2783_v60  ;;  %v2789_v49 = vadd.f32 %v6699_v33, %v8498_v22  ;;  %v8502_v33 = vld [vmem:[#allocation22_spill] sm:$0xff]  ;;  %v8513_v39 = vld [vmem:[#allocation35_spill] sm:$0xff]  ;;  %v2817_v22 = vld [vmem:[%s8403_s2 + $0x58] sm:$0xff] }
 0x2db   : > { %v2716_v52 = vmul.f32 %v2684_v1, %v7028_v15  ;;  %v2653_v16 = vmul.f32 %v2621_v59, %v7045_v43  ;;  %v7090_v37 = vpack.c.bf16 %v6690_v12, %v6670_v14  ;;  %v7094_v61 = vpack.c.bf16 %v6696_v8, %v6677_v38  ;;  %v8503_v14 = vld [vmem:[#allocation24_spill] sm:$0xff]  ;;  %v8520_v1 = vld [vmem:[#allocation38_spill] sm:$0xff] }
 0x2dc   : > { %8497 = vst [vmem:[#allocation42_spill] sm:$0xff] %v7082_v4  ;;  %v2746_v23 = vadd.f32 3.1415918, %v2714_v35  ;;  %v2715_v41 = vmul.f32 %v2683_v57, %v7034_v53  ;;  %5012 = vmatprep.subr.bf16.mxu0 %v7082_v4  ;;  %v7098_v25 = vpack.c.bf16 %v2789_v49, %v2785_v0  ;;  %v2791_v15 = vadd.f32 %v6806_v26, %v8502_v33  ;;  %v2816_v57 = vld [vmem:[%s8403_s2 + $0x50] sm:$0xff]  ;;  %v2818_v49 = vld [vmem:[%s8403_s2 + $0x60] sm:$0xff] }
 0x2dd   : > { %8499 = vst [vmem:[#allocation43_spill] sm:$0xff] %v7090_v37  ;;  %8500 = vst [vmem:[#allocation25_spill] sm:$0xff] %v7094_v61  ;;  %v2748_v36 = vadd.f32 3.1415918, %v2716_v52  ;;  %v2685_v55 = vadd.f32 -5.167685, %v2653_v16  ;;  %5014 = vmatpush1.bf16.msra.mxu0 %v7090_v37  ;;  %v2795_v12 = vadd.f32 %v6831_v13, %v8503_v14  ;;  %v2793_v38 = vadd.f32 %v6810_v46, %v8504_v20 }
 0x2de   : > { %8501 = vst [vmem:[#allocation26_spill] sm:$0xff] %v7098_v25  ;;  %v2778_v8 = vmul.f32 %v2746_v23, %v7013_v10  ;;  %v2747_v53 = vadd.f32 3.1415918, %v2715_v41  ;;  %5028 = vmatprep.subr.bf16.mxu1 %v7098_v25  ;;  %v2797_v9 = vadd.f32 %v6838_v56, %v8505_v47  ;;  %v7113_v26 = vpack.c.bf16 %v6828_v40, %v6801_v6  ;;  %v8509_v10 = vld [vmem:[#allocation32_spill] sm:$0xff]  ;;  %v8511_v6 = vld [vmem:[#allocation34_spill] sm:$0xff]  ;;  %v2819_v52 = vld [vmem:[%s8403_s2 + $0x68] sm:$0xff] }
 0x2df   : > { %v2780_v19 = vmul.f32 %v2748_v36, %v7015_v31  ;;  %v2717_v5 = vmul.f32 %v2685_v55, %v7045_v43  ;;  %5030 = vmatpush1.bf16.msra.mxu1 %v7094_v61  ;;  %v7118_v13 = vpack.c.bf16 %v2795_v12, %v2791_v15  ;;  %v7122_v46 = vpack.c.bf16 %v6835_v18, %v6815_v7  ;;  %v8512_v31 = vld [vmem:[#allocation33_spill] sm:$0xff]  ;;  %v2820_v16 = vld [vmem:[%s8403_s2 + $0x70] sm:$0xff]  ;;  %v8529_v41 = vld [vmem:[#allocation2_spill] sm:$0xff] }
 0x2e0   : > { %8506 = vst [vmem:[#allocation44_spill] sm:$0xff] %v7113_v26  ;;  %v2810_v44 = vadd.f32 %v2778_v8, %v8509_v10  ;;  %v2779_v56 = vmul.f32 %v2747_v53, %v7022_v32  ;;  %v7126_v58 = vpack.c.bf16 %v2797_v9, %v2793_v38  ;;  %v2799_v40 = vadd.f32 %v6948_v29, %v8511_v6  ;;  %v8515_v18 = vld [vmem:[#allocation37_spill] sm:$0xff]  ;;  %v8530_v15 = vld [vmem:[#allocation3_spill] sm:$0xff]  ;;  %v8531_v55 = vld [vmem:[#allocation4_spill] sm:$0xff] }
 0x2e1   : > { %8507 = vst [vmem:[#allocation27_spill] sm:$0xff] %v7118_v13  ;;  %8508 = vst [vmem:[#allocation28_spill] sm:$0xff] %v7122_v46  ;;  %v2812_v45 = vadd.f32 %v2780_v19, %v8512_v31  ;;  %v2749_v43 = vadd.f32 3.1415918, %v2717_v5  ;;  %5016 = vmatprep.subr.bf16.mxu0 %v7118_v13  ;;  %v2803_v3 = vadd.f32 %v6966_v54, %v8513_v39  ;;  %v1946_v54 = vadd.f32 0.99999946, %v8518_v42 }
 0x2e2   : > { %8510 = vst [vmem:[#allocation29_spill] sm:$0xff] %v7126_v58  ;;  %v2801_v7 = vadd.f32 %v6952_v50, %v8514_v27  ;;  %5032 = vmatprep.subr.bf16.mxu1 %v7126_v58  ;;  %5018 = vmatpush1.bf16.msra.mxu0 %v7113_v26  ;;  %v2805_v32 = vadd.f32 %v6998_v51, %v8515_v18  ;;  %v2821_v23 = vld [vmem:[%s8403_s2 + $0x78] sm:$0xff]  ;;  %v667_v33 = vadd.f32 0.5, %v8529_v41  ;;  %v669_v36 = vadd.f32 0.5, %v8530_v15  ;;  %v8533_v38 = vld [vmem:[#allocation6_spill] sm:$0xff]  ;;  %v8534_v47 = vld [vmem:[#allocation7_spill] sm:$0xff] }
 0x2e3   : > { %v7142_v29 = vpack.c.bf16 %v6971_v34, %v6939_v2  ;;  %v7146_v60 = vpack.c.bf16 %v6977_v30, %v6944_v48  ;;  %v2781_v62 = vmul.f32 %v2749_v43, %v7037_v17  ;;  %5034 = vmatpush1.bf16.msra.mxu1 %v7122_v46  ;;  %v7151_v50 = vpack.c.bf16 %v2803_v3, %v2799_v40  ;;  %v8523_v2 = vld [vmem:[#allocation41_spill] sm:$0xff]  ;;  %v8535_v10 = vld [vmem:[#allocation8_spill] sm:$0xff]  ;;  %v8538_v27 = vld [vmem:[#allocation11_spill] sm:$0xff] }
 0x2e4   : > { %v2807_v59 = vadd.f32 %v2775_v21, %v8520_v1  ;;  %v2811_v51 = vadd.f32 %v2779_v56, %v8521_v28  ;;  %v7155_v0 = vpack.c.bf16 %v2805_v32, %v2801_v7  ;;  %v2809_v34 = vadd.f32 %v2777_v63, %v8523_v2  ;;  %v2815_v63 = vld [vmem:[%s8403_s2 + $0x48] sm:$0xff]  ;;  %v8532_v12 = vld [vmem:[#allocation5_spill] sm:$0xff]  ;;  %v8541_v2 = vld [vmem:[#allocation14_spill] sm:$0xff] }
 0x2e5   : > { %8516 = vst [vmem:[#allocation30_spill] sm:$0xff] %v7142_v29  ;;  %8517 = vst [vmem:[#allocation18_spill] sm:$0xff] %v7146_v60  ;;  %v7159_v35 = vpack.c.bf16 %v2810_v44, %v7064_v11  ;;  %v7162_v48 = vpack.c.bf16 %v2812_v45, %v7069_v24  ;;  %5020 = vmatprep.subr.bf16.mxu0 %v7151_v50  ;;  %v2813_v17 = vadd.f32 %v2781_v62, %v1946_v54  ;;  %v2814_v11 = vld [vmem:[%s8403_s2 + $0x40] sm:$0xff]  ;;  %v8528_v24 = vmov 0.0   ;;  %v8536_v6 = vld [vmem:[#allocation9_spill] sm:$0xff] }
 0x2e6   : > { %8519 = vst [vmem:[#allocation20_spill] sm:$0xff] %v7151_v50  ;;  %8522 = vst [vmem:[#allocation19_spill] sm:$0xff] %v7155_v0  ;;  %v7165_v30 = vpack.c.bf16 %v2811_v51, %v2807_v59  ;;  %5036 = vmatprep.subr.bf16.mxu1 %v7155_v0  ;;  %5022 = vmatpush1.bf16.msra.mxu0 %v7142_v29  ;;  %v668_v14 = vadd.f32 0.5, %v8531_v55  ;;  %v670_v20 = vadd.f32 0.5, %v8532_v12  ;;  %v671_v8 = vadd.f32 0.5, %v8533_v38  ;;  %v8537_v45 = vld [vmem:[#allocation10_spill] sm:$0xff] }
 0x2e7   : > { %8524 = vst [vmem:[#allocation21_spill] sm:$0xff] %v7159_v35  ;;  %8525 = vst [vmem:[#allocation22_spill] sm:$0xff] %v7162_v48  ;;  %5038 = vmatpush1.bf16.msra.mxu1 %v7146_v60  ;;  %v7171_v21 = vpack.c.bf16 %v2813_v17, %v2809_v34  ;;  %v731_v53 = vfloor.f32 %v667_v33  ;;  %v673_v9 = vadd.f32 0.5, %v8534_v47  ;;  %v733_v19 = vfloor.f32 %v669_v36  ;;  %v8539_v54 = vld [vmem:[#allocation12_spill] sm:$0xff]  ;;  %v8540_v28 = vld [vmem:[#allocation13_spill] sm:$0xff] }
 0x2e8   : > { %8526 = vst [vmem:[#allocation24_spill] sm:$0xff] %v7165_v30  ;;  %5024 = vmatprep.subr.bf16.mxu0 %v7165_v30  ;;  %v732_v5 = vfloor.f32 %v668_v14  ;;  %v672_v44 = vadd.f32 0.5, %v8535_v10  ;;  %v734_v56 = vfloor.f32 %v670_v20  ;;  %v674_v40 = vadd.f32 0.5, %v8536_v6 }
 0x2e9   : > { %8527 = vst [vmem:[#allocation23_spill] sm:$0xff] %v7171_v21  ;;  %5040 = vmatprep.subr.bf16.mxu1 %v7171_v21  ;;  %v735_v31 = vfloor.f32 %v671_v8  ;;  %v675_v43 = vadd.f32 0.5, %v8537_v45  ;;  %v795_v39 = vsub.f32 %v8529_v41, %v731_v53  ;;  %v737_v3 = vfloor.f32 %v673_v9  ;;  %v8544_v41 = vld [vmem:[#allocation17_spill] sm:$0xff] }
 0x2ea   : > { %5026 = vmatpush1.bf16.msra.mxu0 %v7159_v35  ;;  %v677_v7 = vadd.f32 0.5, %v8538_v27  ;;  %v797_v18 = vsub.f32 %v8530_v15, %v733_v19  ;;  %v796_v32 = vsub.f32 %v8531_v55, %v732_v5  ;;  %v736_v42 = vfloor.f32 %v672_v44 }
 0x2eb   : > { %5042 = vmatpush1.bf16.msra.mxu1 %v7162_v48  ;;  %v676_v62 = vadd.f32 0.5, %v8539_v54  ;;  %v798_v1 = vsub.f32 %v8532_v12, %v734_v56  ;;  %v738_v59 = vfloor.f32 %v674_v40  ;;  %v678_v51 = vadd.f32 0.5, %v8540_v28 }
 0x2ec   : > { %v679_v34 = vadd.f32 0.5, %v8541_v2  ;;  %v799_v17 = vsub.f32 %v8533_v38, %v735_v31  ;;  %v682_v33 = vadd.f32 0.5, %v8544_v41  ;;  %v7256_v15 = vadd.f32 %v797_v18, %v797_v18 }
 0x2ed   : > { %4907 = vmatmul.mubr.msk.f32.vlgmr.msra.gmra.mrb[48].mxu0 %vm2019_vm1, %v2814_v11  ;;  %v7258_v36 = vadd.f32 %v796_v32, %v796_v32  ;;  %v800_v55 = vsub.f32 %v8535_v10, %v736_v42  ;;  %v740_v14 = vfloor.f32 %v676_v62  ;;  %v7261_v12 = vadd.f32 %v798_v1, %v798_v1 }
 0x2ee   : > { %4915 = vmatmul.mubr.msk.f32.vlgmr.msra.gmra.mrb[48].mxu1 %vm2019_vm1, %v2814_v11  ;;  %2964 = vmatprep.mubr.f32.mxu0 %v8528_v24  ;;  %v739_v11 = vfloor.f32 %v675_v43  ;;  %v802_v20 = vsub.f32 %v8536_v6, %v738_v59  ;;  %v742_v38 = vfloor.f32 %v678_v51  ;;  %v743_v8 = vfloor.f32 %v679_v34 }
 0x2ef   : > { %3077 = vmatprep.mubr.f32.mxu1 %v8528_v24  ;;  %v7264_v53 = vadd.f32 %v799_v17, %v799_v17  ;;  %v746_v56 = vfloor.f32 %v682_v33  ;;  %v7276_v6 = vmul.f32 %v7256_v15, %v7256_v15  ;;  %v7280_v40 = vmul.f32 %v7258_v36, %v7258_v36 }
 0x2f0   : > { %v7282_v31 = vadd.f32 %v800_v55, %v800_v55  ;;  %v7287_v43 = vmul.f32 %v7261_v12, %v7261_v12 }
 0x2f1   : > { %4908 = vmatmul.mubr.msk.f32.gmra.mrb[50].mxu0 %vm2019_vm1, %v2815_v63  ;;  %v810_v59 = vsub.f32 %v8544_v41, %v746_v56  ;;  %v988_v51 = vmul.f32 -0.006040975, %v7280_v40 }
 0x2f2   : > { %4916 = vmatmul.mubr.msk.f32.gmra.mrb[50].mxu1 %vm2019_vm1, %v2815_v63  ;;  %2970 = vmatprep.mubr.f32.mxu0 %v8528_v24  ;;  %v8542_v63 = vld [vmem:[#allocation15_spill] sm:$0xff]  ;;  %v990_v17 = vmul.f32 -0.006040975, %v7287_v43 }
 0x2f3   : > { %3083 = vmatprep.mubr.f32.mxu1 %v8528_v24 }
 0x2f5   : > { %4909 = vmatmul.mubr.msk.f32.gmra.mrb[52].mxu0 %vm2019_vm1, %v2816_v57 }
 0x2f6   : > { %4917 = vmatmul.mubr.msk.f32.gmra.mrb[52].mxu1 %vm2019_vm1, %v2816_v57  ;;  %2976 = vmatprep.mubr.f32.mxu0 %v8528_v24  ;;  %v681_v57 = vadd.f32 0.5, %v8542_v63 }
 0x2f7   : > { %3089 = vmatprep.mubr.f32.mxu1 %v8528_v24 }
 0x2f8   : > { %v745_v9 = vfloor.f32 %v681_v57 }
 0x2f9   : > { %4910 = vmatmul.mubr.msk.f32.gmra.mrb[54].mxu0 %vm2019_vm1, %v2817_v22 }
 0x2fa   : > { %4918 = vmatmul.mubr.msk.f32.gmra.mrb[54].mxu1 %vm2019_vm1, %v2817_v22  ;;  %2982 = vmatprep.mubr.f32.mxu0 %v8528_v24  ;;  %v8543_v22 = vld [vmem:[#allocation16_spill] sm:$0xff]  ;;  %v809_v32 = vsub.f32 %v8542_v63, %v745_v9  ;;  %v1054_v9 = vadd.f32 0.08060466, %v990_v17 }
 0x2fb   : > { %3095 = vmatprep.mubr.f32.mxu1 %v8528_v24 }
 0x2fc   : > { %v1118_v35 = vmul.f32 %v1054_v9, %v7287_v43 }
 0x2fd   : > { %4911 = vmatmul.mubr.msk.f32.gmra.mrb[56].mxu0 %vm2019_vm1, %v2818_v49 }
 0x2fe   : > { %4919 = vmatmul.mubr.msk.f32.gmra.mrb[56].mxu1 %vm2019_vm1, %v2818_v49  ;;  %2988 = vmatprep.mubr.f32.mxu0 %v8528_v24  ;;  %v680_v49 = vadd.f32 0.5, %v8543_v22 }
 0x2ff   : > { %3101 = vmatprep.mubr.f32.mxu1 %v8528_v24 }
 0x300   : > { %v744_v19 = vfloor.f32 %v680_v49 }
 0x301   : > { %4912 = vmatmul.mubr.msk.f32.gmra.mrb[58].mxu0 %vm2019_vm1, %v2819_v52 }
 0x302   : > { %4920 = vmatmul.mubr.msk.f32.gmra.mrb[58].mxu1 %vm2019_vm1, %v2819_v52  ;;  %2994 = vmatprep.mubr.f32.mxu0 %v8528_v24  ;;  %v7252_v52 = vadd.f32 %v795_v39, %v795_v39  ;;  %v7289_v39 = vadd.f32 %v802_v20, %v802_v20  ;;  %v808_v42 = vsub.f32 %v8543_v22, %v744_v19 }
 0x303   : > { %3107 = vmatprep.mubr.f32.mxu1 %v8528_v24 }
 0x304   : > { %v7269_v5 = vmul.f32 %v7252_v52, %v7252_v52 }
 0x305   : > { %4913 = vmatmul.mubr.msk.f32.gmra.mrb[60].mxu0 %vm2019_vm1, %v2820_v16 }
 0x306   : > { %4921 = vmatmul.mubr.msk.f32.gmra.mrb[60].mxu1 %vm2019_vm1, %v2820_v16  ;;  %3000 = vmatprep.mubr.f32.mxu0 %v8528_v24  ;;  %v801_v16 = vsub.f32 %v8534_v47, %v737_v3  ;;  %v803_v47 = vsub.f32 %v8537_v45, %v739_v11  ;;  %v804_v45 = vsub.f32 %v8539_v54, %v740_v14  ;;  %v987_v54 = vmul.f32 -0.006040975, %v7269_v5 }
 0x307   : > { %3113 = vmatprep.mubr.f32.mxu1 %v8528_v24  ;;  %v806_v3 = vsub.f32 %v8540_v28, %v742_v38  ;;  %v989_v28 = vmul.f32 -0.006040975, %v7276_v6  ;;  %v7320_v11 = vmul.f32 %v7289_v39, %v7289_v39  ;;  %v7340_v14 = vadd.f32 %v810_v59, %v810_v59 }
 0x308   : > { %v7271_v44 = vadd.f32 %v801_v16, %v801_v16  ;;  %v7297_v18 = vadd.f32 %v803_v47, %v803_v47  ;;  %v7315_v34 = vadd.f32 %v804_v45, %v804_v45  ;;  %v7331_v16 = vadd.f32 %v809_v32, %v809_v32 }
 0x309   : > { %4914 = vmatmul.mubr.msk.f32.gmra.mrb[62].mxu0 %vm2019_vm1, %v2821_v23  ;;  %v7322_v63 = vadd.f32 %v806_v3, %v806_v3  ;;  %v1051_v41 = vadd.f32 0.08060466, %v987_v54  ;;  %v1053_v20 = vadd.f32 0.08060466, %v989_v28  ;;  %v1052_v38 = vadd.f32 0.08060466, %v988_v51 }
 0x30a   : > { %4922 = vmatmul.mubr.msk.f32.gmra.mrb[62].mxu1 %vm2019_vm1, %v2821_v23  ;;  %3768 = vmatprep.mubr.f32.mxu0 %v8528_v24  ;;  %v741_v23 = vfloor.f32 %v677_v7  ;;  %v7295_v7 = vmul.f32 %v7264_v53, %v7264_v53  ;;  %v7304_v62 = vmul.f32 %v7271_v44, %v7271_v44  ;;  %v7329_v49 = vmul.f32 %v7297_v18, %v7297_v18 }
 0x30b   : > { %3881 = vmatprep.mubr.f32.mxu1 %v8528_v24  ;;  %v7345_v47 = vmul.f32 %v7315_v34, %v7315_v34  ;;  %v994_v19 = vmul.f32 -0.006040975, %v7320_v11  ;;  %v7369_v28 = vmul.f32 %v7340_v14, %v7340_v14  ;;  %v1117_v51 = vmul.f32 %v1053_v20, %v7276_v6 }
 0x30c   : > { %v805_v10 = vsub.f32 %v8538_v27, %v741_v23  ;;  %v807_v27 = vsub.f32 %v8541_v2, %v743_v8  ;;  %v7313_v2 = vmul.f32 %v7282_v31, %v7282_v31  ;;  %v991_v22 = vmul.f32 -0.006040975, %v7295_v7 }
 0x30d   : > { %v7333_v23 = vadd.f32 %v808_v42, %v808_v42  ;;  %v993_v33 = vmul.f32 -0.006040975, %v7304_v62  ;;  %v995_v3 = vmul.f32 -0.006040975, %v7329_v49  ;;  %v1115_v42 = vmul.f32 %v1051_v41, %v7269_v5 }
 0x30e   : > { %v7306_v1 = vadd.f32 %v805_v10, %v805_v10  ;;  %v7324_v57 = vadd.f32 %v807_v27, %v807_v27  ;;  %v992_v8 = vmul.f32 -0.006040975, %v7313_v2  ;;  %v7350_v10 = vmul.f32 %v7322_v63, %v7322_v63 }
 0x30f   : > { %v1055_v45 = vadd.f32 0.08060466, %v991_v22  ;;  %v7359_v27 = vmul.f32 %v7331_v16, %v7331_v16  ;;  %v7363_v32 = vmul.f32 %v7333_v23, %v7333_v23  ;;  %v1057_v54 = vadd.f32 0.08060466, %v993_v33 }
 0x310   : > { %v7338_v55 = vmul.f32 %v7306_v1, %v7306_v1  ;;  %v7354_v56 = vmul.f32 %v7324_v57, %v7324_v57  ;;  %v1116_v17 = vmul.f32 %v1052_v38, %v7280_v40  ;;  %v1056_v22 = vadd.f32 0.08060466, %v992_v8 }
 0x311   : > { %v996_v48 = vmul.f32 -0.006040975, %v7345_v47  ;;  %v1058_v21 = vadd.f32 0.08060466, %v994_v19  ;;  %v998_v30 = vmul.f32 -0.006040975, %v7350_v10  ;;  %v1119_v33 = vmul.f32 %v1055_v45, %v7295_v7 }
 0x312   : > { %v997_v59 = vmul.f32 -0.006040975, %v7338_v55  ;;  %v999_v41 = vmul.f32 -0.006040975, %v7354_v56  ;;  %v1059_v60 = vadd.f32 0.08060466, %v995_v3  ;;  %v1121_v38 = vmul.f32 %v1057_v54, %v7304_v62 }
 0x313   : > { %v1001_v29 = vmul.f32 -0.006040975, %v7359_v27  ;;  %v1000_v0 = vmul.f32 -0.006040975, %v7363_v32  ;;  %v1179_v20 = vadd.f32 -0.5983973, %v1115_v42  ;;  %v1120_v19 = vmul.f32 %v1056_v22, %v7313_v2 }
 0x314   : > { %v1061_v8 = vadd.f32 0.08060466, %v997_v59  ;;  %v1002_v50 = vmul.f32 -0.006040975, %v7369_v28  ;;  %v1181_v46 = vadd.f32 -0.5983973, %v1117_v51  ;;  %v1122_v58 = vmul.f32 %v1058_v21, %v7320_v11 }
 0x315   : > { %v1180_v9 = vadd.f32 -0.5983973, %v1116_v17  ;;  %v1060_v26 = vadd.f32 0.08060466, %v996_v48  ;;  %v1182_v24 = vadd.f32 -0.5983973, %v1118_v35  ;;  %v1123_v61 = vmul.f32 %v1059_v60, %v7329_v49 }
 0x316   : > { %v1062_v45 = vadd.f32 0.08060466, %v998_v30  ;;  %v1063_v3 = vadd.f32 0.08060466, %v999_v41  ;;  %v1183_v13 = vadd.f32 -0.5983973, %v1119_v33  ;;  %v1243_v54 = vmul.f32 %v1179_v20, %v7269_v5 }
 0x317   : > { %v1065_v37 = vadd.f32 0.08060466, %v1001_v29  ;;  %v1064_v42 = vadd.f32 0.08060466, %v1000_v0  ;;  %v1185_v59 = vadd.f32 -0.5983973, %v1121_v38  ;;  %v1125_v25 = vmul.f32 %v1061_v8, %v7338_v55 }
 0x318   : > { %v1066_v51 = vadd.f32 0.08060466, %v1002_v50  ;;  %v1245_v17 = vmul.f32 %v1181_v46, %v7276_v6  ;;  %v1244_v48 = vmul.f32 %v1180_v9, %v7280_v40  ;;  %v1184_v35 = vadd.f32 -0.5983973, %v1120_v19 }
 0x319   : > { %v1124_v21 = vmul.f32 %v1060_v26, %v7345_v47  ;;  %v1246_v30 = vmul.f32 %v1182_v24, %v7287_v43  ;;  %v1186_v22 = vadd.f32 -0.5983973, %v1122_v58  ;;  %v1126_v60 = vmul.f32 %v1062_v45, %v7350_v10 }
 0x31a   : > { %v1127_v29 = vmul.f32 %v1063_v3, %v7354_v56  ;;  %v1247_v0 = vmul.f32 %v1183_v13, %v7295_v7  ;;  %v1187_v41 = vadd.f32 -0.5983973, %v1123_v61  ;;  %v1129_v33 = vmul.f32 %v1065_v37, %v7359_v27 }
 0x31b   : > { %v1128_v50 = vmul.f32 %v1064_v42, %v7363_v32  ;;  %v1307_v46 = vadd.f32 2.5499265, %v1243_v54  ;;  %v1249_v20 = vmul.f32 %v1185_v59, %v7304_v62  ;;  %v1189_v38 = vadd.f32 -0.5983973, %v1125_v25 }
 0x31c   : > { %v1130_v26 = vmul.f32 %v1066_v51, %v7369_v28  ;;  %v1309_v8 = vadd.f32 2.5499265, %v1245_v17  ;;  %v1308_v24 = vadd.f32 2.5499265, %v1244_v48  ;;  %v1248_v58 = vmul.f32 %v1184_v35, %v7313_v2 }
 0x31d   : > { %v1188_v9 = vadd.f32 -0.5983973, %v1124_v21  ;;  %v1310_v19 = vadd.f32 2.5499265, %v1246_v30  ;;  %v1250_v45 = vmul.f32 %v1186_v22, %v7320_v11  ;;  %v1190_v13 = vadd.f32 -0.5983973, %v1126_v60 }
 0x31e   : > { %v1191_v61 = vadd.f32 -0.5983973, %v1127_v29  ;;  %v1311_v3 = vadd.f32 2.5499265, %v1247_v0  ;;  %v1251_v37 = vmul.f32 %v1187_v41, %v7329_v49  ;;  %v1193_v42 = vadd.f32 -0.5983973, %v1129_v33 }
 0x31f   : > { %v1192_v54 = vadd.f32 -0.5983973, %v1128_v50  ;;  %v1371_v59 = vmul.f32 %v1307_v46, %v7269_v5  ;;  %v1313_v25 = vadd.f32 2.5499265, %v1249_v20  ;;  %v1253_v51 = vmul.f32 %v1189_v38, %v7338_v55 }
 0x320   : > { %v1194_v17 = vadd.f32 -0.5983973, %v1130_v26  ;;  %v1373_v48 = vmul.f32 %v1309_v8, %v7276_v6  ;;  %v1372_v35 = vmul.f32 %v1308_v24, %v7280_v40  ;;  %v1312_v21 = vadd.f32 2.5499265, %v1248_v58 }
 0x321   : > { %v1252_v30 = vmul.f32 %v1188_v9, %v7345_v47  ;;  %v1374_v22 = vmul.f32 %v1310_v19, %v7287_v43  ;;  %v1314_v60 = vadd.f32 2.5499265, %v1250_v45  ;;  %v1254_v29 = vmul.f32 %v1190_v13, %v7350_v10 }
 0x322   : > { %v1255_v0 = vmul.f32 %v1191_v61, %v7354_v56  ;;  %v1375_v41 = vmul.f32 %v1311_v3, %v7295_v7  ;;  %v1315_v33 = vadd.f32 2.5499265, %v1251_v37  ;;  %v1257_v50 = vmul.f32 %v1193_v42, %v7359_v27 }
 0x323   : > { %v1256_v46 = vmul.f32 %v1192_v54, %v7363_v32  ;;  %v1435_v20 = vadd.f32 -5.167685, %v1371_v59  ;;  %v1377_v38 = vmul.f32 %v1313_v25, %v7304_v62  ;;  %v1317_v26 = vadd.f32 2.5499265, %v1253_v51 }
 0x324   : > { %v1258_v8 = vmul.f32 %v1194_v17, %v7369_v28  ;;  %v1437_v24 = vadd.f32 -5.167685, %v1373_v48  ;;  %v1436_v58 = vadd.f32 -5.167685, %v1372_v35  ;;  %v1376_v9 = vmul.f32 %v1312_v21, %v7313_v2 }
 0x325   : > { %v1316_v19 = vadd.f32 2.5499265, %v1252_v30  ;;  %v1438_v45 = vadd.f32 -5.167685, %v1374_v22  ;;  %v1378_v13 = vmul.f32 %v1314_v60, %v7320_v11  ;;  %v1318_v61 = vadd.f32 2.5499265, %v1254_v29 }
 0x326   : > { %v1319_v3 = vadd.f32 2.5499265, %v1255_v0  ;;  %v1439_v37 = vadd.f32 -5.167685, %v1375_v41  ;;  %v1379_v42 = vmul.f32 %v1315_v33, %v7329_v49  ;;  %v1321_v54 = vadd.f32 2.5499265, %v1257_v50 }
 0x327   : > { %v1320_v59 = vadd.f32 2.5499265, %v1256_v46  ;;  %v1499_v25 = vmul.f32 %v1435_v20, %v7269_v5  ;;  %v1441_v51 = vadd.f32 -5.167685, %v1377_v38  ;;  %v1381_v17 = vmul.f32 %v1317_v26, %v7338_v55 }
 0x328   : > { %v1322_v48 = vadd.f32 2.5499265, %v1258_v8  ;;  %v1501_v35 = vmul.f32 %v1437_v24, %v7276_v6  ;;  %v1500_v21 = vmul.f32 %v1436_v58, %v7280_v40  ;;  %v1440_v30 = vadd.f32 -5.167685, %v1376_v9 }
 0x329   : > { %v1380_v22 = vmul.f32 %v1316_v19, %v7345_v47  ;;  %v1502_v60 = vmul.f32 %v1438_v45, %v7287_v43  ;;  %v1442_v29 = vadd.f32 -5.167685, %v1378_v13  ;;  %v1382_v0 = vmul.f32 %v1318_v61, %v7350_v10 }
 0x32a   : > { %v1383_v41 = vmul.f32 %v1319_v3, %v7354_v56  ;;  %v1503_v33 = vmul.f32 %v1439_v37, %v7295_v7  ;;  %v1443_v50 = vadd.f32 -5.167685, %v1379_v42  ;;  %v1385_v46 = vmul.f32 %v1321_v54, %v7359_v27 }
 0x32b   : > { %v1384_v20 = vmul.f32 %v1320_v59, %v7363_v32  ;;  %v1563_v38 = vadd.f32 3.1415918, %v1499_v25  ;;  %v1505_v26 = vmul.f32 %v1441_v51, %v7304_v62  ;;  %v1445_v8 = vadd.f32 -5.167685, %v1381_v17 }
 0x32c   : > { %v1386_v24 = vmul.f32 %v1322_v48, %v7369_v28  ;;  %v1565_v58 = vadd.f32 3.1415918, %v1501_v35  ;;  %v1564_v9 = vadd.f32 3.1415918, %v1500_v21  ;;  %v1504_v19 = vmul.f32 %v1440_v30, %v7313_v2 }
 0x32d   : > { %v1444_v45 = vadd.f32 -5.167685, %v1380_v22  ;;  %v1566_v13 = vadd.f32 3.1415918, %v1502_v60  ;;  %v1506_v61 = vmul.f32 %v1442_v29, %v7320_v11  ;;  %v1446_v3 = vadd.f32 -5.167685, %v1382_v0 }
 0x32e   : > { %v1447_v37 = vadd.f32 -5.167685, %v1383_v41  ;;  %v1567_v42 = vadd.f32 3.1415918, %v1503_v33  ;;  %v1507_v54 = vmul.f32 %v1443_v50, %v7329_v49  ;;  %v1449_v59 = vadd.f32 -5.167685, %v1385_v46 }
 0x32f   : > { %v1448_v25 = vadd.f32 -5.167685, %v1384_v20  ;;  %v7434_v51 = vmul.f32 %v1563_v38, %v7252_v52  ;;  %v1569_v17 = vadd.f32 3.1415918, %v1505_v26  ;;  %v1509_v48 = vmul.f32 %v1445_v8, %v7338_v55 }
 0x330   : > { %v1450_v35 = vadd.f32 -5.167685, %v1386_v24  ;;  %v7438_v21 = vmul.f32 %v1565_v58, %v7256_v15  ;;  %v7441_v30 = vmul.f32 %v1564_v9, %v7258_v36  ;;  %v1568_v22 = vadd.f32 3.1415918, %v1504_v19 }
 0x331   : > { %v1508_v60 = vmul.f32 %v1444_v45, %v7345_v47  ;;  %v7445_v29 = vmul.f32 %v1566_v13, %v7261_v12  ;;  %v1570_v0 = vadd.f32 3.1415918, %v1506_v61  ;;  %v1510_v52 = vmul.f32 %v1446_v3, %v7350_v10 }
 0x332   : > { %8545 = vst [vmem:[#allocation31_spill] sm:$0xff] %v7441_v30  ;;  %v1511_v41 = vmul.f32 %v1447_v37, %v7354_v56  ;;  %v7450_v33 = vmul.f32 %v1567_v42, %v7264_v53  ;;  %v1571_v50 = vadd.f32 3.1415918, %v1507_v54  ;;  %v1513_v15 = vmul.f32 %v1449_v59, %v7359_v27 }
 0x333   : > { %8546 = vst [vmem:[#allocation32_spill] sm:$0xff] %v7445_v29  ;;  %v1512_v36 = vmul.f32 %v1448_v25, %v7363_v32  ;;  %v7455_v46 = vmul.f32 %v1569_v17, %v7271_v44  ;;  %v1573_v20 = vadd.f32 3.1415918, %v1509_v48  ;;  %v1514_v12 = vmul.f32 %v1450_v35, %v7369_v28 }
 0x334   : > { %v1659_v38 = vmul.f32 -0.020783309, %v7269_v5  ;;  %v7460_v26 = vmul.f32 %v1568_v22, %v7282_v31  ;;  %v1572_v8 = vadd.f32 3.1415918, %v1508_v60  ;;  %v1661_v53 = vmul.f32 -0.020783309, %v7276_v6 }
 0x335   : > { %v1663_v24 = vmul.f32 -0.020783309, %v7295_v7  ;;  %v7465_v58 = vmul.f32 %v1570_v0, %v7289_v39  ;;  %v1574_v9 = vadd.f32 3.1415918, %v1510_v52  ;;  %v1575_v19 = vadd.f32 3.1415918, %v1511_v41 }
 0x336   : > { %8547 = vst [vmem:[#allocation34_spill] sm:$0xff] %v7460_v26  ;;  %v1665_v44 = vmul.f32 -0.020783309, %v7304_v62  ;;  %v7469_v45 = vmul.f32 %v1571_v50, %v7297_v18  ;;  %v1577_v13 = vadd.f32 3.1415918, %v1513_v15  ;;  %v7473_v3 = vmul.f32 %v1573_v20, %v7306_v1 }
 0x337   : > { %8548 = vst [vmem:[#allocation33_spill] sm:$0xff] %v7465_v58  ;;  %v1576_v61 = vadd.f32 3.1415918, %v1512_v36  ;;  %v1667_v31 = vmul.f32 -0.020783309, %v7329_v49  ;;  %v7479_v54 = vmul.f32 %v1572_v8, %v7315_v34  ;;  %v7483_v17 = vmul.f32 %v1574_v9, %v7322_v63 }
 0x338   : > { %v7475_v37 = vadd.f32 3.1415918, %v1514_v12  ;;  %v1691_v42 = vadd.f32 0.23012525, %v1659_v38  ;;  %v1669_v39 = vmul.f32 -0.020783309, %v7338_v55  ;;  %v7488_v22 = vmul.f32 %v1575_v19, %v7324_v57 }
 0x339   : > { %8549 = vst [vmem:[#allocation35_spill] sm:$0xff] %v7479_v54  ;;  %v1693_v59 = vadd.f32 0.23012525, %v1661_v53  ;;  %v1695_v25 = vadd.f32 0.23012525, %v1663_v24  ;;  %8550 = vst [vmem:[#allocation36_spill] sm:$0xff] %v7483_v17  ;;  %v7493_v52 = vmul.f32 %v1577_v13, %v7331_v16  ;;  %v7498_v15 = vmul.f32 %v1576_v61, %v7333_v23 }
 0x33a   : > { %v1671_v18 = vmul.f32 -0.020783309, %v7354_v56  ;;  %v1697_v48 = vadd.f32 0.23012525, %v1665_v44  ;;  %v1673_v35 = vmul.f32 -0.020783309, %v7359_v27  ;;  %v1723_v36 = vmul.f32 %v1691_v42, %v7269_v5 }
 0x33b   : > { %v1660_v1 = vmul.f32 -0.020783309, %v7280_v40  ;;  %v1699_v60 = vadd.f32 0.23012525, %v1667_v31  ;;  %v1664_v0 = vmul.f32 -0.020783309, %v7313_v2  ;;  %v1725_v12 = vmul.f32 %v1693_v59, %v7276_v6 }
 0x33c   : > { %v1662_v34 = vmul.f32 -0.020783309, %v7287_v43  ;;  %v1701_v41 = vadd.f32 0.23012525, %v1669_v39  ;;  %v1666_v63 = vmul.f32 -0.020783309, %v7320_v11  ;;  %v1727_v53 = vmul.f32 %v1695_v25, %v7295_v7 }
 0x33d   : > { %v1668_v50 = vmul.f32 -0.020783309, %v7345_v47  ;;  %8551 = vst [vmem:[#allocation37_spill] sm:$0xff] %v7498_v15  ;;  %v1703_v57 = vadd.f32 0.23012525, %v1671_v18  ;;  %v1729_v24 = vmul.f32 %v1697_v48, %v7304_v62  ;;  %v1731_v23 = vmul.f32 %v1699_v60, %v7329_v49 }
 0x33e   : > { %v1672_v20 = vmul.f32 -0.020783309, %v7363_v32  ;;  %v1705_v38 = vadd.f32 0.23012525, %v1673_v35  ;;  %v1692_v8 = vadd.f32 0.23012525, %v1660_v1  ;;  %v1733_v44 = vmul.f32 %v1701_v41, %v7338_v55 }
 0x33f   : > { %v1670_v16 = vmul.f32 -0.020783309, %v7350_v10  ;;  %v1696_v9 = vadd.f32 0.23012525, %v1664_v0  ;;  %v1694_v19 = vadd.f32 0.23012525, %v1662_v34  ;;  %v1735_v42 = vmul.f32 %v1703_v57, %v7354_v56 }
 0x340   : > { %v1698_v13 = vadd.f32 0.23012525, %v1666_v63  ;;  %v1700_v61 = vadd.f32 0.23012525, %v1668_v50  ;;  %v1755_v31 = vadd.f32 -1.3327482, %v1723_v36  ;;  %v1737_v35 = vmul.f32 %v1705_v38, %v7359_v27 }
 0x341   : > { %v1704_v39 = vadd.f32 0.23012525, %v1672_v20  ;;  %v1674_v59 = vmul.f32 -0.020783309, %v7369_v28  ;;  %v1757_v18 = vadd.f32 -1.3327482, %v1725_v12  ;;  %v1724_v25 = vmul.f32 %v1692_v8, %v7280_v40 }
 0x342   : > { %v1702_v48 = vadd.f32 0.23012525, %v1670_v16  ;;  %v1759_v1 = vadd.f32 -1.3327482, %v1727_v53  ;;  %v1761_v0 = vadd.f32 -1.3327482, %v1729_v24  ;;  %v1728_v60 = vmul.f32 %v1696_v9, %v7313_v2 }
 0x343   : > { %v1726_v34 = vmul.f32 %v1694_v19, %v7287_v43  ;;  %v1763_v41 = vadd.f32 -1.3327482, %v1731_v23  ;;  %v1765_v63 = vadd.f32 -1.3327482, %v1733_v44  ;;  %v1730_v50 = vmul.f32 %v1698_v13, %v7320_v11 }
 0x344   : > { %v1732_v36 = vmul.f32 %v1700_v61, %v7345_v47  ;;  %v1787_v57 = vmul.f32 %v1755_v31, %v7269_v5  ;;  %v1767_v20 = vadd.f32 -1.3327482, %v1735_v42  ;;  %v1736_v12 = vmul.f32 %v1704_v39, %v7363_v32 }
 0x345   : > { %v1706_v38 = vadd.f32 0.23012525, %v1674_v59  ;;  %v1789_v8 = vmul.f32 %v1757_v18, %v7276_v6  ;;  %v1769_v16 = vadd.f32 -1.3327482, %v1737_v35  ;;  %v1756_v53 = vadd.f32 -1.3327482, %v1724_v25 }
 0x346   : > { %v1734_v24 = vmul.f32 %v1702_v48, %v7350_v10  ;;  %v1791_v9 = vmul.f32 %v1759_v1, %v7295_v7  ;;  %v1793_v19 = vmul.f32 %v1761_v0, %v7304_v62  ;;  %v1760_v23 = vadd.f32 -1.3327482, %v1728_v60 }
 0x347   : > { %v1758_v44 = vadd.f32 -1.3327482, %v1726_v34  ;;  %v1795_v13 = vmul.f32 %v1763_v41, %v7329_v49  ;;  %v1797_v61 = vmul.f32 %v1765_v63, %v7338_v55  ;;  %v1762_v31 = vadd.f32 -1.3327482, %v1730_v50 }
 0x348   : > { %v1764_v42 = vadd.f32 -1.3327482, %v1732_v36  ;;  %v1819_v39 = vadd.f32 4.0581627, %v1787_v57  ;;  %v1799_v59 = vmul.f32 %v1767_v20, %v7354_v56  ;;  %v1768_v18 = vadd.f32 -1.3327482, %v1736_v12 }
 0x349   : > { %v1738_v35 = vmul.f32 %v1706_v38, %v7369_v28  ;;  %v1821_v25 = vadd.f32 4.0581627, %v1789_v8  ;;  %v1801_v48 = vmul.f32 %v1769_v16, %v7359_v27  ;;  %v1788_v1 = vmul.f32 %v1756_v53, %v7280_v40 }
 0x34a   : > { %v1766_v0 = vadd.f32 -1.3327482, %v1734_v24  ;;  %v1823_v60 = vadd.f32 4.0581627, %v1791_v9  ;;  %v1825_v34 = vadd.f32 4.0581627, %v1793_v19  ;;  %v1792_v41 = vmul.f32 %v1760_v23, %v7313_v2 }
 0x34b   : > { %v1790_v63 = vmul.f32 %v1758_v44, %v7287_v43  ;;  %v1827_v50 = vadd.f32 4.0581627, %v1795_v13  ;;  %v1829_v36 = vadd.f32 4.0581627, %v1797_v61  ;;  %v1794_v57 = vmul.f32 %v1762_v31, %v7320_v11 }
 0x34c   : > { %v1796_v20 = vmul.f32 %v1764_v42, %v7345_v47  ;;  %v1851_v12 = vmul.f32 %v1819_v39, %v7269_v5  ;;  %v1831_v38 = vadd.f32 4.0581627, %v1799_v59  ;;  %v1800_v8 = vmul.f32 %v1768_v18, %v7363_v32 }
 0x34d   : > { %v1770_v16 = vadd.f32 -1.3327482, %v1738_v35  ;;  %v1853_v53 = vmul.f32 %v1821_v25, %v7276_v6  ;;  %v1833_v24 = vadd.f32 4.0581627, %v1801_v48  ;;  %v1820_v9 = vadd.f32 4.0581627, %v1788_v1 }
 0x34e   : > { %v1798_v19 = vmul.f32 %v1766_v0, %v7350_v10  ;;  %v1855_v23 = vmul.f32 %v1823_v60, %v7295_v7  ;;  %v1857_v44 = vmul.f32 %v1825_v34, %v7304_v62  ;;  %v1824_v13 = vadd.f32 4.0581627, %v1792_v41 }
 0x34f   : > { %v1822_v61 = vadd.f32 4.0581627, %v1790_v63  ;;  %v1859_v31 = vmul.f32 %v1827_v50, %v7329_v49  ;;  %v1861_v42 = vmul.f32 %v1829_v36, %v7338_v55  ;;  %v1826_v39 = vadd.f32 4.0581627, %v1794_v57 }
 0x350   : > { %v1828_v59 = vadd.f32 4.0581627, %v1796_v20  ;;  %v1883_v18 = vadd.f32 -4.9347587, %v1851_v12  ;;  %v1863_v35 = vmul.f32 %v1831_v38, %v7354_v56  ;;  %v1832_v25 = vadd.f32 4.0581627, %v1800_v8 }
 0x351   : > { %v1802_v48 = vmul.f32 %v1770_v16, %v7369_v28  ;;  %v1885_v1 = vadd.f32 -4.9347587, %v1853_v53  ;;  %v1865_v0 = vmul.f32 %v1833_v24, %v7359_v27  ;;  %v1852_v60 = vmul.f32 %v1820_v9, %v7280_v40 }
 0x352   : > { %v1830_v34 = vadd.f32 4.0581627, %v1798_v19  ;;  %v1887_v41 = vadd.f32 -4.9347587, %v1855_v23  ;;  %v1889_v63 = vadd.f32 -4.9347587, %v1857_v44  ;;  %v1856_v50 = vmul.f32 %v1824_v13, %v7313_v2 }
 0x353   : > { %v1854_v36 = vmul.f32 %v1822_v61, %v7287_v43  ;;  %v1891_v57 = vadd.f32 -4.9347587, %v1859_v31  ;;  %v1893_v20 = vadd.f32 -4.9347587, %v1861_v42  ;;  %v1858_v12 = vmul.f32 %v1826_v39, %v7320_v11 }
 0x354   : > { %v1860_v38 = vmul.f32 %v1828_v59, %v7345_v47  ;;  %v1915_v8 = vmul.f32 %v1883_v18, %v7269_v5  ;;  %v1895_v16 = vadd.f32 -4.9347587, %v1863_v35  ;;  %v1864_v53 = vmul.f32 %v1832_v25, %v7363_v32 }
 0x355   : > { %v1834_v24 = vadd.f32 4.0581627, %v1802_v48  ;;  %v1917_v9 = vmul.f32 %v1885_v1, %v7276_v6  ;;  %v1897_v19 = vadd.f32 -4.9347587, %v1865_v0  ;;  %v1884_v23 = vadd.f32 -4.9347587, %v1852_v60 }
 0x356   : > { %v1862_v44 = vmul.f32 %v1830_v34, %v7350_v10  ;;  %v1919_v13 = vmul.f32 %v1887_v41, %v7295_v7  ;;  %v1921_v61 = vmul.f32 %v1889_v63, %v7304_v62  ;;  %v1888_v31 = vadd.f32 -4.9347587, %v1856_v50 }
 0x357   : > { %v1886_v42 = vadd.f32 -4.9347587, %v1854_v36  ;;  %v1923_v39 = vmul.f32 %v1891_v57, %v7329_v49  ;;  %v1925_v5 = vmul.f32 %v1893_v20, %v7338_v55  ;;  %v1890_v59 = vadd.f32 -4.9347587, %v1858_v12 }
 0x358   : > { %v1892_v18 = vadd.f32 -4.9347587, %v1860_v38  ;;  %v7556_v35 = vadd.f32 0.99999946, %v1915_v8  ;;  %v1927_v6 = vmul.f32 %v1895_v16, %v7354_v56  ;;  %v1896_v25 = vadd.f32 -4.9347587, %v1864_v53 }
 0x359   : > { %v1866_v48 = vmul.f32 %v1834_v24, %v7369_v28  ;;  %v7560_v1 = vadd.f32 0.99999946, %v1917_v9  ;;  %v1929_v7 = vmul.f32 %v1897_v19, %v7359_v27  ;;  %v1916_v62 = vmul.f32 %v1884_v23, %v7280_v40  ;;  %v2833_v27 = vpop.permute.xlu0 %2832 }
 0x35a   : > { %8552 = vst [vmem:[#allocation40_spill] sm:$0xff] %v7556_v35  ;;  %v1894_v0 = vadd.f32 -4.9347587, %v1862_v44  ;;  %v7564_v60 = vadd.f32 0.99999946, %v1919_v13  ;;  %v1920_v55 = vmul.f32 %v1888_v31, %v7313_v2  ;;  %v1918_v34 = vmul.f32 %v1886_v42, %v7287_v43  ;;  %v2838_v44 = vpop.permute.xlu1 %2837 }
 0x35b   : > { %8553 = vst [vmem:[#allocation38_spill] sm:$0xff] %v7560_v1  ;;  %v7566_v49 = vadd.f32 0.99999946, %v1921_v61  ;;  %v7570_v41 = vadd.f32 0.99999946, %v1923_v39  ;;  %v1922_v63 = vmul.f32 %v1890_v59, %v7320_v11  ;;  %v1924_v50 = vmul.f32 %v1892_v18, %v7345_v47 }
 0x35c   : > { %8554 = vst [vmem:[#allocation39_spill] sm:$0xff] %v7564_v60  ;;  %v7572_v56 = vadd.f32 0.99999946, %v1925_v5  ;;  %v7578_v40 = vmul.f32 %v7475_v37, %v7340_v14  ;;  %v7580_v57 = vadd.f32 0.99999946, %v1927_v6  ;;  %v1928_v2 = vmul.f32 %v1896_v25, %v7363_v32 }
 0x35d   : > { %8555 = vst [vmem:[#allocation41_spill] sm:$0xff] %v7566_v49  ;;  %8556 = vst [vmem:[#allocation2_spill] sm:$0xff] %v7570_v41  ;;  %v1898_v20 = vadd.f32 -4.9347587, %v1866_v48  ;;  %v7583_v8 = vadd.f32 0.99999946, %v1929_v7  ;;  %v1926_v11 = vmul.f32 %v1894_v0, %v7350_v10 }
 0x35e   : > { %8557 = vst [vmem:[#allocation3_spill] sm:$0xff] %v7572_v56  ;;  %8558 = vst [vmem:[#allocation4_spill] sm:$0xff] %v7578_v40  ;;  %v7585_v16 = vadd.f32 0.99999946, %v1916_v62  ;;  %v7588_v14 = vadd.f32 0.99999946, %v1920_v55 }
 0x35f   : > { %8559 = vst [vmem:[#allocation5_spill] sm:$0xff] %v7580_v57  ;;  %8560 = vst [vmem:[#allocation6_spill] sm:$0xff] %v7583_v8  ;;  %v7590_v37 = vadd.f32 0.99999946, %v1918_v34  ;;  %v7592_v32 = vadd.f32 0.99999946, %v1922_v63  ;;  %v7599_v10 = vmul.f32 %v1898_v20, %v7369_v28 }
 0x360   : > { %8561 = vst [vmem:[#allocation7_spill] sm:$0xff] %v7585_v16  ;;  %8562 = vst [vmem:[#allocation8_spill] sm:$0xff] %v7588_v14  ;;  %v7594_v23 = vadd.f32 0.99999946, %v1924_v50  ;;  %v7596_v42 = vadd.f32 0.99999946, %v1928_v2 }
 0x361   : > { %8563 = vst [vmem:[#allocation9_spill] sm:$0xff] %v7590_v37  ;;  %8564 = vst [vmem:[#allocation10_spill] sm:$0xff] %v7592_v32  ;;  %v7601_v25 = vadd.f32 0.99999946, %v1926_v11 }
 0x362   : > { %8565 = vst [vmem:[#allocation11_spill] sm:$0xff] %v7594_v23  ;;  %8566 = vst [vmem:[#allocation12_spill] sm:$0xff] %v7596_v42 }
 0x363   : > { %8567 = vst [vmem:[#allocation13_spill] sm:$0xff] %v7599_v10  ;;  %8568 = vst [vmem:[#allocation14_spill] sm:$0xff] %v7601_v25 }
 0x3c0   : > { %v2960_v36 = vpop.f32.mrb[48].mxu0 }
 0x3c1   : > { %v2961_v43 = vadd.f32 %v2960_v36, %v2833_v27  ;;  %v3073_v12 = vpop.f32.mrb[48].mxu1  ;;  %v2962_v38 = vpop.f32.mrb[49].mxu0 }
 0x3c2   : > { %v3074_v47 = vadd.f32 %v3073_v12, %v2833_v27  ;;  %v2963_v53 = vadd.f32 %v2962_v38, %v2833_v27  ;;  %v3075_v24 = vpop.f32.mrb[49].mxu1 }
 0x3c3   : > { %v3120_v9 = vadd.f32 0.5, %v2961_v43  ;;  %v3076_v19 = vadd.f32 %v3075_v24, %v2833_v27 }
 0x3c4   : > { %v3122_v13 = vadd.f32 0.5, %v3074_v47  ;;  %v3121_v61 = vadd.f32 0.5, %v2963_v53  ;;  %v2966_v31 = vpop.f32.mrb[50].mxu0 }
 0x3c5   : > { %v3152_v39 = vfloor.f32 %v3120_v9  ;;  %v3123_v5 = vadd.f32 0.5, %v3076_v19  ;;  %v2967_v59 = vadd.f32 %v2966_v31, %v2838_v44  ;;  %v3079_v18 = vpop.f32.mrb[50].mxu1  ;;  %v2968_v6 = vpop.f32.mrb[51].mxu0 }
 0x3c6   : > { %v3154_v48 = vfloor.f32 %v3122_v13  ;;  %v3153_v7 = vfloor.f32 %v3121_v61  ;;  %v3080_v62 = vadd.f32 %v3079_v18, %v2838_v44  ;;  %v2969_v0 = vadd.f32 %v2968_v6, %v2838_v44  ;;  %v3081_v55 = vpop.f32.mrb[51].mxu1 }
 0x3c7   : > { %v3184_v34 = vsub.f32 %v2961_v43, %v3152_v39  ;;  %v3155_v63 = vfloor.f32 %v3123_v5  ;;  %v3124_v50 = vadd.f32 0.5, %v2967_v59  ;;  %v3082_v27 = vadd.f32 %v3081_v55, %v2838_v44 }
 0x3c8   : > { %v3186_v36 = vsub.f32 %v3074_v47, %v3154_v48  ;;  %v3185_v2 = vsub.f32 %v2963_v53, %v3153_v7  ;;  %v3126_v28 = vadd.f32 0.5, %v3080_v62  ;;  %v3125_v20 = vadd.f32 0.5, %v2969_v0  ;;  %v2972_v12 = vpop.f32.mrb[52].mxu0 }
 0x3c9   : > { %v7603_v38 = vadd.f32 %v3184_v34, %v3184_v34  ;;  %v3187_v24 = vsub.f32 %v3076_v19, %v3155_v63  ;;  %v3156_v9 = vfloor.f32 %v3124_v50  ;;  %v3127_v11 = vadd.f32 0.5, %v3082_v27  ;;  %v7605_v31 = vpop.f32.mrb[52].mxu1  ;;  %v7607_v13 = vpop.f32.mrb[53].mxu0 }
 0x3ca   : > { %v7609_v61 = vadd.f32 %v3186_v36, %v3186_v36  ;;  %v7611_v43 = vadd.f32 %v3185_v2, %v3185_v2  ;;  %v3158_v39 = vfloor.f32 %v3126_v28  ;;  %v3157_v44 = vfloor.f32 %v3125_v20  ;;  %v7613_v47 = vpop.f32.mrb[53].mxu1 }
 0x3cb   : > { %v7617_v53 = vmul.f32 %v7603_v38, %v7603_v38  ;;  %v7619_v5 = vadd.f32 %v3187_v24, %v3187_v24  ;;  %v3188_v19 = vsub.f32 %v2967_v59, %v3156_v9  ;;  %v3159_v18 = vfloor.f32 %v3127_v11 }
 0x3cc   : > { %v7623_v6 = vmul.f32 %v7609_v61, %v7609_v61  ;;  %v7627_v48 = vmul.f32 %v7611_v43, %v7611_v43  ;;  %v3190_v7 = vsub.f32 %v3080_v62, %v3158_v39  ;;  %v3189_v55 = vsub.f32 %v2969_v0, %v3157_v44  ;;  %v7629_v34 = vpop.f32.mrb[54].mxu0 }
 0x3cd   : > { %v3280_v63 = vmul.f32 -0.006040975, %v7617_v53  ;;  %v7634_v50 = vmul.f32 %v7619_v5, %v7619_v5  ;;  %v7636_v59 = vadd.f32 %v3188_v19, %v3188_v19  ;;  %v3191_v36 = vsub.f32 %v3082_v27, %v3159_v18  ;;  %v7638_v2 = vpop.f32.mrb[54].mxu1  ;;  %v7640_v28 = vpop.f32.mrb[55].mxu0 }
 0x3ce   : > { %v3282_v20 = vmul.f32 -0.006040975, %v7623_v6  ;;  %v3281_v62 = vmul.f32 -0.006040975, %v7627_v48  ;;  %v7644_v0 = vadd.f32 %v3190_v7, %v3190_v7  ;;  %v7646_v24 = vadd.f32 %v3189_v55, %v3189_v55  ;;  %v7648_v9 = vpop.f32.mrb[55].mxu1 }
 0x3cf   : > { %v3312_v11 = vadd.f32 0.08060466, %v3280_v63  ;;  %v3283_v39 = vmul.f32 -0.006040975, %v7634_v50  ;;  %v7653_v27 = vmul.f32 %v7636_v59, %v7636_v59  ;;  %v7655_v44 = vadd.f32 %v3191_v36, %v3191_v36 }
 0x3d0   : > { %v3314_v19 = vadd.f32 0.08060466, %v3282_v20  ;;  %v3313_v18 = vadd.f32 0.08060466, %v3281_v62  ;;  %v7659_v4 = vmul.f32 %v7644_v0, %v7644_v0  ;;  %v7663_v7 = vmul.f32 %v7646_v24, %v7646_v24  ;;  %v7665_v55 = vpop.f32.mrb[56].mxu0 }
 0x3d1   : > { %v3344_v63 = vmul.f32 %v3312_v11, %v7617_v53  ;;  %v3315_v25 = vadd.f32 0.08060466, %v3283_v39  ;;  %v3284_v42 = vmul.f32 -0.006040975, %v7653_v27  ;;  %v7671_v36 = vmul.f32 %v7655_v44, %v7655_v44  ;;  %v7673_v20 = vpop.f32.mrb[56].mxu1  ;;  %v7675_v62 = vpop.f32.mrb[57].mxu0 }
 0x3d2   : > { %v3346_v23 = vmul.f32 %v3314_v19, %v7623_v6  ;;  %v3345_v10 = vmul.f32 %v3313_v18, %v7627_v48  ;;  %v3286_v32 = vmul.f32 -0.006040975, %v7659_v4  ;;  %v3285_v37 = vmul.f32 -0.006040975, %v7663_v7  ;;  %v7681_v11 = vpop.f32.mrb[57].mxu1  ;;  %v7683_v39 = vpop.permute.xlu0 %2842 }
 0x3d3   : > { %v3376_v14 = vadd.f32 -0.5983973, %v3344_v63  ;;  %v3347_v8 = vmul.f32 %v3315_v25, %v7634_v50  ;;  %v3316_v16 = vadd.f32 0.08060466, %v3284_v42  ;;  %v3287_v57 = vmul.f32 -0.006040975, %v7671_v36 }
 0x3d4   : > { %v3378_v40 = vadd.f32 -0.5983973, %v3346_v23  ;;  %v3377_v17 = vadd.f32 -0.5983973, %v3345_v10  ;;  %v3318_v15 = vadd.f32 0.08060466, %v3286_v32  ;;  %v7688_v19 = vadd.f32 %v2972_v12, %v7683_v39 }
 0x3d5   : > { %v3408_v18 = vmul.f32 %v3376_v14, %v7617_v53  ;;  %v3379_v54 = vadd.f32 -0.5983973, %v3347_v8  ;;  %v3348_v58 = vmul.f32 %v3316_v16, %v7653_v27  ;;  %v3317_v29 = vadd.f32 0.08060466, %v3285_v37  ;;  %v7692_v26 = vpop.f32.mrb[58].mxu0  ;;  %v7694_v63 = vpop.f32.mrb[58].mxu1 }
 0x3d6   : > { %v3410_v42 = vmul.f32 %v3378_v40, %v7623_v6  ;;  %v3409_v25 = vmul.f32 %v3377_v17, %v7627_v48  ;;  %v3350_v23 = vmul.f32 %v3318_v15, %v7659_v4  ;;  %v3319_v32 = vadd.f32 0.08060466, %v3287_v57  ;;  %v7699_v10 = vpop.f32.mrb[59].mxu0  ;;  %v7701_v12 = vpop.f32.mrb[59].mxu1 }
 0x3d7   : > { %v3440_v14 = vadd.f32 2.5499265, %v3408_v18  ;;  %v3411_v8 = vmul.f32 %v3379_v54, %v7634_v50  ;;  %v3380_v16 = vadd.f32 -0.5983973, %v3348_v58  ;;  %v3349_v37 = vmul.f32 %v3317_v29, %v7663_v7 }
 0x3d8   : > { %v3442_v30 = vadd.f32 2.5499265, %v3410_v42  ;;  %v3441_v56 = vadd.f32 2.5499265, %v3409_v25  ;;  %v3382_v41 = vadd.f32 -0.5983973, %v3350_v23  ;;  %v3351_v40 = vmul.f32 %v3319_v32, %v7671_v36 }
 0x3d9   : > { %v3472_v17 = vmul.f32 %v3440_v14, %v7617_v53  ;;  %v3443_v49 = vadd.f32 2.5499265, %v3411_v8  ;;  %v3412_v15 = vmul.f32 %v3380_v16, %v7653_v27  ;;  %v3381_v57 = vadd.f32 -0.5983973, %v3349_v37  ;;  %v7708_v60 = vpop.f32.mrb[60].mxu0  ;;  %v7710_v1 = vpop.f32.mrb[60].mxu1 }
 0x3da   : > { %8569 = vst [vmem:[#allocation15_spill] sm:$0xff] %v7710_v1  ;;  %v3474_v54 = vmul.f32 %v3442_v30, %v7623_v6  ;;  %v3473_v58 = vmul.f32 %v3441_v56, %v7627_v48  ;;  %v3414_v29 = vmul.f32 %v3382_v41, %v7659_v4  ;;  %v3383_v18 = vadd.f32 -0.5983973, %v3351_v40  ;;  %v7715_v42 = vpop.f32.mrb[61].mxu0  ;;  %v7717_v25 = vpop.f32.mrb[61].mxu1 }
 0x3db   : > { %8570 = vst [vmem:[#allocation16_spill] sm:$0xff] %v7715_v42  ;;  %8571 = vst [vmem:[#allocation17_spill] sm:$0xff] %v7717_v25  ;;  %v3504_v23 = vadd.f32 -5.167685, %v3472_v17  ;;  %v3475_v32 = vmul.f32 %v3443_v49, %v7634_v50  ;;  %v3444_v14 = vadd.f32 2.5499265, %v3412_v15  ;;  %v3413_v8 = vmul.f32 %v3381_v57, %v7663_v7 }
 0x3dc   : > { %v3506_v16 = vadd.f32 -5.167685, %v3474_v54  ;;  %v3505_v37 = vadd.f32 -5.167685, %v3473_v58  ;;  %v3446_v35 = vadd.f32 2.5499265, %v3414_v29  ;;  %v3415_v30 = vmul.f32 %v3383_v18, %v7671_v36 }
 0x3dd   : > { %v3536_v56 = vmul.f32 %v3504_v23, %v7617_v53  ;;  %v3507_v1 = vadd.f32 -5.167685, %v3475_v32  ;;  %v3476_v41 = vmul.f32 %v3444_v14, %v7653_v27  ;;  %v3445_v40 = vadd.f32 2.5499265, %v3413_v8  ;;  %v7724_v42 = vpop.f32.mrb[62].mxu0  ;;  %v7726_v25 = vpop.f32.mrb[62].mxu1 }
 0x3de   : > { %v3538_v49 = vmul.f32 %v3506_v16, %v7623_v6  ;;  %v3537_v17 = vmul.f32 %v3505_v37, %v7627_v48  ;;  %v3478_v15 = vmul.f32 %v3446_v35, %v7659_v4  ;;  %v3447_v57 = vadd.f32 2.5499265, %v3415_v30  ;;  %v7731_v54 = vpop.f32.mrb[63].mxu0  ;;  %v7733_v58 = vpop.f32.mrb[63].mxu1 }
 0x3df   : > { %v3568_v53 = vadd.f32 3.1415918, %v3536_v56  ;;  %v3539_v29 = vmul.f32 %v3507_v1, %v7634_v50  ;;  %v3508_v18 = vadd.f32 -5.167685, %v3476_v41  ;;  %v3477_v23 = vmul.f32 %v3445_v40, %v7663_v7 }
 0x3e0   : > { %v3570_v32 = vadd.f32 3.1415918, %v3538_v49  ;;  %v3569_v14 = vadd.f32 3.1415918, %v3537_v17  ;;  %v3510_v8 = vadd.f32 -5.167685, %v3478_v15  ;;  %v3479_v6 = vmul.f32 %v3447_v57, %v7671_v36 }
 0x3e1   : > { %v3600_v48 = vmul.f32 %v3568_v53, %v7603_v38  ;;  %v3571_v16 = vadd.f32 3.1415918, %v3539_v29  ;;  %v3540_v35 = vmul.f32 %v3508_v18, %v7653_v27  ;;  %v3509_v37 = vadd.f32 -5.167685, %v3477_v23  ;;  %v2848_v23 = vpop.permute.xlu1 %2847 }
 0x3e2   : > { %v3602_v30 = vmul.f32 %v3570_v32, %v7609_v61  ;;  %v7742_v56 = vmul.f32 %v3569_v14, %v7611_v43  ;;  %v3542_v1 = vmul.f32 %v3510_v8, %v7659_v4  ;;  %v3511_v50 = vadd.f32 -5.167685, %v3479_v6 }
 0x3e3   : > { %v7746_v41 = vadd.f32 %v3600_v48, %v7434_v51  ;;  %v7749_v40 = vmul.f32 %v3571_v16, %v7619_v5  ;;  %v3572_v49 = vadd.f32 3.1415918, %v3540_v35  ;;  %v3541_v38 = vmul.f32 %v3509_v37, %v7663_v7 }
 0x3e4   : > { %v7753_v27 = vadd.f32 %v3602_v30, %v7438_v21  ;;  %v3574_v17 = vadd.f32 3.1415918, %v3542_v1  ;;  %v3543_v61 = vmul.f32 %v3511_v50, %v7671_v36  ;;  %v3128_v43 = vadd.f32 0.5, %v7688_v19 }
 0x3e5   : > { %v3604_v4 = vmul.f32 %v3572_v49, %v7636_v59  ;;  %v3573_v15 = vadd.f32 3.1415918, %v3541_v38  ;;  %v3086_v51 = vadd.f32 %v7605_v31, %v7683_v39  ;;  %v2975_v5 = vadd.f32 %v7607_v13, %v7683_v39 }
 0x3e6   : > { %v3606_v57 = vmul.f32 %v3574_v17, %v7644_v0  ;;  %v3575_v7 = vadd.f32 3.1415918, %v3543_v61  ;;  %v3160_v53 = vfloor.f32 %v3128_v43  ;;  %v3088_v21 = vadd.f32 %v7613_v47, %v7683_v39 }
 0x3e7   : > { %v7766_v36 = vadd.f32 %v3604_v4, %v7450_v33  ;;  %v7769_v29 = vmul.f32 %v3573_v15, %v7646_v24  ;;  %v3130_v59 = vadd.f32 0.5, %v3086_v51  ;;  %v3129_v18 = vadd.f32 0.5, %v2975_v5 }
 0x3e8   : > { %v7772_v31 = vadd.f32 %v3606_v57, %v7455_v46  ;;  %v7775_v13 = vmul.f32 %v3575_v7, %v7655_v44  ;;  %v3192_v0 = vsub.f32 %v7688_v19, %v3160_v53  ;;  %v3131_v32 = vadd.f32 0.5, %v3088_v21 }
 0x3e9   : > { %v3162_v14 = vfloor.f32 %v3130_v59  ;;  %v3161_v47 = vfloor.f32 %v3129_v18  ;;  %v2979_v33 = vadd.f32 %v7629_v34, %v2848_v23  ;;  %v3092_v39 = vadd.f32 %v7638_v2, %v2848_v23 }
 0x3ea   : > { %v7780_v24 = vadd.f32 %v3192_v0, %v3192_v0  ;;  %v3163_v8 = vfloor.f32 %v3131_v32  ;;  %v2981_v6 = vadd.f32 %v7640_v28, %v2848_v23  ;;  %v3094_v46 = vadd.f32 %v7648_v9, %v2848_v23 }
 0x3eb   : > { %v3194_v48 = vsub.f32 %v3086_v51, %v3162_v14  ;;  %v3193_v16 = vsub.f32 %v2975_v5, %v3161_v47  ;;  %v3132_v44 = vadd.f32 0.5, %v2979_v33  ;;  %v3134_v35 = vadd.f32 0.5, %v3092_v39 }
 0x3ec   : > { %v7786_v19 = vmul.f32 %v7780_v24, %v7780_v24  ;;  %v3195_v37 = vsub.f32 %v3088_v21, %v3163_v8  ;;  %v3133_v30 = vadd.f32 0.5, %v2981_v6  ;;  %v3135_v34 = vadd.f32 0.5, %v3094_v46 }
 0x3ed   : > { %v7788_v1 = vadd.f32 %v3194_v48, %v3194_v48  ;;  %v7790_v2 = vadd.f32 %v3193_v16, %v3193_v16  ;;  %v3164_v50 = vfloor.f32 %v3132_v44  ;;  %v3166_v49 = vfloor.f32 %v3134_v35 }
 0x3ee   : > { %v3288_v28 = vmul.f32 -0.006040975, %v7786_v19  ;;  %v7793_v9 = vadd.f32 %v3195_v37, %v3195_v37  ;;  %v3165_v38 = vfloor.f32 %v3133_v30  ;;  %v3167_v17 = vfloor.f32 %v3135_v34  ;;  %v7839_v34 = vpop.permute.xlu0 %2852 }
 0x3ef   : > { %v7797_v61 = vmul.f32 %v7788_v1, %v7788_v1  ;;  %v7801_v43 = vmul.f32 %v7790_v2, %v7790_v2  ;;  %v3196_v4 = vsub.f32 %v2979_v33, %v3164_v50  ;;  %v3198_v15 = vsub.f32 %v3092_v39, %v3166_v49 }
 0x3f0   : > { %v3320_v51 = vadd.f32 0.08060466, %v3288_v28  ;;  %v7805_v5 = vmul.f32 %v7793_v9, %v7793_v9  ;;  %v3197_v57 = vsub.f32 %v2981_v6, %v3165_v38  ;;  %v3199_v7 = vsub.f32 %v3094_v46, %v3167_v17 }
 0x3f1   : > { %v3290_v53 = vmul.f32 -0.006040975, %v7797_v61  ;;  %v3289_v21 = vmul.f32 -0.006040975, %v7801_v43  ;;  %v7809_v59 = vadd.f32 %v3196_v4, %v3196_v4  ;;  %v7811_v18 = vadd.f32 %v3198_v15, %v3198_v15 }
 0x3f2   : > { %v3352_v23 = vmul.f32 %v3320_v51, %v7786_v19  ;;  %v3291_v0 = vmul.f32 -0.006040975, %v7805_v5  ;;  %v7815_v32 = vadd.f32 %v3197_v57, %v3197_v57  ;;  %v7817_v14 = vadd.f32 %v3199_v7, %v3199_v7 }
 0x3f3   : > { %v3322_v47 = vadd.f32 0.08060466, %v3290_v53  ;;  %v3321_v33 = vadd.f32 0.08060466, %v3289_v21  ;;  %v7821_v39 = vmul.f32 %v7809_v59, %v7809_v59  ;;  %v7825_v8 = vmul.f32 %v7811_v18, %v7811_v18 }
 0x3f4   : > { %v3384_v6 = vadd.f32 -0.5983973, %v3352_v23  ;;  %v3323_v46 = vadd.f32 0.08060466, %v3291_v0  ;;  %v7829_v48 = vmul.f32 %v7815_v32, %v7815_v32  ;;  %v7833_v16 = vmul.f32 %v7817_v14, %v7817_v14 }
 0x3f5   : > { %v3354_v44 = vmul.f32 %v3322_v47, %v7797_v61  ;;  %v3353_v35 = vmul.f32 %v3321_v33, %v7801_v43  ;;  %v3292_v37 = vmul.f32 -0.006040975, %v7821_v39  ;;  %v3294_v30 = vmul.f32 -0.006040975, %v7825_v8 }
 0x3f6   : > { %v3416_v50 = vmul.f32 %v3384_v6, %v7786_v19  ;;  %v3355_v49 = vmul.f32 %v3323_v46, %v7805_v5  ;;  %v3293_v28 = vmul.f32 -0.006040975, %v7829_v48  ;;  %v3295_v38 = vmul.f32 -0.006040975, %v7833_v16 }
 0x3f7   : > { %v3386_v17 = vadd.f32 -0.5983973, %v3354_v44  ;;  %v3385_v4 = vadd.f32 -0.5983973, %v3353_v35  ;;  %v3324_v15 = vadd.f32 0.08060466, %v3292_v37  ;;  %v7847_v51 = vadd.f32 %v7665_v55, %v7839_v34 }
 0x3f8   : > { %v3448_v57 = vadd.f32 2.5499265, %v3416_v50  ;;  %v3387_v7 = vadd.f32 -0.5983973, %v3355_v49  ;;  %v3326_v53 = vadd.f32 0.08060466, %v3294_v30  ;;  %v7851_v21 = vadd.f32 %v7673_v20, %v7839_v34 }
 0x3f9   : > { %v3418_v23 = vmul.f32 %v3386_v17, %v7797_v61  ;;  %v3417_v0 = vmul.f32 %v3385_v4, %v7801_v43  ;;  %v3356_v47 = vmul.f32 %v3324_v15, %v7821_v39  ;;  %v3325_v33 = vadd.f32 0.08060466, %v3293_v28 }
 0x3fa   : > { %v3480_v6 = vmul.f32 %v3448_v57, %v7786_v19  ;;  %v3419_v46 = vmul.f32 %v3387_v7, %v7805_v5  ;;  %v3358_v55 = vmul.f32 %v3326_v53, %v7825_v8  ;;  %v3327_v44 = vadd.f32 0.08060466, %v3295_v38 }
 0x3fb   : > { %v3450_v35 = vadd.f32 2.5499265, %v3418_v23  ;;  %v3449_v37 = vadd.f32 2.5499265, %v3417_v0  ;;  %v3388_v30 = vadd.f32 -0.5983973, %v3356_v47  ;;  %v3357_v20 = vmul.f32 %v3325_v33, %v7829_v48 }
 0x3fc   : > { %v3512_v50 = vadd.f32 -5.167685, %v3480_v6  ;;  %v3451_v49 = vadd.f32 2.5499265, %v3419_v46  ;;  %v3390_v17 = vadd.f32 -0.5983973, %v3358_v55  ;;  %v3359_v4 = vmul.f32 %v3327_v44, %v7833_v16 }
 0x3fd   : > { %v3482_v15 = vmul.f32 %v3450_v35, %v7797_v61  ;;  %v3481_v28 = vmul.f32 %v3449_v37, %v7801_v43  ;;  %v3420_v57 = vmul.f32 %v3388_v30, %v7821_v39  ;;  %v3389_v7 = vadd.f32 -0.5983973, %v3357_v20 }
 0x3fe   : > { %v3544_v53 = vmul.f32 %v3512_v50, %v7786_v19  ;;  %v3483_v38 = vmul.f32 %v3451_v49, %v7805_v5  ;;  %v3422_v23 = vmul.f32 %v3390_v17, %v7825_v8  ;;  %v3391_v0 = vadd.f32 -0.5983973, %v3359_v4 }
 0x3ff   : > { %v3514_v47 = vadd.f32 -5.167685, %v3482_v15  ;;  %v3513_v33 = vadd.f32 -5.167685, %v3481_v28  ;;  %v3452_v6 = vadd.f32 2.5499265, %v3420_v57  ;;  %v3421_v46 = vmul.f32 %v3389_v7, %v7829_v48 }
 0x400   : > { %v3576_v55 = vadd.f32 3.1415918, %v3544_v53  ;;  %v3515_v44 = vadd.f32 -5.167685, %v3483_v38  ;;  %v3454_v35 = vadd.f32 2.5499265, %v3422_v23  ;;  %v3423_v37 = vmul.f32 %v3391_v0, %v7833_v16 }
 0x401   : > { %v3546_v30 = vmul.f32 %v3514_v47, %v7797_v61  ;;  %v3545_v20 = vmul.f32 %v3513_v33, %v7801_v43  ;;  %v3484_v19 = vmul.f32 %v3452_v6, %v7821_v39  ;;  %v3453_v50 = vadd.f32 2.5499265, %v3421_v46 }
 0x402   : > { %v3608_v49 = vmul.f32 %v3576_v55, %v7780_v24  ;;  %v3547_v17 = vmul.f32 %v3515_v44, %v7805_v5  ;;  %v3486_v4 = vmul.f32 %v3454_v35, %v7825_v8  ;;  %v3455_v15 = vadd.f32 2.5499265, %v3423_v37 }
 0x403   : > { %v3578_v28 = vadd.f32 3.1415918, %v3546_v30  ;;  %v3577_v57 = vadd.f32 3.1415918, %v3545_v20  ;;  %v3516_v7 = vadd.f32 -5.167685, %v3484_v19  ;;  %v3485_v53 = vmul.f32 %v3453_v50, %v7829_v48 }
 0x404   : > { %v7877_v38 = vadd.f32 %v3608_v49, %v7469_v45  ;;  %v3579_v61 = vadd.f32 3.1415918, %v3547_v17  ;;  %v3518_v43 = vadd.f32 -5.167685, %v3486_v4  ;;  %v3487_v23 = vmul.f32 %v3455_v15, %v7833_v16  ;;  %v2858_v4 = vpop.permute.xlu1 %2857 }
 0x405   : > { %v3610_v0 = vmul.f32 %v3578_v28, %v7788_v1  ;;  %v7882_v24 = vmul.f32 %v3577_v57, %v7790_v2  ;;  %v3548_v5 = vmul.f32 %v3516_v7, %v7821_v39  ;;  %v3517_v47 = vadd.f32 -5.167685, %v3485_v53 }
 0x406   : > { %v7886_v33 = vmul.f32 %v3579_v61, %v7793_v9  ;;  %v3550_v6 = vmul.f32 %v3518_v43, %v7825_v8  ;;  %v3519_v46 = vadd.f32 -5.167685, %v3487_v23  ;;  %v3136_v45 = vadd.f32 0.5, %v7847_v51 }
 0x407   : > { %v7891_v55 = vadd.f32 %v3610_v0, %v7473_v3  ;;  %v3580_v44 = vadd.f32 3.1415918, %v3548_v5  ;;  %v3549_v1 = vmul.f32 %v3517_v47, %v7829_v48  ;;  %v3138_v2 = vadd.f32 0.5, %v7851_v21 }
 0x408   : > { %v3582_v35 = vadd.f32 3.1415918, %v3550_v6  ;;  %v3551_v39 = vmul.f32 %v3519_v46, %v7833_v16  ;;  %v3168_v37 = vfloor.f32 %v3136_v45  ;;  %v2987_v9 = vadd.f32 %v7675_v62, %v7839_v34 }
 0x409   : > { %v3612_v8 = vmul.f32 %v3580_v44, %v7809_v59  ;;  %v3581_v30 = vadd.f32 3.1415918, %v3549_v1  ;;  %v3170_v20 = vfloor.f32 %v3138_v2  ;;  %v3100_v3 = vadd.f32 %v7681_v11, %v7839_v34 }
 0x40a   : > { %v3614_v19 = vmul.f32 %v3582_v35, %v7811_v18  ;;  %v3583_v50 = vadd.f32 3.1415918, %v3551_v39  ;;  %v3200_v48 = vsub.f32 %v7847_v51, %v3168_v37  ;;  %v3137_v49 = vadd.f32 0.5, %v2987_v9 }
 0x40b   : > { %v7904_v17 = vadd.f32 %v3612_v8, %v7488_v22  ;;  %v7907_v16 = vmul.f32 %v3581_v30, %v7815_v32  ;;  %v3202_v62 = vsub.f32 %v7851_v21, %v3170_v20  ;;  %v3139_v59 = vadd.f32 0.5, %v3100_v3 }
 0x40c   : > { %v7911_v15 = vadd.f32 %v3614_v19, %v7493_v52  ;;  %v7914_v11 = vmul.f32 %v3583_v50, %v7817_v14  ;;  %v7916_v18 = vadd.f32 %v3200_v48, %v3200_v48  ;;  %v3169_v34 = vfloor.f32 %v3137_v49 }
 0x40d   : > { %v7918_v51 = vadd.f32 %v3202_v62, %v3202_v62  ;;  %v3171_v22 = vfloor.f32 %v3139_v59  ;;  %v2991_v28 = vadd.f32 %v7692_v26, %v2858_v4  ;;  %v3104_v32 = vadd.f32 %v7694_v63, %v2858_v4 }
 0x40e   : > { %v7924_v21 = vmul.f32 %v7916_v18, %v7916_v18  ;;  %v3201_v57 = vsub.f32 %v2987_v9, %v3169_v34  ;;  %v2993_v52 = vadd.f32 %v7699_v10, %v2858_v4  ;;  %v3106_v14 = vadd.f32 %v7701_v12, %v2858_v4 }
 0x40f   : > { %v7930_v7 = vmul.f32 %v7918_v51, %v7918_v51  ;;  %v3203_v53 = vsub.f32 %v3100_v3, %v3171_v22  ;;  %v3140_v61 = vadd.f32 0.5, %v2991_v28  ;;  %v3142_v43 = vadd.f32 0.5, %v3104_v32 }
 0x410   : > { %v3296_v26 = vmul.f32 -0.006040975, %v7924_v21  ;;  %v7933_v23 = vadd.f32 %v3201_v57, %v3201_v57  ;;  %v3141_v63 = vadd.f32 0.5, %v2993_v52  ;;  %v3143_v0 = vadd.f32 0.5, %v3106_v14 }
 0x411   : > { %v3298_v5 = vmul.f32 -0.006040975, %v7930_v7  ;;  %v7936_v47 = vadd.f32 %v3203_v53, %v3203_v53  ;;  %v3172_v10 = vfloor.f32 %v3140_v61  ;;  %v3174_v6 = vfloor.f32 %v3142_v43  ;;  %v7976_v53 = vpop.permute.xlu0 %2862 }
 0x412   : > { %v3328_v12 = vadd.f32 0.08060466, %v3296_v26  ;;  %v7940_v46 = vmul.f32 %v7933_v23, %v7933_v23  ;;  %v3173_v45 = vfloor.f32 %v3141_v63  ;;  %v3175_v44 = vfloor.f32 %v3143_v0 }
 0x413   : > { %v3330_v1 = vadd.f32 0.08060466, %v3298_v5  ;;  %v7944_v2 = vmul.f32 %v7936_v47, %v7936_v47  ;;  %v3204_v35 = vsub.f32 %v2991_v28, %v3172_v10  ;;  %v3206_v39 = vsub.f32 %v3104_v32, %v3174_v6 }
 0x414   : > { %v3360_v37 = vmul.f32 %v3328_v12, %v7924_v21  ;;  %v3297_v9 = vmul.f32 -0.006040975, %v7940_v46  ;;  %v3205_v8 = vsub.f32 %v2993_v52, %v3173_v45  ;;  %v3207_v30 = vsub.f32 %v3106_v14, %v3175_v44 }
 0x415   : > { %v3362_v20 = vmul.f32 %v3330_v1, %v7930_v7  ;;  %v3299_v3 = vmul.f32 -0.006040975, %v7944_v2  ;;  %v7950_v19 = vadd.f32 %v3204_v35, %v3204_v35  ;;  %v7952_v50 = vadd.f32 %v3206_v39, %v3206_v39  ;;  %v8572_v1 = vld [vmem:[#allocation15_spill] sm:$0xff] }
 0x416   : > { %v3392_v48 = vadd.f32 -0.5983973, %v3360_v37  ;;  %v3329_v49 = vadd.f32 0.08060466, %v3297_v9  ;;  %v7954_v62 = vadd.f32 %v3205_v8, %v3205_v8  ;;  %v7956_v59 = vadd.f32 %v3207_v30, %v3207_v30 }
 0x417   : > { %v3394_v4 = vadd.f32 -0.5983973, %v3362_v20  ;;  %v3331_v34 = vadd.f32 0.08060466, %v3299_v3  ;;  %v7960_v22 = vmul.f32 %v7950_v19, %v7950_v19  ;;  %v7964_v28 = vmul.f32 %v7952_v50, %v7952_v50 }
 0x418   : > { %v3424_v32 = vmul.f32 %v3392_v48, %v7924_v21  ;;  %v3361_v57 = vmul.f32 %v3329_v49, %v7940_v46  ;;  %v7970_v52 = vmul.f32 %v7954_v62, %v7954_v62  ;;  %v7974_v14 = vmul.f32 %v7956_v59, %v7956_v59 }
 0x419   : > { %v3426_v61 = vmul.f32 %v3394_v4, %v7930_v7  ;;  %v3363_v43 = vmul.f32 %v3331_v34, %v7944_v2  ;;  %v3300_v26 = vmul.f32 -0.006040975, %v7960_v22  ;;  %v3302_v63 = vmul.f32 -0.006040975, %v7964_v28 }
 0x41a   : > { %v3456_v0 = vadd.f32 2.5499265, %v3424_v32  ;;  %v3393_v5 = vadd.f32 -0.5983973, %v3361_v57  ;;  %v3301_v10 = vmul.f32 -0.006040975, %v7970_v52  ;;  %v7985_v6 = vadd.f32 %v7708_v60, %v7976_v53 }
 0x41b   : > { %v3458_v12 = vadd.f32 2.5499265, %v3426_v61  ;;  %v3395_v45 = vadd.f32 -0.5983973, %v3363_v43  ;;  %v3332_v44 = vadd.f32 0.08060466, %v3300_v26  ;;  %v7989_v35 = vadd.f32 %v8572_v1, %v7976_v53 }
 0x41c   : > { %v3488_v39 = vmul.f32 %v3456_v0, %v7924_v21  ;;  %v3425_v37 = vmul.f32 %v3393_v5, %v7940_v46  ;;  %v3334_v9 = vadd.f32 0.08060466, %v3302_v63  ;;  %v3333_v8 = vadd.f32 0.08060466, %v3301_v10  ;;  %v8573_v43 = vld [vmem:[#allocation16_spill] sm:$0xff] }
 0x41d   : > { %v3490_v30 = vmul.f32 %v3458_v12, %v7930_v7  ;;  %v3427_v20 = vmul.f32 %v3395_v45, %v7944_v2  ;;  %v3364_v60 = vmul.f32 %v3332_v44, %v7960_v22  ;;  %v3303_v3 = vmul.f32 -0.006040975, %v7974_v14 }
 0x41e   : > { %v3520_v48 = vadd.f32 -5.167685, %v3488_v39  ;;  %v3457_v49 = vadd.f32 2.5499265, %v3425_v37  ;;  %v3366_v4 = vmul.f32 %v3334_v9, %v7964_v28  ;;  %v3365_v34 = vmul.f32 %v3333_v8, %v7970_v52 }
 0x41f   : > { %v3522_v32 = vadd.f32 -5.167685, %v3490_v30  ;;  %v3459_v57 = vadd.f32 2.5499265, %v3427_v20  ;;  %v3396_v61 = vadd.f32 -0.5983973, %v3364_v60  ;;  %v2999_v26 = vadd.f32 %v8573_v43, %v7976_v53 }
 0x420   : > { %v3552_v63 = vmul.f32 %v3520_v48, %v7924_v21  ;;  %v3489_v0 = vmul.f32 %v3457_v49, %v7940_v46  ;;  %v3398_v5 = vadd.f32 -0.5983973, %v3366_v4  ;;  %v3397_v10 = vadd.f32 -0.5983973, %v3365_v34 }
 0x421   : > { %v3554_v12 = vmul.f32 %v3522_v32, %v7930_v7  ;;  %v3491_v45 = vmul.f32 %v3459_v57, %v7944_v2  ;;  %v3428_v44 = vmul.f32 %v3396_v61, %v7960_v22  ;;  %v3335_v1 = vadd.f32 0.08060466, %v3303_v3  ;;  %v8574_v61 = vld [vmem:[#allocation40_spill] sm:$0xff] }
 0x422   : > { %v3584_v39 = vadd.f32 3.1415918, %v3552_v63  ;;  %v3521_v37 = vadd.f32 -5.167685, %v3489_v0  ;;  %v3430_v9 = vmul.f32 %v3398_v5, %v7964_v28  ;;  %v3429_v8 = vmul.f32 %v3397_v10, %v7970_v52 }
 0x423   : > { %v3586_v30 = vadd.f32 3.1415918, %v3554_v12  ;;  %v3523_v20 = vadd.f32 -5.167685, %v3491_v45  ;;  %v3460_v21 = vadd.f32 2.5499265, %v3428_v44  ;;  %v3367_v60 = vmul.f32 %v3335_v1, %v7974_v14 }
 0x424   : > { %v3616_v48 = vmul.f32 %v3584_v39, %v7916_v18  ;;  %v3553_v7 = vmul.f32 %v3521_v37, %v7940_v46  ;;  %v3462_v49 = vadd.f32 2.5499265, %v3430_v9  ;;  %v3461_v4 = vadd.f32 2.5499265, %v3429_v8  ;;  %v8575_v18 = vld [vmem:[#allocation38_spill] sm:$0xff] }
 0x425   : > { %v3618_v34 = vmul.f32 %v3586_v30, %v7918_v51  ;;  %v3555_v3 = vmul.f32 %v3523_v20, %v7944_v2  ;;  %v3492_v32 = vmul.f32 %v3460_v21, %v7960_v22  ;;  %v3399_v57 = vadd.f32 -0.5983973, %v3367_v60 }
 0x426   : > { %v8015_v43 = vadd.f32 %v3616_v48, %v8574_v61  ;;  %v3585_v63 = vadd.f32 3.1415918, %v3553_v7  ;;  %v3494_v0 = vmul.f32 %v3462_v49, %v7964_v28  ;;  %v3493_v5 = vmul.f32 %v3461_v4, %v7970_v52  ;;  %v8576_v49 = vld [vmem:[#allocation17_spill] sm:$0xff] }
 0x427   : > { %v8020_v10 = vadd.f32 %v3618_v34, %v8575_v18  ;;  %v3587_v46 = vadd.f32 3.1415918, %v3555_v3  ;;  %v3524_v12 = vadd.f32 -5.167685, %v3492_v32  ;;  %v3431_v51 = vmul.f32 %v3399_v57, %v7974_v14  ;;  %v8577_v18 = vld [vmem:[#allocation39_spill] sm:$0xff] }
 0x428   : > { %v8024_v2 = vmul.f32 %v3585_v63, %v7933_v23  ;;  %v3526_v45 = vadd.f32 -5.167685, %v3494_v0  ;;  %v3525_v44 = vadd.f32 -5.167685, %v3493_v5  ;;  %v3144_v1 = vadd.f32 0.5, %v7985_v6 }
 0x429   : > { %v8028_v39 = vmul.f32 %v3587_v46, %v7936_v47  ;;  %v3556_v37 = vmul.f32 %v3524_v12, %v7960_v22  ;;  %v3463_v9 = vadd.f32 2.5499265, %v3431_v51  ;;  %v3146_v8 = vadd.f32 0.5, %v7989_v35  ;;  %v8578_v51 = vld [vmem:[#allocation41_spill] sm:$0xff] }
 0x42a   : > { %v3558_v30 = vmul.f32 %v3526_v45, %v7964_v28  ;;  %v3557_v20 = vmul.f32 %v3525_v44, %v7970_v52  ;;  %v3176_v21 = vfloor.f32 %v3144_v1  ;;  %v3145_v60 = vadd.f32 0.5, %v2999_v26 }
 0x42b   : > { %v3588_v23 = vadd.f32 3.1415918, %v3556_v37  ;;  %v3495_v48 = vmul.f32 %v3463_v9, %v7974_v14  ;;  %v3178_v7 = vfloor.f32 %v3146_v8  ;;  %v3112_v4 = vadd.f32 %v8576_v49, %v7976_v53  ;;  %v2868_v53 = vpop.permute.xlu1 %2867 }
 0x42c   : > { %v3590_v47 = vadd.f32 3.1415918, %v3558_v30  ;;  %v3589_v34 = vadd.f32 3.1415918, %v3557_v20  ;;  %v3208_v22 = vsub.f32 %v7985_v6, %v3176_v21  ;;  %v3177_v3 = vfloor.f32 %v3145_v60 }
 0x42d   : > { %v3620_v32 = vmul.f32 %v3588_v23, %v7950_v19  ;;  %v3527_v57 = vadd.f32 -5.167685, %v3495_v48  ;;  %v3210_v28 = vsub.f32 %v7989_v35, %v3178_v7  ;;  %v3147_v52 = vadd.f32 0.5, %v3112_v4 }
 0x42e   : > { %v3622_v61 = vmul.f32 %v3590_v47, %v7952_v50  ;;  %v8042_v63 = vmul.f32 %v3589_v34, %v7954_v62  ;;  %v8044_v0 = vadd.f32 %v3208_v22, %v3208_v22  ;;  %v3209_v5 = vsub.f32 %v2999_v26, %v3177_v3 }
 0x42f   : > { %v8047_v46 = vadd.f32 %v3620_v32, %v8577_v18  ;;  %v3559_v6 = vmul.f32 %v3527_v57, %v7974_v14  ;;  %v8050_v12 = vadd.f32 %v3210_v28, %v3210_v28  ;;  %v3179_v19 = vfloor.f32 %v3147_v52 }
 0x430   : > { %v8053_v35 = vadd.f32 %v3622_v61, %v8578_v51  ;;  %v8057_v50 = vmul.f32 %v8044_v0, %v8044_v0  ;;  %v8059_v62 = vadd.f32 %v3209_v5, %v3209_v5  ;;  %v3003_v26 = vadd.f32 %v7724_v42, %v2868_v53 }
 0x431   : > { %v3591_v45 = vadd.f32 3.1415918, %v3559_v6  ;;  %v8064_v44 = vmul.f32 %v8050_v12, %v8050_v12  ;;  %v3211_v14 = vsub.f32 %v3112_v4, %v3179_v19  ;;  %v3116_v1 = vadd.f32 %v7726_v25, %v2868_v53 }
 0x432   : > { %v3304_v37 = vmul.f32 -0.006040975, %v8057_v50  ;;  %v8070_v9 = vmul.f32 %v8059_v62, %v8059_v62  ;;  %v3148_v8 = vadd.f32 0.5, %v3003_v26  ;;  %v3005_v30 = vadd.f32 %v7731_v54, %v2868_v53 }
 0x433   : > { %v8074_v20 = vmul.f32 %v3591_v45, %v7956_v59  ;;  %v3306_v42 = vmul.f32 -0.006040975, %v8064_v44  ;;  %v8077_v21 = vadd.f32 %v3211_v14, %v3211_v14  ;;  %v3150_v60 = vadd.f32 0.5, %v3116_v1 }
 0x434   : > { %v3336_v23 = vadd.f32 0.08060466, %v3304_v37  ;;  %v3305_v25 = vmul.f32 -0.006040975, %v8070_v9  ;;  %v3180_v48 = vfloor.f32 %v3148_v8  ;;  %v3149_v7 = vadd.f32 0.5, %v3005_v30 }
 0x435   : > { %v3338_v49 = vadd.f32 0.08060466, %v3306_v42  ;;  %v8082_v4 = vmul.f32 %v8077_v21, %v8077_v21  ;;  %v3182_v47 = vfloor.f32 %v3150_v60  ;;  %v3118_v54 = vadd.f32 %v7733_v58, %v2868_v53 }
 0x436   : > { %v3368_v59 = vmul.f32 %v3336_v23, %v8057_v50  ;;  %v3337_v34 = vadd.f32 0.08060466, %v3305_v25  ;;  %v3212_v22 = vsub.f32 %v3003_v26, %v3180_v48  ;;  %v3181_v3 = vfloor.f32 %v3149_v7 }
 0x437   : > { %v3370_v32 = vmul.f32 %v3338_v49, %v8064_v44  ;;  %v3307_v57 = vmul.f32 -0.006040975, %v8082_v4  ;;  %v3214_v28 = vsub.f32 %v3116_v1, %v3182_v47  ;;  %v3151_v52 = vadd.f32 0.5, %v3118_v54 }
 0x438   : > { %v3400_v61 = vadd.f32 -0.5983973, %v3368_v59  ;;  %v3369_v5 = vmul.f32 %v3337_v34, %v8070_v9  ;;  %v8089_v18 = vadd.f32 %v3212_v22, %v3212_v22  ;;  %v3213_v6 = vsub.f32 %v3005_v30, %v3181_v3 }
 0x439   : > { %v3402_v19 = vadd.f32 -0.5983973, %v3370_v32  ;;  %v3339_v51 = vadd.f32 0.08060466, %v3307_v57  ;;  %v8091_v58 = vadd.f32 %v3214_v28, %v3214_v28  ;;  %v3183_v53 = vfloor.f32 %v3151_v52 }
 0x43a   : > { %v3432_v26 = vmul.f32 %v3400_v61, %v8057_v50  ;;  %v3401_v45 = vadd.f32 -0.5983973, %v3369_v5  ;;  %v8096_v14 = vmul.f32 %v8089_v18, %v8089_v18  ;;  %v8098_v1 = vadd.f32 %v3213_v6, %v3213_v6 }
 0x43b   : > { %v3434_v37 = vmul.f32 %v3402_v19, %v8064_v44  ;;  %v3371_v8 = vmul.f32 %v3339_v51, %v8082_v4  ;;  %v8104_v30 = vmul.f32 %v8091_v58, %v8091_v58  ;;  %v3215_v42 = vsub.f32 %v3118_v54, %v3183_v53 }
 0x43c   : > { %v3464_v60 = vadd.f32 2.5499265, %v3432_v26  ;;  %v3433_v23 = vmul.f32 %v3401_v45, %v8070_v9  ;;  %v3308_v25 = vmul.f32 -0.006040975, %v8096_v14  ;;  %v8110_v48 = vmul.f32 %v8098_v1, %v8098_v1 }
 0x43d   : > { %v3466_v7 = vadd.f32 2.5499265, %v3434_v37  ;;  %v3403_v49 = vadd.f32 -0.5983973, %v3371_v8  ;;  %v3310_v47 = vmul.f32 -0.006040975, %v8104_v30  ;;  %v8113_v59 = vadd.f32 %v3215_v42, %v3215_v42 }
 0x43e   : > { %v3496_v34 = vmul.f32 %v3464_v60, %v8057_v50  ;;  %v3465_v22 = vadd.f32 2.5499265, %v3433_v23  ;;  %v3340_v3 = vadd.f32 0.08060466, %v3308_v25  ;;  %v3309_v54 = vmul.f32 -0.006040975, %v8110_v48 }
 0x43f   : > { %v3498_v32 = vmul.f32 %v3466_v7, %v8064_v44  ;;  %v3435_v57 = vmul.f32 %v3403_v49, %v8082_v4  ;;  %v3342_v28 = vadd.f32 0.08060466, %v3310_v47  ;;  %v8121_v52 = vmul.f32 %v8113_v59, %v8113_v59 }
 0x440   : > { %v3528_v61 = vadd.f32 -5.167685, %v3496_v34  ;;  %v3497_v5 = vmul.f32 %v3465_v22, %v8070_v9  ;;  %v3372_v6 = vmul.f32 %v3340_v3, %v8096_v14  ;;  %v3341_v19 = vadd.f32 0.08060466, %v3309_v54 }
 0x441   : > { %v3530_v51 = vadd.f32 -5.167685, %v3498_v32  ;;  %v3467_v53 = vadd.f32 2.5499265, %v3435_v57  ;;  %v3374_v26 = vmul.f32 %v3342_v28, %v8104_v30  ;;  %v3311_v45 = vmul.f32 -0.006040975, %v8121_v52 }
 0x442   : > { %v3560_v37 = vmul.f32 %v3528_v61, %v8057_v50  ;;  %v3529_v8 = vadd.f32 -5.167685, %v3497_v5  ;;  %v3404_v42 = vadd.f32 -0.5983973, %v3372_v6  ;;  %v3373_v60 = vmul.f32 %v3341_v19, %v8110_v48 }
 0x443   : > { %v3562_v23 = vmul.f32 %v3530_v51, %v8064_v44  ;;  %v3499_v25 = vmul.f32 %v3467_v53, %v8082_v4  ;;  %v3406_v7 = vadd.f32 -0.5983973, %v3374_v26  ;;  %v3343_v49 = vadd.f32 0.08060466, %v3311_v45  ;;  %v8579_v53 = vld [vmem:[#allocation2_spill] sm:$0xff] }
 0x444   : > { %v3592_v47 = vadd.f32 3.1415918, %v3560_v37  ;;  %v3561_v34 = vmul.f32 %v3529_v8, %v8070_v9  ;;  %v3436_v22 = vmul.f32 %v3404_v42, %v8096_v14  ;;  %v3405_v3 = vadd.f32 -0.5983973, %v3373_v60  ;;  %v8580_v42 = vld [vmem:[#allocation3_spill] sm:$0xff] }
 0x445   : > { %v3594_v54 = vadd.f32 3.1415918, %v3562_v23  ;;  %v3531_v32 = vadd.f32 -5.167685, %v3499_v25  ;;  %v3438_v50 = vmul.f32 %v3406_v7, %v8104_v30  ;;  %v3375_v57 = vmul.f32 %v3343_v49, %v8121_v52  ;;  %v8581_v7 = vld [vmem:[#allocation31_spill] sm:$0xff] }
 0x446   : > { %v3624_v28 = vmul.f32 %v3592_v47, %v8044_v0  ;;  %v3593_v61 = vadd.f32 3.1415918, %v3561_v34  ;;  %v3468_v44 = vadd.f32 2.5499265, %v3436_v22  ;;  %v3437_v5 = vmul.f32 %v3405_v3, %v8110_v48  ;;  %v8582_v47 = vld [vmem:[#allocation34_spill] sm:$0xff] }
 0x447   : > { %v3626_v6 = vmul.f32 %v3594_v54, %v8050_v12  ;;  %v3563_v19 = vmul.f32 %v3531_v32, %v8082_v4  ;;  %v3470_v9 = vadd.f32 2.5499265, %v3438_v50  ;;  %v3407_v51 = vadd.f32 -0.5983973, %v3375_v57  ;;  %v8583_v54 = vld [vmem:[#allocation32_spill] sm:$0xff] }
 0x448   : > { %v8140_v26 = vadd.f32 %v3624_v28, %v8579_v53  ;;  %v3625_v45 = vmul.f32 %v3593_v61, %v8059_v62  ;;  %v3500_v37 = vmul.f32 %v3468_v44, %v8096_v14  ;;  %v3469_v8 = vadd.f32 2.5499265, %v3437_v5  ;;  %v8584_v61 = vld [vmem:[#allocation33_spill] sm:$0xff] }
 0x449   : > { %v8145_v0 = vadd.f32 %v3626_v6, %v8580_v42  ;;  %v3595_v60 = vadd.f32 3.1415918, %v3563_v19  ;;  %v3502_v23 = vmul.f32 %v3470_v9, %v8104_v30  ;;  %v3439_v12 = vmul.f32 %v3407_v51, %v8121_v52  ;;  %v8585_v19 = vld [vmem:[#allocation35_spill] sm:$0xff] }
 0x44a   : > { %v3532_v25 = vadd.f32 -5.167685, %v3500_v37  ;;  %v3501_v4 = vmul.f32 %v3469_v8, %v8110_v48  ;;  %v3633_v49 = vadd.f32 %v7742_v56, %v8581_v7  ;;  %v3637_v62 = vadd.f32 %v7769_v29, %v8582_v47  ;;  %v8587_v37 = vld [vmem:[#allocation36_spill] sm:$0xff]  ;;  %v8595_v47 = vld [vmem:[#allocation13_spill] sm:$0xff] }
 0x44b   : > { %v3627_v34 = vmul.f32 %v3595_v60, %v8077_v21  ;;  %v3534_v22 = vadd.f32 -5.167685, %v3502_v23  ;;  %v3471_v3 = vadd.f32 2.5499265, %v3439_v12  ;;  %v3635_v32 = vadd.f32 %v7749_v40, %v8583_v54 }
 0x44c   : > { %v3564_v50 = vmul.f32 %v3532_v25, %v8096_v14  ;;  %v3533_v57 = vadd.f32 -5.167685, %v3501_v4  ;;  %v5043_v28 = vpack.c.bf16 %v3637_v62, %v3633_v49  ;;  %v3639_v44 = vadd.f32 %v7775_v13, %v8584_v61  ;;  %v8590_v25 = vld [vmem:[#allocation7_spill] sm:$0xff]  ;;  %v8591_v4 = vld [vmem:[#allocation6_spill] sm:$0xff]  ;;  %v8602_v61 = vld [vmem:[#allocation25_spill] sm:$0xff] }
 0x44d   : > { %v3566_v5 = vmul.f32 %v3534_v22, %v8104_v30  ;;  %v3503_v56 = vmul.f32 %v3471_v3, %v8121_v52  ;;  %v5045_v29 = vpack.c.bf16 %v7766_v36, %v7746_v41  ;;  %v5061_v21 = vpack.c.bf16 %v7772_v31, %v7753_v27  ;;  %v8586_v30 = vld [vmem:[#allocation37_spill] sm:$0xff]  ;;  %v8588_v31 = vld [vmem:[#allocation4_spill] sm:$0xff]  ;;  %v8596_v3 = vld [vmem:[#allocation11_spill] sm:$0xff] }
 0x44e   : > { %v3596_v6 = vadd.f32 3.1415918, %v3564_v50  ;;  %v3565_v40 = vmul.f32 %v3533_v57, %v8110_v48  ;;  %5044 = vmatprep.subr.bf16.mxu0 %v5043_v28  ;;  %v5059_v14 = vpack.c.bf16 %v3639_v44, %v3635_v32  ;;  %v3641_v9 = vadd.f32 %v7882_v24, %v8585_v19  ;;  %v8598_v57 = vld [vmem:[#allocation14_spill] sm:$0xff]  ;;  %v8603_v44 = vld [vmem:[#allocation27_spill] sm:$0xff] }
 0x44f   : > { %v3598_v51 = vadd.f32 3.1415918, %v3566_v5  ;;  %v3535_v13 = vadd.f32 -5.167685, %v3503_v56  ;;  %5046 = vmatpush1.bf16.msra.mxu0 %v5045_v29  ;;  %v3645_v53 = vadd.f32 %v7907_v16, %v8586_v30  ;;  %v3643_v41 = vadd.f32 %v7886_v33, %v8587_v37  ;;  %v8589_v33 = vld [vmem:[#allocation5_spill] sm:$0xff]  ;;  %v8606_v29 = vld [vmem:[#allocation44_spill] sm:$0xff] }
 0x450   : > { %v3628_v36 = vmul.f32 %v3596_v6, %v8089_v18  ;;  %v3597_v27 = vadd.f32 3.1415918, %v3565_v40  ;;  %5060 = vmatprep.subr.bf16.mxu1 %v5059_v14  ;;  %v3647_v48 = vadd.f32 %v7914_v11, %v8588_v31  ;;  %v5049_v8 = vpack.c.bf16 %v7904_v17, %v7877_v38  ;;  %v8592_v17 = vld [vmem:[#allocation8_spill] sm:$0xff]  ;;  %v8604_v5 = vld [vmem:[#allocation29_spill] sm:$0xff]  ;;  %v8609_v14 = vld [vmem:[#allocation19_spill] sm:$0xff] }
 0x451   : > { %v3630_v24 = vmul.f32 %v3598_v51, %v8091_v58  ;;  %v3567_v42 = vmul.f32 %v3535_v13, %v8121_v52  ;;  %5062 = vmatpush1.bf16.msra.mxu1 %v5061_v21  ;;  %v5047_v60 = vpack.c.bf16 %v3645_v53, %v3641_v9  ;;  %v5065_v16 = vpack.c.bf16 %v7911_v15, %v7891_v55  ;;  %v8593_v52 = vld [vmem:[#allocation9_spill] sm:$0xff]  ;;  %v8594_v55 = vld [vmem:[#allocation10_spill] sm:$0xff]  ;;  %v3674_v21 = vld [vmem:[%s8403_s2 + $0xd0] sm:$0xff] }
 0x452   : > { %v3660_v23 = vadd.f32 %v3628_v36, %v8589_v33  ;;  %v3629_v18 = vmul.f32 %v3597_v27, %v8098_v1  ;;  %v5063_v12 = vpack.c.bf16 %v3647_v48, %v3643_v41  ;;  %v3649_v11 = vadd.f32 %v8024_v2, %v8590_v25  ;;  %v8607_v6 = vld [vmem:[#allocation28_spill] sm:$0xff]  ;;  %v8610_v19 = vld [vmem:[#allocation30_spill] sm:$0xff]  ;;  %v3675_v9 = vld [vmem:[%s8403_s2 + $0xd8] sm:$0xff] }
 0x453   : > { %v3662_v7 = vadd.f32 %v3630_v24, %v8591_v4  ;;  %v3599_v38 = vadd.f32 3.1415918, %v3567_v42  ;;  %5048 = vmatprep.subr.bf16.mxu0 %v5047_v60  ;;  %v3653_v58 = vadd.f32 %v8042_v63, %v8592_v17  ;;  %v3651_v49 = vadd.f32 %v8028_v39, %v8593_v52  ;;  %v8597_v39 = vld [vmem:[#allocation12_spill] sm:$0xff]  ;;  %v8611_v51 = vld [vmem:[#allocation18_spill] sm:$0xff]  ;;  %v8613_v30 = vld [vmem:[#allocation23_spill] sm:$0xff] }
 0x454   : > { %5064 = vmatprep.subr.bf16.mxu1 %v5063_v12  ;;  %5050 = vmatpush1.bf16.msra.mxu0 %v5049_v8  ;;  %v3655_v15 = vadd.f32 %v8074_v20, %v8594_v55  ;;  %v5053_v1 = vpack.c.bf16 %v8047_v46, %v8015_v43  ;;  %v5069_v2 = vpack.c.bf16 %v8053_v35, %v8020_v10  ;;  %v1962_v62 = vadd.f32 0.99999946, %v8595_v47  ;;  %v8608_v40 = vld [vmem:[#allocation20_spill] sm:$0xff]  ;;  %v8614_v53 = vld [vmem:[#allocation21_spill] sm:$0xff]  ;;  %v3676_v37 = vld [vmem:[%s8403_s2 + $0xe0] sm:$0xff] }
 0x455   : > { %v3631_v22 = vmul.f32 %v3599_v38, %v8113_v59  ;;  %5066 = vmatpush1.bf16.msra.mxu1 %v5065_v16  ;;  %v5051_v63 = vpack.c.bf16 %v3653_v58, %v3649_v11  ;;  %v3657_v54 = vadd.f32 %v3625_v45, %v8596_v3  ;;  %v3661_v32 = vadd.f32 %v3629_v18, %v8597_v39  ;;  %v3672_v59 = vld [vmem:[%s8403_s2 + $0xc0] sm:$0xff]  ;;  %v8612_v13 = vld [vmem:[#allocation24_spill] sm:$0xff]  ;;  %v3677_v36 = vld [vmem:[%s8403_s2 + $0xe8] sm:$0xff]  ;;  %v4191_v11 = vpop.permute.xlu0 %4190  ;;  %v4196_v38 = vpop.permute.xlu1 %4195 }
 0x456   : > { %v5067_v50 = vpack.c.bf16 %v3655_v15, %v3651_v49  ;;  %v3659_v28 = vadd.f32 %v3627_v34, %v8598_v57  ;;  %v5057_v20 = vpack.c.bf16 %v3660_v23, %v8140_v26  ;;  %v5073_v43 = vpack.c.bf16 %v3662_v7, %v8145_v0  ;;  %v8599_v45 = vld [vmem:[#allocation42_spill] sm:$0xff]  ;;  %v8601_v0 = vld [vmem:[#allocation43_spill] sm:$0xff]  ;;  %v3678_v27 = vld [vmem:[%s8403_s2 + $0xf0] sm:$0xff] }
 0x457   : > { %5052 = vmatprep.subr.bf16.mxu0 %v5051_v63  ;;  %v5055_v46 = vpack.c.bf16 %v3661_v32, %v3657_v54  ;;  %v3663_v10 = vadd.f32 %v3631_v22, %v1962_v62  ;;  %v8600_v26 = vld [vmem:[#allocation26_spill] sm:$0xff]  ;;  %v3673_v34 = vld [vmem:[%s8403_s2 + $0xc8] sm:$0xff]  ;;  %v8605_v56 = vmov 0.0   ;;  %v3679_v31 = vld [vmem:[%s8403_s2 + $0xf8] sm:$0xff] }
 0x458   : > { %5068 = vmatprep.subr.bf16.mxu1 %v5067_v50  ;;  %5054 = vmatpush1.bf16.msra.mxu0 %v5053_v1  ;;  %v8615_v41 = vld [vmem:[#allocation22_spill] sm:$0xff]  ;;  %v3665_v8 = vld [vmem:[%s8403_s2 + $0x88] sm:$0xff]  ;;  %v3666_v24 = vld [vmem:[%s8403_s2 + $0x90] sm:$0xff] }
 0x459   : > { %5070 = vmatpush1.bf16.msra.mxu1 %v5069_v2  ;;  %5056 = vmatprep.subr.bf16.mxu0 %v5055_v46  ;;  %v5071_v35 = vpack.c.bf16 %v3663_v10, %v3659_v28  ;;  %v3664_v48 = vld [vmem:[%s8403_s2 + $0x80] sm:$0xff]  ;;  %v3667_v42 = vld [vmem:[%s8403_s2 + $0x98] sm:$0xff]  ;;  %v3669_v16 = vld [vmem:[%s8403_s2 + $0xa8] sm:$0xff] }
 0x45a   : > { %v3668_v60 = vld [vmem:[%s8403_s2 + $0xa0] sm:$0xff]  ;;  %v3670_v33 = vld [vmem:[%s8403_s2 + $0xb0] sm:$0xff]  ;;  %v3671_v23 = vld [vmem:[%s8403_s2 + $0xb8] sm:$0xff] }
 0x45b   : > { %5072 = vmatprep.subr.bf16.mxu1 %v5071_v35  ;;  %v4201_v35 = vpop.permute.xlu0 %4200 }
 0x45c   : > { %5058 = vmatpush1.bf16.msra.mxu0 %v5057_v20 }
 0x45d   : > { %5074 = vmatpush1.bf16.msra.mxu1 %v5073_v43  ;;  %5076 = vmatprep.subr.bf16.mxu0 %v8599_v45 }
 0x45e   : > { %5092 = vmatprep.subr.bf16.mxu1 %v8600_v26 }
 0x45f   : > { %4923 = vmatmul.mubr.msk.f32.vlgmr.msra.gmra.mrb[64].mxu0 %vm2019_vm1, %v3672_v59 }
 0x460   : > { %4931 = vmatmul.mubr.msk.f32.vlgmr.msra.gmra.mrb[64].mxu1 %vm2019_vm1, %v3672_v59  ;;  %5078 = vmatpush1.bf16.msra.mxu0 %v8601_v0 }
 0x461   : > { %5094 = vmatpush1.bf16.msra.mxu1 %v8602_v61  ;;  %5080 = vmatprep.subr.bf16.mxu0 %v8603_v44  ;;  %v4206_v61 = vpop.permute.xlu1 %4205 }
 0x462   : > { %5096 = vmatprep.subr.bf16.mxu1 %v8604_v5  ;;  %3774 = vmatprep.mubr.f32.mxu0 %v8605_v56 }
 0x463   : > { %3887 = vmatprep.mubr.f32.mxu1 %v8605_v56  ;;  %4924 = vmatmul.mubr.msk.f32.gmra.mrb[66].mxu0 %vm2019_vm1, %v3673_v34 }
 0x464   : > { %4932 = vmatmul.mubr.msk.f32.gmra.mrb[66].mxu1 %vm2019_vm1, %v3673_v34  ;;  %5082 = vmatpush1.bf16.msra.mxu0 %v8606_v29 }
 0x465   : > { %5098 = vmatpush1.bf16.msra.mxu1 %v8607_v6  ;;  %5084 = vmatprep.subr.bf16.mxu0 %v8608_v40 }
 0x466   : > { %5100 = vmatprep.subr.bf16.mxu1 %v8609_v14  ;;  %3780 = vmatprep.mubr.f32.mxu0 %v8605_v56 }
 0x467   : > { %3893 = vmatprep.mubr.f32.mxu1 %v8605_v56  ;;  %4925 = vmatmul.mubr.msk.f32.gmra.mrb[68].mxu0 %vm2019_vm1, %v3674_v21 }
 0x468   : > { %4933 = vmatmul.mubr.msk.f32.gmra.mrb[68].mxu1 %vm2019_vm1, %v3674_v21  ;;  %5086 = vmatpush1.bf16.msra.mxu0 %v8610_v19 }
 0x469   : > { %5102 = vmatpush1.bf16.msra.mxu1 %v8611_v51  ;;  %5088 = vmatprep.subr.bf16.mxu0 %v8612_v13 }
 0x46a   : > { %5104 = vmatprep.subr.bf16.mxu1 %v8613_v30  ;;  %3786 = vmatprep.mubr.f32.mxu0 %v8605_v56 }
 0x46b   : > { %3899 = vmatprep.mubr.f32.mxu1 %v8605_v56  ;;  %4926 = vmatmul.mubr.msk.f32.gmra.mrb[70].mxu0 %vm2019_vm1, %v3675_v9 }
 0x46c   : > { %4934 = vmatmul.mubr.msk.f32.gmra.mrb[70].mxu1 %vm2019_vm1, %v3675_v9  ;;  %5090 = vmatpush1.bf16.msra.mxu0 %v8614_v53 }
 0x46d   : > { %5106 = vmatpush1.bf16.msra.mxu1 %v8615_v41  ;;  %3792 = vmatprep.mubr.f32.mxu0 %v8605_v56 }
 0x46e   : > { %3905 = vmatprep.mubr.f32.mxu1 %v8605_v56 }
 0x46f   : > { %4927 = vmatmul.mubr.msk.f32.gmra.mrb[72].mxu0 %vm2019_vm1, %v3676_v37 }
 0x470   : > { %4935 = vmatmul.mubr.msk.f32.gmra.mrb[72].mxu1 %vm2019_vm1, %v3676_v37  ;;  %3798 = vmatprep.mubr.f32.mxu0 %v8605_v56 }
 0x471   : > { %3911 = vmatprep.mubr.f32.mxu1 %v8605_v56 }
 0x473   : > { %4928 = vmatmul.mubr.msk.f32.gmra.mrb[74].mxu0 %vm2019_vm1, %v3677_v36 }
 0x474   : > { %4936 = vmatmul.mubr.msk.f32.gmra.mrb[74].mxu1 %vm2019_vm1, %v3677_v36  ;;  %3804 = vmatprep.mubr.f32.mxu0 %v8605_v56 }
 0x475   : > { %3917 = vmatprep.mubr.f32.mxu1 %v8605_v56 }
 0x477   : > { %4929 = vmatmul.mubr.msk.f32.gmra.mrb[76].mxu0 %vm2019_vm1, %v3678_v27 }
 0x478   : > { %4937 = vmatmul.mubr.msk.f32.gmra.mrb[76].mxu1 %vm2019_vm1, %v3678_v27  ;;  %3810 = vmatprep.mubr.f32.mxu0 %v8605_v56 }
 0x479   : > { %3923 = vmatprep.mubr.f32.mxu1 %v8605_v56 }
 0x47b   : > { %4930 = vmatmul.mubr.msk.f32.gmra.mrb[78].mxu0 %vm2019_vm1, %v3679_v31 }
 0x47c   : > { %4938 = vmatmul.mubr.msk.f32.gmra.mrb[78].mxu1 %vm2019_vm1, %v3679_v31  ;;  %4018 = vmatprep.mubr.f32.mxu0 %v8605_v56 }
 0x47d   : > { %4131 = vmatprep.mubr.f32.mxu1 %v8605_v56 }
 0x47f   : > { %4939 = vmatmul.mubr.msk.f32.vlgmr.msra.gmra.mrb[64].mxu0 %vm2019_vm1, %v3664_v48 }
 0x480   : > { %4947 = vmatmul.mubr.msk.f32.vlgmr.msra.gmra.mrb[64].mxu1 %vm2019_vm1, %v3664_v48  ;;  %4024 = vmatprep.mubr.f32.mxu0 %v8605_v56 }
 0x481   : > { %4137 = vmatprep.mubr.f32.mxu1 %v8605_v56 }
 0x483   : > { %4940 = vmatmul.mubr.msk.f32.gmra.mrb[66].mxu0 %vm2019_vm1, %v3665_v8 }
 0x484   : > { %4948 = vmatmul.mubr.msk.f32.gmra.mrb[66].mxu1 %vm2019_vm1, %v3665_v8  ;;  %4030 = vmatprep.mubr.f32.mxu0 %v8605_v56 }
 0x485   : > { %4143 = vmatprep.mubr.f32.mxu1 %v8605_v56 }
 0x487   : > { %4941 = vmatmul.mubr.msk.f32.gmra.mrb[68].mxu0 %vm2019_vm1, %v3666_v24 }
 0x488   : > { %4949 = vmatmul.mubr.msk.f32.gmra.mrb[68].mxu1 %vm2019_vm1, %v3666_v24  ;;  %4036 = vmatprep.mubr.f32.mxu0 %v8605_v56 }
 0x489   : > { %4149 = vmatprep.mubr.f32.mxu1 %v8605_v56 }
 0x48b   : > { %4942 = vmatmul.mubr.msk.f32.gmra.mrb[70].mxu0 %vm2019_vm1, %v3667_v42 }
 0x48c   : > { %4950 = vmatmul.mubr.msk.f32.gmra.mrb[70].mxu1 %vm2019_vm1, %v3667_v42  ;;  %4042 = vmatprep.mubr.f32.mxu0 %v8605_v56 }
 0x48d   : > { %4155 = vmatprep.mubr.f32.mxu1 %v8605_v56 }
 0x48f   : > { %4943 = vmatmul.mubr.msk.f32.gmra.mrb[72].mxu0 %vm2019_vm1, %v3668_v60 }
 0x490   : > { %4951 = vmatmul.mubr.msk.f32.gmra.mrb[72].mxu1 %vm2019_vm1, %v3668_v60  ;;  %4048 = vmatprep.mubr.f32.mxu0 %v8605_v56 }
 0x491   : > { %4161 = vmatprep.mubr.f32.mxu1 %v8605_v56 }
 0x493   : > { %4944 = vmatmul.mubr.msk.f32.gmra.mrb[74].mxu0 %vm2019_vm1, %v3669_v16 }
 0x494   : > { %4952 = vmatmul.mubr.msk.f32.gmra.mrb[74].mxu1 %vm2019_vm1, %v3669_v16  ;;  %4054 = vmatprep.mubr.f32.mxu0 %v8605_v56  ;;  %v4211_v16 = vpop.permute.xlu0 %4210 }
 0x495   : > { %4167 = vmatprep.mubr.f32.mxu1 %v8605_v56 }
 0x497   : > { %4945 = vmatmul.mubr.msk.f32.gmra.mrb[76].mxu0 %vm2019_vm1, %v3670_v33 }
 0x498   : > { %4953 = vmatmul.mubr.msk.f32.gmra.mrb[76].mxu1 %vm2019_vm1, %v3670_v33  ;;  %4060 = vmatprep.mubr.f32.mxu0 %v8605_v56 }
 0x499   : > { %4173 = vmatprep.mubr.f32.mxu1 %v8605_v56 }
 0x49b   : > { %4946 = vmatmul.mubr.msk.f32.gmra.mrb[78].mxu0 %vm2019_vm1, %v3671_v23 }
 0x49c   : > { %4954 = vmatmul.mubr.msk.f32.gmra.mrb[78].mxu1 %vm2019_vm1, %v3671_v23  ;;  %4436 = vmatprep.mubr.f32.mxu0 %v8605_v56 }
 0x49d   : > { %4549 = vmatprep.mubr.f32.mxu1 %v8605_v56 }
 0x552   : > { %v4020_v18 = vpop.f32.mrb[64].mxu0 }
 0x553   : > { %v4133_v12 = vpop.f32.mrb[64].mxu1  ;;  %v4022_v25 = vpop.f32.mrb[65].mxu0  ;;  %v4228_v7 = vadd.f32 %v4191_v11, %v4020_v18 }
 0x554   : > { %v4135_v4 = vpop.f32.mrb[65].mxu1  ;;  %v4230_v17 = vadd.f32 %v4191_v11, %v4133_v12  ;;  %v4229_v58 = vadd.f32 %v4191_v11, %v4022_v25 }
 0x555   : > { %v4231_v49 = vadd.f32 %v4191_v11, %v4135_v4  ;;  %v4260_v22 = vmax.f32 %v4228_v7, 0.0  ;;  %v4216_v11 = vpop.permute.xlu1 %4215 }
 0x556   : > { %v4026_v52 = vpop.f32.mrb[66].mxu0  ;;  %v4262_v54 = vmax.f32 %v4230_v17, 0.0  ;;  %v4261_v39 = vmax.f32 %v4229_v58, 0.0 }
 0x557   : > { %v4232_v55 = vadd.f32 %v4196_v38, %v4026_v52  ;;  %v4139_v15 = vpop.f32.mrb[66].mxu1  ;;  %v4028_v1 = vpop.f32.mrb[67].mxu0  ;;  %v4263_v28 = vmax.f32 %v4231_v49, 0.0 }
 0x558   : > { %v4234_v2 = vadd.f32 %v4196_v38, %v4139_v15  ;;  %v4233_v47 = vadd.f32 %v4196_v38, %v4028_v1  ;;  %v4141_v62 = vpop.f32.mrb[67].mxu1 }
 0x559   : > { %v4264_v63 = vmax.f32 %v4232_v55, 0.0  ;;  %v4235_v3 = vadd.f32 %v4196_v38, %v4141_v62 }
 0x55a   : > { %v4266_v32 = vmax.f32 %v4234_v2, 0.0  ;;  %v4265_v50 = vmax.f32 %v4233_v47, 0.0  ;;  %v4032_v57 = vpop.f32.mrb[68].mxu0 }
 0x55b   : > { %v5109_v20 = vpack.c.bf16 %v4264_v63, %v4260_v22  ;;  %v4267_v43 = vmax.f32 %v4235_v3, 0.0  ;;  %v4145_v46 = vpop.f32.mrb[68].mxu1  ;;  %v4034_v10 = vpop.f32.mrb[69].mxu0  ;;  %v4236_v34 = vadd.f32 %v4201_v35, %v4032_v57 }
 0x55c   : > { %v5125_v59 = vpack.c.bf16 %v4266_v32, %v4262_v54  ;;  %v5107_v45 = vpack.c.bf16 %v4265_v50, %v4261_v39  ;;  %v4147_v26 = vpop.f32.mrb[69].mxu1  ;;  %v4238_v44 = vadd.f32 %v4201_v35, %v4145_v46  ;;  %v4237_v5 = vadd.f32 %v4201_v35, %v4034_v10 }
 0x55d   : > { %v5123_v0 = vpack.c.bf16 %v4267_v43, %v4263_v28  ;;  %v4239_v21 = vadd.f32 %v4201_v35, %v4147_v26  ;;  %v4268_v13 = vmax.f32 %v4236_v34, 0.0  ;;  %v4221_v43 = vpop.permute.xlu0 %4220  ;;  %v4226_v26 = vpop.permute.xlu1 %4225 }
 0x55e   : > { %v4038_v29 = vpop.f32.mrb[70].mxu0  ;;  %5108 = vmatprep.subr.bf16.mxu0 %v5107_v45  ;;  %v4270_v37 = vmax.f32 %v4238_v44, 0.0  ;;  %v4269_v41 = vmax.f32 %v4237_v5, 0.0 }
 0x55f   : > { %v4240_v6 = vadd.f32 %v4206_v61, %v4038_v29  ;;  %v4151_v40 = vpop.f32.mrb[70].mxu1  ;;  %5124 = vmatprep.subr.bf16.mxu1 %v5123_v0  ;;  %v4040_v14 = vpop.f32.mrb[71].mxu0  ;;  %5110 = vmatpush1.bf16.msra.mxu0 %v5109_v20  ;;  %v4271_v48 = vmax.f32 %v4239_v21, 0.0 }
 0x560   : > { %v4242_v19 = vadd.f32 %v4206_v61, %v4151_v40  ;;  %v4241_v9 = vadd.f32 %v4206_v61, %v4040_v14  ;;  %v4153_v51 = vpop.f32.mrb[71].mxu1  ;;  %5126 = vmatpush1.bf16.msra.mxu1 %v5125_v59 }
 0x561   : > { %v4272_v30 = vmax.f32 %v4240_v6, 0.0  ;;  %v4243_v53 = vadd.f32 %v4206_v61, %v4153_v51 }
 0x562   : > { %v4274_v36 = vmax.f32 %v4242_v19, 0.0  ;;  %v4273_v27 = vmax.f32 %v4241_v9, 0.0  ;;  %v4044_v31 = vpop.f32.mrb[72].mxu0 }
 0x563   : > { %v5113_v8 = vpack.c.bf16 %v4272_v30, %v4268_v13  ;;  %v4275_v24 = vmax.f32 %v4243_v53, 0.0  ;;  %v4157_v42 = vpop.f32.mrb[72].mxu1  ;;  %v4046_v60 = vpop.f32.mrb[73].mxu0  ;;  %v4244_v25 = vadd.f32 %v4211_v16, %v4044_v31 }
 0x564   : > { %v5129_v33 = vpack.c.bf16 %v4274_v36, %v4270_v37  ;;  %v5111_v23 = vpack.c.bf16 %v4273_v27, %v4269_v41  ;;  %v4159_v18 = vpop.f32.mrb[73].mxu1  ;;  %v4246_v4 = vadd.f32 %v4211_v16, %v4157_v42  ;;  %v4245_v7 = vadd.f32 %v4211_v16, %v4046_v60  ;;  %v4293_v42 = vld [vmem:[%s8403_s2 + $0x108] sm:$0xff]  ;;  %v4294_v60 = vld [vmem:[%s8403_s2 + $0x110] sm:$0xff] }
 0x565   : > { %v5127_v12 = vpack.c.bf16 %v4275_v24, %v4271_v48  ;;  %v4247_v17 = vadd.f32 %v4211_v16, %v4159_v18  ;;  %v4276_v2 = vmax.f32 %v4244_v25, 0.0  ;;  %v4292_v24 = vld [vmem:[%s8403_s2 + $0x100] sm:$0xff]  ;;  %v4295_v16 = vld [vmem:[%s8403_s2 + $0x118] sm:$0xff]  ;;  %v4298_v18 = vld [vmem:[%s8403_s2 + $0x130] sm:$0xff] }
 0x566   : > { %v4050_v38 = vpop.f32.mrb[74].mxu0  ;;  %5112 = vmatprep.subr.bf16.mxu0 %v5111_v23  ;;  %v4278_v22 = vmax.f32 %v4246_v4, 0.0  ;;  %v4277_v63 = vmax.f32 %v4245_v7, 0.0  ;;  %v4297_v23 = vld [vmem:[%s8403_s2 + $0x128] sm:$0xff]  ;;  %v4311_v7 = vpop.permute.xlu0 %4310 }
 0x567   : > { %v4248_v58 = vadd.f32 %v4216_v11, %v4050_v38  ;;  %v4163_v52 = vpop.f32.mrb[74].mxu1  ;;  %5128 = vmatprep.subr.bf16.mxu1 %v5127_v12  ;;  %v4052_v49 = vpop.f32.mrb[75].mxu0  ;;  %5114 = vmatpush1.bf16.msra.mxu0 %v5113_v8  ;;  %v4279_v32 = vmax.f32 %v4247_v17, 0.0  ;;  %v4299_v12 = vld [vmem:[%s8403_s2 + $0x138] sm:$0xff] }
 0x568   : > { %v4250_v55 = vadd.f32 %v4216_v11, %v4163_v52  ;;  %v4249_v15 = vadd.f32 %v4216_v11, %v4052_v49  ;;  %v4165_v1 = vpop.f32.mrb[75].mxu1  ;;  %5130 = vmatpush1.bf16.msra.mxu1 %v5129_v33  ;;  %v4296_v33 = vld [vmem:[%s8403_s2 + $0x120] sm:$0xff] }
 0x569   : > { %v4280_v47 = vmax.f32 %v4248_v58, 0.0  ;;  %v4251_v62 = vadd.f32 %v4216_v11, %v4165_v1  ;;  %v4316_v58 = vpop.permute.xlu1 %4315 }
 0x56a   : > { %v4282_v3 = vmax.f32 %v4250_v55, 0.0  ;;  %v4281_v54 = vmax.f32 %v4249_v15, 0.0  ;;  %v4056_v39 = vpop.f32.mrb[76].mxu0 }
 0x56b   : > { %v5117_v50 = vpack.c.bf16 %v4280_v47, %v4276_v2  ;;  %v4283_v57 = vmax.f32 %v4251_v62, 0.0  ;;  %v4169_v28 = vpop.f32.mrb[76].mxu1  ;;  %v4058_v20 = vpop.f32.mrb[77].mxu0  ;;  %v4252_v45 = vadd.f32 %v4221_v43, %v4056_v39 }
 0x56c   : > { %v5133_v46 = vpack.c.bf16 %v4282_v3, %v4278_v22  ;;  %v5115_v10 = vpack.c.bf16 %v4281_v54, %v4277_v63  ;;  %v4171_v35 = vpop.f32.mrb[77].mxu1  ;;  %v4254_v0 = vadd.f32 %v4221_v43, %v4169_v28  ;;  %v4253_v34 = vadd.f32 %v4221_v43, %v4058_v20 }
 0x56d   : > { %v5131_v59 = vpack.c.bf16 %v4283_v57, %v4279_v32  ;;  %v4255_v44 = vadd.f32 %v4221_v43, %v4171_v35  ;;  %v4284_v19 = vmax.f32 %v4252_v45, 0.0 }
 0x56e   : > { %v4062_v61 = vpop.f32.mrb[78].mxu0  ;;  %5116 = vmatprep.subr.bf16.mxu0 %v5115_v10  ;;  %v4286_v13 = vmax.f32 %v4254_v0, 0.0  ;;  %v4285_v30 = vmax.f32 %v4253_v34, 0.0 }
 0x56f   : > { %v4256_v5 = vadd.f32 %v4226_v26, %v4062_v61  ;;  %v4175_v29 = vpop.f32.mrb[78].mxu1  ;;  %5132 = vmatprep.subr.bf16.mxu1 %v5131_v59  ;;  %v4064_v21 = vpop.f32.mrb[79].mxu0  ;;  %5118 = vmatpush1.bf16.msra.mxu0 %v5117_v50  ;;  %v4287_v41 = vmax.f32 %v4255_v44, 0.0 }
 0x570   : > { %v4258_v6 = vadd.f32 %v4226_v26, %v4175_v29  ;;  %v4257_v40 = vadd.f32 %v4226_v26, %v4064_v21  ;;  %v4177_v14 = vpop.f32.mrb[79].mxu1  ;;  %5134 = vmatpush1.bf16.msra.mxu1 %v5133_v46  ;;  %v4321_v59 = vpop.permute.xlu0 %4320 }
 0x571   : > { %v4288_v9 = vmax.f32 %v4256_v5, 0.0  ;;  %v4259_v51 = vadd.f32 %v4226_v26, %v4177_v14  ;;  %v4326_v44 = vpop.permute.xlu1 %4325 }
 0x572   : > { %v4290_v53 = vmax.f32 %v4258_v6, 0.0  ;;  %v4289_v37 = vmax.f32 %v4257_v40, 0.0 }
 0x573   : > { %v5121_v36 = vpack.c.bf16 %v4288_v9, %v4284_v19  ;;  %v4291_v27 = vmax.f32 %v4259_v51, 0.0 }
 0x574   : > { %v5137_v31 = vpack.c.bf16 %v4290_v53, %v4286_v13  ;;  %v5119_v48 = vpack.c.bf16 %v4289_v37, %v4285_v30 }
 0x575   : > { %v5135_v8 = vpack.c.bf16 %v4291_v27, %v4287_v41 }
 0x576   : > { %5120 = vmatprep.subr.bf16.mxu0 %v5119_v48 }
 0x577   : > { %5136 = vmatprep.subr.bf16.mxu1 %v5135_v8  ;;  %5122 = vmatpush1.bf16.msra.mxu0 %v5121_v36 }
 0x578   : > { %5138 = vmatpush1.bf16.msra.mxu1 %v5137_v31 }
 0x57a   : > { %4955 = vmatmul.mubr.msk.f32.vlgmr.msra.gmra.mrb[80].mxu0 %vm2019_vm1, %v4292_v24 }
 0x57b   : > { %4963 = vmatmul.mubr.msk.f32.vlgmr.msra.gmra.mrb[80].mxu1 %vm2019_vm1, %v4292_v24  ;;  %4442 = vmatprep.mubr.f32.mxu0 %v8605_v56 }
 0x57c   : > { %4555 = vmatprep.mubr.f32.mxu1 %v8605_v56 }
 0x57e   : > { %4956 = vmatmul.mubr.msk.f32.gmra.mrb[82].mxu0 %vm2019_vm1, %v4293_v42 }
 0x57f   : > { %4964 = vmatmul.mubr.msk.f32.gmra.mrb[82].mxu1 %vm2019_vm1, %v4293_v42  ;;  %4448 = vmatprep.mubr.f32.mxu0 %v8605_v56 }
 0x580   : > { %4561 = vmatprep.mubr.f32.mxu1 %v8605_v56 }
 0x582   : > { %4957 = vmatmul.mubr.msk.f32.gmra.mrb[84].mxu0 %vm2019_vm1, %v4294_v60 }
 0x583   : > { %4965 = vmatmul.mubr.msk.f32.gmra.mrb[84].mxu1 %vm2019_vm1, %v4294_v60  ;;  %4454 = vmatprep.mubr.f32.mxu0 %v8605_v56 }
 0x584   : > { %4567 = vmatprep.mubr.f32.mxu1 %v8605_v56 }
 0x586   : > { %4958 = vmatmul.mubr.msk.f32.gmra.mrb[86].mxu0 %vm2019_vm1, %v4295_v16 }
 0x587   : > { %4966 = vmatmul.mubr.msk.f32.gmra.mrb[86].mxu1 %vm2019_vm1, %v4295_v16  ;;  %4460 = vmatprep.mubr.f32.mxu0 %v8605_v56 }
 0x588   : > { %4573 = vmatprep.mubr.f32.mxu1 %v8605_v56 }
 0x58a   : > { %4959 = vmatmul.mubr.msk.f32.gmra.mrb[88].mxu0 %vm2019_vm1, %v4296_v33 }
 0x58b   : > { %4967 = vmatmul.mubr.msk.f32.gmra.mrb[88].mxu1 %vm2019_vm1, %v4296_v33  ;;  %4466 = vmatprep.mubr.f32.mxu0 %v8605_v56  ;;  %v4331_v33 = vpop.permute.xlu0 %4330 }
 0x58c   : > { %4579 = vmatprep.mubr.f32.mxu1 %v8605_v56 }
 0x58e   : > { %4960 = vmatmul.mubr.msk.f32.gmra.mrb[90].mxu0 %vm2019_vm1, %v4297_v23 }
 0x58f   : > { %4968 = vmatmul.mubr.msk.f32.gmra.mrb[90].mxu1 %vm2019_vm1, %v4297_v23  ;;  %4472 = vmatprep.mubr.f32.mxu0 %v8605_v56 }
 0x590   : > { %4585 = vmatprep.mubr.f32.mxu1 %v8605_v56 }
 0x592   : > { %4961 = vmatmul.mubr.msk.f32.gmra.mrb[92].mxu0 %vm2019_vm1, %v4298_v18 }
 0x593   : > { %4969 = vmatmul.mubr.msk.f32.gmra.mrb[92].mxu1 %vm2019_vm1, %v4298_v18  ;;  %4478 = vmatprep.mubr.f32.mxu0 %v8605_v56 }
 0x594   : > { %4591 = vmatprep.mubr.f32.mxu1 %v8605_v56 }
 0x596   : > { %4962 = vmatmul.mubr.msk.f32.gmra.mrb[94].mxu0 %vm2019_vm1, %v4299_v12 }
 0x597   : > { %4970 = vmatmul.mubr.msk.f32.gmra.mrb[94].mxu1 %vm2019_vm1, %v4299_v12  ;;  %4704 = vmatprep.mubr.f32.mxu0 %v8605_v56 }
 0x598   : > { %4775 = vmatprep.mubr.f32.mxu1 %v8605_v56 }
 0x64d   : > { %v4438_v25 = vpop.f32.mrb[80].mxu0 }
 0x64e   : > { %v4551_v11 = vpop.f32.mrb[80].mxu1  ;;  %v4440_v4 = vpop.f32.mrb[81].mxu0  ;;  %v4439_v17 = vadd.f32 %v4438_v25, %v4311_v7 }
 0x64f   : > { %v4553_v38 = vpop.f32.mrb[81].mxu1  ;;  %v4552_v52 = vadd.f32 %v4551_v11, %v4311_v7  ;;  %v4441_v49 = vadd.f32 %v4440_v4, %v4311_v7  ;;  %v4336_v4 = vpop.permute.xlu1 %4335 }
 0x650   : > { %v4554_v15 = vadd.f32 %v4553_v38, %v4311_v7  ;;  %v4598_v3 = vmax.f32 %v4439_v17, 0.0 }
 0x651   : > { %v4444_v55 = vpop.f32.mrb[82].mxu0  ;;  %v4600_v39 = vmax.f32 %v4552_v52, 0.0  ;;  %v4599_v32 = vmax.f32 %v4441_v49, 0.0 }
 0x652   : > { %v4445_v1 = vadd.f32 %v4444_v55, %v4316_v58  ;;  %v4557_v2 = vpop.f32.mrb[82].mxu1  ;;  %v4446_v47 = vpop.f32.mrb[83].mxu0  ;;  %v4601_v20 = vmax.f32 %v4554_v15, 0.0 }
 0x653   : > { %v4558_v62 = vadd.f32 %v4557_v2, %v4316_v58  ;;  %v4447_v22 = vadd.f32 %v4446_v47, %v4316_v58  ;;  %v4559_v63 = vpop.f32.mrb[83].mxu1 }
 0x654   : > { %v4602_v54 = vmax.f32 %v4445_v1, 0.0  ;;  %v4560_v56 = vadd.f32 %v4559_v63, %v4316_v58 }
 0x655   : > { %v4604_v50 = vmax.f32 %v4558_v62, 0.0  ;;  %v4603_v57 = vmax.f32 %v4447_v22, 0.0  ;;  %v4450_v28 = vpop.f32.mrb[84].mxu0 }
 0x656   : > { %v5141_v43 = vpack.c.bf16 %v4602_v54, %v4598_v3  ;;  %v4605_v46 = vmax.f32 %v4560_v56, 0.0  ;;  %v4563_v10 = vpop.f32.mrb[84].mxu1  ;;  %v4452_v35 = vpop.f32.mrb[85].mxu0  ;;  %v4451_v61 = vadd.f32 %v4450_v28, %v4321_v59 }
 0x657   : > { %v5157_v45 = vpack.c.bf16 %v4604_v50, %v4600_v39  ;;  %v5139_v26 = vpack.c.bf16 %v4603_v57, %v4599_v32  ;;  %v4565_v0 = vpop.f32.mrb[85].mxu1  ;;  %v4564_v5 = vadd.f32 %v4563_v10, %v4321_v59  ;;  %v4453_v29 = vadd.f32 %v4452_v35, %v4321_v59 }
 0x658   : > { %v5155_v34 = vpack.c.bf16 %v4605_v46, %v4601_v20  ;;  %v4566_v6 = vadd.f32 %v4565_v0, %v4321_v59  ;;  %v4606_v30 = vmax.f32 %v4451_v61, 0.0 }
 0x659   : > { %v4456_v21 = vpop.f32.mrb[86].mxu0  ;;  %5140 = vmatprep.subr.bf16.mxu0 %v5139_v26  ;;  %v4608_v41 = vmax.f32 %v4564_v5, 0.0  ;;  %v4607_v36 = vmax.f32 %v4453_v29, 0.0  ;;  %v4346_v26 = vpop.permute.xlu1 %4345 }
 0x65a   : > { %v4457_v40 = vadd.f32 %v4456_v21, %v4326_v44  ;;  %v4569_v14 = vpop.f32.mrb[86].mxu1  ;;  %5156 = vmatprep.subr.bf16.mxu1 %v5155_v34  ;;  %v4458_v19 = vpop.f32.mrb[87].mxu0  ;;  %5142 = vmatpush1.bf16.msra.mxu0 %v5141_v43  ;;  %v4609_v8 = vmax.f32 %v4566_v6, 0.0 }
 0x65b   : > { %v4570_v9 = vadd.f32 %v4569_v14, %v4326_v44  ;;  %v4459_v51 = vadd.f32 %v4458_v19, %v4326_v44  ;;  %v4571_v13 = vpop.f32.mrb[87].mxu1  ;;  %5158 = vmatpush1.bf16.msra.mxu1 %v5157_v45  ;;  %v4341_v43 = vpop.permute.xlu0 %4340 }
 0x65c   : > { %v4610_v53 = vmax.f32 %v4457_v40, 0.0  ;;  %v4572_v37 = vadd.f32 %v4571_v13, %v4326_v44 }
 0x65d   : > { %v4612_v27 = vmax.f32 %v4570_v9, 0.0  ;;  %v4611_v31 = vmax.f32 %v4459_v51, 0.0  ;;  %v4462_v48 = vpop.f32.mrb[88].mxu0 }
 0x65e   : > { %v5145_v24 = vpack.c.bf16 %v4610_v53, %v4606_v30  ;;  %v4613_v42 = vmax.f32 %v4572_v37, 0.0  ;;  %v4575_v60 = vpop.f32.mrb[88].mxu1  ;;  %v4464_v16 = vpop.f32.mrb[89].mxu0  ;;  %v4463_v11 = vadd.f32 %v4462_v48, %v4331_v33 }
 0x65f   : > { %v5161_v23 = vpack.c.bf16 %v4612_v27, %v4608_v41  ;;  %v5143_v18 = vpack.c.bf16 %v4611_v31, %v4607_v36  ;;  %v4577_v12 = vpop.f32.mrb[89].mxu1  ;;  %v4576_v7 = vadd.f32 %v4575_v60, %v4331_v33  ;;  %v4465_v38 = vadd.f32 %v4464_v16, %v4331_v33 }
 0x660   : > { %v5159_v25 = vpack.c.bf16 %v4613_v42, %v4609_v8  ;;  %v4578_v58 = vadd.f32 %v4577_v12, %v4331_v33  ;;  %v4614_v47 = vmax.f32 %v4463_v11, 0.0  ;;  %v4635_v42 = vpop.permute.xlu0 %4634 }
 0x661   : > { %v4468_v17 = vpop.f32.mrb[90].mxu0  ;;  %5144 = vmatprep.subr.bf16.mxu0 %v5143_v18  ;;  %v4616_v63 = vmax.f32 %v4576_v7, 0.0  ;;  %v4615_v3 = vmax.f32 %v4465_v38, 0.0 }
 0x662   : > { %v4469_v52 = vadd.f32 %v4468_v17, %v4336_v4  ;;  %v4581_v49 = vpop.f32.mrb[90].mxu1  ;;  %5160 = vmatprep.subr.bf16.mxu1 %v5159_v25  ;;  %v4470_v55 = vpop.f32.mrb[91].mxu0  ;;  %5146 = vmatpush1.bf16.msra.mxu0 %v5145_v24  ;;  %v4617_v32 = vmax.f32 %v4578_v58, 0.0  ;;  %v4630_v24 = vld [vmem:[%s8404_s3] sm:$0xff] }
 0x663   : > { %v4582_v15 = vadd.f32 %v4581_v49, %v4336_v4  ;;  %v4471_v1 = vadd.f32 %v4470_v55, %v4336_v4  ;;  %v4583_v2 = vpop.f32.mrb[91].mxu1  ;;  %5162 = vmatpush1.bf16.msra.mxu1 %v5161_v23 }
 0x664   : > { %v4618_v62 = vmax.f32 %v4469_v52, 0.0  ;;  %v4584_v22 = vadd.f32 %v4583_v2, %v4336_v4 }
 0x665   : > { %v4620_v54 = vmax.f32 %v4582_v15, 0.0  ;;  %v4619_v56 = vmax.f32 %v4471_v1, 0.0  ;;  %v4474_v39 = vpop.f32.mrb[92].mxu0 }
 0x666   : > { %v5149_v50 = vpack.c.bf16 %v4618_v62, %v4614_v47  ;;  %v4621_v57 = vmax.f32 %v4584_v22, 0.0  ;;  %v4587_v28 = vpop.f32.mrb[92].mxu1  ;;  %v4476_v20 = vpop.f32.mrb[93].mxu0  ;;  %v4475_v45 = vadd.f32 %v4474_v39, %v4341_v43 }
 0x667   : > { %v5165_v46 = vpack.c.bf16 %v4620_v54, %v4616_v63  ;;  %v5147_v10 = vpack.c.bf16 %v4619_v56, %v4615_v3  ;;  %v4589_v35 = vpop.f32.mrb[93].mxu1  ;;  %v4588_v0 = vadd.f32 %v4587_v28, %v4341_v43  ;;  %v4477_v34 = vadd.f32 %v4476_v20, %v4341_v43 }
 0x668   : > { %v5163_v59 = vpack.c.bf16 %v4621_v57, %v4617_v32  ;;  %v4590_v44 = vadd.f32 %v4589_v35, %v4341_v43  ;;  %v4622_v19 = vmax.f32 %v4475_v45, 0.0 }
 0x669   : > { %v4480_v61 = vpop.f32.mrb[94].mxu0  ;;  %5148 = vmatprep.subr.bf16.mxu0 %v5147_v10  ;;  %v4624_v13 = vmax.f32 %v4588_v0, 0.0  ;;  %v4623_v30 = vmax.f32 %v4477_v34, 0.0 }
 0x66a   : > { %v4481_v5 = vadd.f32 %v4480_v61, %v4346_v26  ;;  %v4593_v29 = vpop.f32.mrb[94].mxu1  ;;  %5164 = vmatprep.subr.bf16.mxu1 %v5163_v59  ;;  %v4482_v21 = vpop.f32.mrb[95].mxu0  ;;  %5150 = vmatpush1.bf16.msra.mxu0 %v5149_v50  ;;  %v4625_v41 = vmax.f32 %v4590_v44, 0.0 }
 0x66b   : > { %v4594_v6 = vadd.f32 %v4593_v29, %v4346_v26  ;;  %v4483_v40 = vadd.f32 %v4482_v21, %v4346_v26  ;;  %v4595_v14 = vpop.f32.mrb[95].mxu1  ;;  %5166 = vmatpush1.bf16.msra.mxu1 %v5165_v46 }
 0x66c   : > { %v4626_v9 = vmax.f32 %v4481_v5, 0.0  ;;  %v4596_v51 = vadd.f32 %v4595_v14, %v4346_v26 }
 0x66d   : > { %v4628_v53 = vmax.f32 %v4594_v6, 0.0  ;;  %v4627_v37 = vmax.f32 %v4483_v40, 0.0 }
 0x66e   : > { %v5153_v36 = vpack.c.bf16 %v4626_v9, %v4622_v19  ;;  %v4629_v27 = vmax.f32 %v4596_v51, 0.0 }
 0x66f   : > { %v5169_v31 = vpack.c.bf16 %v4628_v53, %v4624_v13  ;;  %v5151_v48 = vpack.c.bf16 %v4627_v37, %v4623_v30 }
 0x670   : > { %v5167_v8 = vpack.c.bf16 %v4629_v27, %v4625_v41 }
 0x671   : > { %5152 = vmatprep.subr.bf16.mxu0 %v5151_v48 }
 0x672   : > { %5168 = vmatprep.subr.bf16.mxu1 %v5167_v8  ;;  %5154 = vmatpush1.bf16.msra.mxu0 %v5153_v36 }
 0x673   : > { %5170 = vmatpush1.bf16.msra.mxu1 %v5169_v31 }
 0x675   : > { %4971 = vmatmul.mubr.msk.f32.vlgmr.msra.gmra.mrb[96].mxu0 %vm2019_vm1, %v4630_v24 }
 0x676   : > { %4972 = vmatmul.mubr.msk.f32.vlgmr.msra.gmra.mrb[96].mxu1 %vm2019_vm1, %v4630_v24 }
 0x748   : > { %v4706_v60 = vpop.f32.mrb[96].mxu0 }
 0x749   : > { %v4707_v16 = vadd.f32 %v4706_v60, %v4635_v42  ;;  %v4777_v33 = vpop.f32.mrb[96].mxu1  ;;  %v4708_v23 = vpop.f32.mrb[97].mxu0 }
 0x74a   : > { %v4778_v18 = vadd.f32 %v4777_v33, %v4635_v42  ;;  %v4709_v12 = vadd.f32 %v4708_v23, %v4635_v42  ;;  %v4779_v25 = vpop.f32.mrb[97].mxu1 }
 0x74b   : > { %v4973_v11 = vclamps-f32 %v4707_v16, 1.0  ;;  %v4780_v4 = vadd.f32 %v4779_v25, %v4635_v42 }
 0x74c   : > { %v4975_v7 = vclamps-f32 %v4778_v18, 1.0  ;;  %v4974_v38 = vclamps-f32 %v4709_v12, 1.0 }
 0x74d   : > { %4790 = vst [vmem:[%s226_s6] sm:$0xff] %v4973_v11  ;;  %v4976_v17 = vclamps-f32 %v4780_v4, 1.0 }
 0x74e   : > { %4792 = vst [vmem:[%s226_s6 + $0x10] sm:$0xff] %v4975_v7  ;;  %4791 = vst [vmem:[%s226_s6 + $0x8] sm:$0xff] %v4974_v38 }
 0x74f   : > { %4793 = vst [vmem:[%s226_s6 + $0x18] sm:$0xff] %v4976_v17 }
 0x750 PF: > { %s15_s18 = sadd.s32 1, %s5221_s18  }
 0x751   : > { %p12_p4 = scmp.ge.s32.totalorder %s15_s18, 10  }
 0x753   :  { %14 = sbr.rel (!%p12_p4) target bundleno = 1 (0x1), region = 70 }

</bundles_post_ra>
